<compile_context>
chip_gen: v5e
topology: v5e:2x2
jax: 0.10.0
libtpu: 0.0.40
codegen_flags: <defaults>
</compile_context>

<pallas_src>
import jax
import jax.numpy as jnp
import numpy as np
from jax.experimental import pallas as pl
from jax.experimental.pallas import tpu as pltpu

_VMEM_LIMIT = 32 * 1024 * 1024          # safe scoped-VMEM request on v5e/v6e/v7x
_VMEM_BUDGET = int(0.75 * _VMEM_LIMIT)  # headroom for compiler temporaries


def _spatial_conv_matrix(w_sp, H, W, ksp, dil):
    """Dense tap matrix T of shape (2*H*W, H*W) s.t. attn = [avg | max] @ T.

    Row index p = c*H*W + ph*W + pw is the *input* map position (contracted),
    column index q = qh*W + qw is the *output* position:
        T[c*HW + p, q] = w_sp[c, kh, kw]   with   kh = (ph - qh + pad) / dil,
                                                  kw = (pw - qw + pad) / dil
    and zero whenever the offset falls outside the kernel footprint or is not a
    multiple of the dilation — i.e. the dilation-aware "same"-padded conv
    expressed as one matmul.
    """
    pad = dil * (ksp - 1) // 2
    dh = jnp.arange(H)[:, None] - jnp.arange(H)[None, :] + pad          # [ph, qh]
    dw = jnp.arange(W)[:, None] - jnp.arange(W)[None, :] + pad          # [pw, qw]
    vh = (dh >= 0) & (dh < ksp * dil) & (dh % dil == 0)
    vw = (dw >= 0) & (dw < ksp * dil) & (dw % dil == 0)
    kh = jnp.clip(dh // dil, 0, ksp - 1)
    kw = jnp.clip(dw // dil, 0, ksp - 1)
    taps = w_sp[:, kh[:, None, :, None], kw[None, :, None, :]]          # (2,ph,pw,qh,qw)
    valid = (vh[:, None, :, None] & vw[None, :, None, :])[None]
    return jnp.where(valid, taps, 0.0).reshape(2 * H * W, H * W).astype(jnp.float32)


def make_kernel(B_t, HW, Cp, Cout):
    """Fused conv3x3 + SE gate + CBAM spatial attention for B_t images."""
    inv_c = 1.0 / float(Cout)
    inv_hw = 1.0 / float(HW)

    def kernel(patches_ref, wconv_ref, bconv_ref, wfc1_ref, bfc1_ref,
               wfc2_ref, bfc2_ref, tsp_ref, bsp_ref, out_ref):
        # ---- 3x3 "same" conv: single MXU matmul over bf16 im2col patches -----
        y = jnp.dot(patches_ref[...], wconv_ref[...],
                    preferred_element_type=jnp.float32) + bconv_ref[...]  # (B_t*HW, Cp)
        y3 = y.reshape(B_t, HW, Cp)

        # ---- squeeze-excite channel gate (NF style: 2 * sigmoid), batched ----
        # bf16 operands for the two FC matmuls, f32 accumulation & elementwise.
        m = (jnp.sum(y3, axis=1) * inv_hw).astype(jnp.bfloat16)          # (B_t, Cp)
        h1 = jnp.maximum(
            jnp.dot(m, wfc1_ref[...], preferred_element_type=jnp.float32)
            + bfc1_ref[...], 0.0)                                         # (B_t, Hp) f32
        gate = 2.0 * jax.nn.sigmoid(
            jnp.dot(h1.astype(jnp.bfloat16), wfc2_ref[...],
                    preferred_element_type=jnp.float32) + bfc2_ref[...])  # (B_t, Cp)
        y3 = y3 * gate[:, None, :]

        # ---- CBAM spatial attention ------------------------------------------
        # Channel mean/max are lane reductions (padded channels are exactly 0 ->
        # divide by the true Cout; mask them with -inf for the max).
        lane = jax.lax.broadcasted_iota(jnp.int32, (1, 1, Cp), 2)
        avg = jnp.sum(y3, axis=-1) * inv_c                                # (B_t, HW)
        mx = jnp.max(jnp.where(lane < Cout, y3, -jnp.inf), axis=-1)       # (B_t, HW)

        # 7x7 conv over the two maps == ONE fused matmul against the tap matrix.
        sp = jnp.concatenate([avg, mx], axis=-1).astype(jnp.bfloat16)     # (B_t, 2*HW)
        attn = jnp.dot(sp, tsp_ref[...],
                       preferred_element_type=jnp.float32) + bsp_ref[0]   # (B_t, HW)

        y3 = y3 * jax.nn.sigmoid(attn)[:, :, None]
        out_ref[...] = y3.reshape(B_t * HW, Cp).astype(out_ref.dtype)     # bf16 store

    return kernel


def _vmem_need_bytes(bt, HW, K9, Cp, Hp):
    """Rough per-grid-step VMEM footprint (conservative: weights counted 2x)."""
    patches = 2 * bt * HW * K9 * 2          # bf16 input block, double-buffered
    out_blk = 2 * bt * HW * Cp * 2          # bf16 output block, double-buffered
    weights = (K9 * Cp * 2 + Cp * Hp * 2 + Hp * Cp * 2 + 2 * HW * HW * 2
               + 3 * Cp * 4 + Hp * 4)
    live = 3 * bt * HW * Cp * 4             # f32 y3 + elementwise temporaries
    return patches + out_blk + 2 * weights + live


def _choose_batch_tile(B, HW, K9, Cp, Hp, budget):
    """Largest B_t (<=8) dividing B that fits the VMEM budget, keeping >=2 grid
    steps (so v7x's two TensorCores can split the 'parallel' batch axis)."""
    for bt in range(min(B, 8), 0, -1):
        if B % bt:
            continue
        if B >= 2 and B // bt < 2:
            continue
        if _vmem_need_bytes(bt, HW, K9, Cp, Hp) <= budget:
            return bt
    return 1


def nf_cbam_forward(x_nchw, params, *, kernel_size=7, dilation=1, batch_tile=None):
    """x_nchw: (B, Cin, H, W) float32 -> (B, Cout, H, W) float32."""
    B, Cin, H, W = x_nchw.shape
    Cout = params["w_conv"].shape[-1]
    hidden = params["w_fc1"].shape[-1]
    HW = H * W
    K9 = 9 * Cin
    Cp = ((Cout + 127) // 128) * 128            # lane-pad channels to 128
    Hp = ((hidden + 127) // 128) * 128          # lane-pad SE hidden dim to 128

    if batch_tile is None:
        B_t = _choose_batch_tile(B, HW, K9, Cp, Hp, _VMEM_BUDGET)
    else:
        B_t = min(batch_tile, B)
    assert B % B_t == 0, "batch_tile must divide batch"

    # ---- wrapper-side im2col for the 3x3 "same" conv (cheap XLA pads/slices) --
    x = jnp.transpose(x_nchw, (0, 2, 3, 1)).astype(jnp.float32)            # NHWC
    xpad = jnp.pad(x, ((0, 0), (1, 1), (1, 1), (0, 0)))
    patches = jnp.concatenate(
        [xpad[:, kh:kh + H, kw:kw + W, :] for kh in range(3) for kw in range(3)],
        axis=-1).reshape(B * HW, K9).astype(jnp.bfloat16)                  # (B*HW, 9*Cin)

    # ---- channel / hidden lane-padded weights; padded lanes stay exactly 0 ----
    wconv = jnp.zeros((K9, Cp), jnp.float32).at[:, :Cout].set(
        params["w_conv"].reshape(K9, Cout)).astype(jnp.bfloat16)
    bconv = jnp.zeros((1, Cp), jnp.float32).at[:, :Cout].set(params["b_conv"])
    wfc1 = jnp.zeros((Cp, Hp), jnp.float32).at[:Cout, :hidden].set(
        params["w_fc1"]).astype(jnp.bfloat16)
    bfc1 = jnp.zeros((1, Hp), jnp.float32).at[:, :hidden].set(params["b_fc1"])
    wfc2 = jnp.zeros((Hp, Cp), jnp.float32).at[:hidden, :Cout].set(
        params["w_fc2"]).astype(jnp.bfloat16)
    bfc2 = jnp.zeros((1, Cp), jnp.float32).at[:, :Cout].set(params["b_fc2"])

    # ---- 7x7 spatial conv as ONE fused bf16 tap matrix ------------------------
    T = _spatial_conv_matrix(params["w_sp"], H, W,
                             kernel_size, dilation).astype(jnp.bfloat16)   # (2*HW, HW)
    bsp = params["b_sp"].reshape(1).astype(jnp.float32)

    kernel = make_kernel(B_t, HW, Cp, Cout)

    def build_in_specs(single_buffer_invariant):
        inv = ({"pipeline_mode": pl.Buffered(1)} if single_buffer_invariant else {})
        return [
            pl.BlockSpec((B_t * HW, K9), lambda b: (b, 0)),          # im2col patches
            pl.BlockSpec((K9, Cp), lambda b: (0, 0), **inv),         # conv weight
            pl.BlockSpec((1, Cp), lambda b: (0, 0), **inv),          # conv bias
            pl.BlockSpec((Cp, Hp), lambda b: (0, 0), **inv),         # SE fc1
            pl.BlockSpec((1, Hp), lambda b: (0, 0), **inv),
            pl.BlockSpec((Hp, Cp), lambda b: (0, 0), **inv),         # SE fc2
            pl.BlockSpec((1, Cp), lambda b: (0, 0), **inv),
            pl.BlockSpec((2 * HW, HW), lambda b: (0, 0), **inv),     # fused tap matrix
            pl.BlockSpec(memory_space=pltpu.MemorySpace.SMEM),       # spatial bias scalar
        ]

    def run(in_specs):
        return pl.pallas_call(
            kernel,
            out_shape=jax.ShapeDtypeStruct((B * HW, Cp), jnp.bfloat16),
            grid=(B // B_t,),
            in_specs=in_specs,
            out_specs=pl.BlockSpec((B_t * HW, Cp), lambda b: (b, 0)),
            compiler_params=pltpu.CompilerParams(
                dimension_semantics=("parallel",),
                vmem_limit_bytes=_VMEM_LIMIT),
        )(patches, wconv, bconv, wfc1, bfc1, wfc2, bfc2, T, bsp)

    try:
        # Single-buffer the grid-invariant weight / tap-matrix blocks (they are
        # fetched once) to halve their VMEM footprint.
        out_flat = run(build_in_specs(True))
        jax.block_until_ready(out_flat)
    except Exception:
        # Fallback for jax versions that reject pipeline_mode=pl.Buffered(1).
        out_flat = run(build_in_specs(False))

    out = out_flat.reshape(B, H, W, Cp)[..., :Cout].astype(jnp.float32)    # drop padding
    return jnp.transpose(out, (0, 3, 1, 2))                                # back to NCHW


def reference_forward(x_nchw, params, *, kernel_size=7, dilation=1):
    """Pure-JAX reference with identical semantics (conv inputs bf16-cast to match)."""
    B, Cin, H, W = x_nchw.shape
    Cout = params["w_conv"].shape[-1]
    pad_sp = dilation * (kernel_size - 1) // 2

    x = jnp.transpose(x_nchw, (0, 2, 3, 1)).astype(jnp.float32)
    xpad = jnp.pad(x, ((0, 0), (1, 1), (1, 1), (0, 0)))
    y = jnp.zeros((B, H, W, Cout), jnp.float32)
    for kh in range(3):
        for kw in range(3):
            y = y + jnp.einsum("bhwc,cd->bhwd",
                               xpad[:, kh:kh + H, kw:kw + W, :].astype(jnp.bfloat16),
                               params["w_conv"][kh, kw].astype(jnp.bfloat16),
                               preferred_element_type=jnp.float32)
    y = y + params["b_conv"][0]

    m = y.mean(axis=(1, 2))                                         # (B, Cout)
    h1 = jax.nn.relu(m @ params["w_fc1"] + params["b_fc1"][0])
    gate = 2.0 * jax.nn.sigmoid(h1 @ params["w_fc2"] + params["b_fc2"][0])
    y = y * gate[:, None, None, :]

    avg = y.mean(axis=-1)
    mx = y.max(axis=-1)
    sp = jnp.stack([avg, mx], axis=1)                               # (B, 2, H, W)
    sppad = jnp.pad(sp, ((0, 0), (0, 0), (pad_sp, pad_sp), (pad_sp, pad_sp)))
    attn = jnp.zeros((B, H, W), jnp.float32) + params["b_sp"][0]
    for c in range(2):
        for kh in range(kernel_size):
            for kw in range(kernel_size):
                attn = attn + sppad[:, c,
                                    kh * dilation:kh * dilation + H,
                                    kw * dilation:kw * dilation + W] \
                              * params["w_sp"][c, kh, kw]
    out = y * jax.nn.sigmoid(attn)[..., None]
    return jnp.transpose(out, (0, 3, 1, 2))


def init_params(key, in_channels, channels, se_rate=0.5, kernel_size=7):
    hidden = max(1, int(channels * se_rate))
    ks = jax.random.split(key, 8)
    return {
        "w_conv": 0.1 * jax.random.normal(ks[0], (3, 3, in_channels, channels), jnp.float32),
        "b_conv": 0.1 * jax.random.normal(ks[1], (1, channels), jnp.float32),
        "w_fc1":  0.1 * jax.random.normal(ks[2], (channels, hidden), jnp.float32),
        "b_fc1":  0.1 * jax.random.normal(ks[3], (1, hidden), jnp.float32),
        "w_fc2":  0.1 * jax.random.normal(ks[4], (hidden, channels), jnp.float32),
        "b_fc2":  0.1 * jax.random.normal(ks[5], (1, channels), jnp.float32),
        "w_sp":   0.1 * jax.random.normal(ks[6], (2, kernel_size, kernel_size), jnp.float32),
        "b_sp":   0.1 * jax.random.normal(ks[7], (1,), jnp.float32),
    }


if __name__ == "__main__":
    key = jax.random.PRNGKey(0)
    k_x, k_p = jax.random.split(key)

    B, Cin, Cout, H, W = 2, 4, 8, 16, 16
    x = jax.random.normal(k_x, (B, Cin, H, W), jnp.float32)
    params = init_params(k_p, in_channels=Cin, channels=Cout,
                         se_rate=0.5, kernel_size=7)

    ref = jax.block_until_ready(
        reference_forward(x, params, kernel_size=7, dilation=1))

    # Auto batch_tile (keeps >=2 grid steps for v7x's 2 TCs), plus explicit
    # single-step batched path to exercise both grid shapes.
    for bt in (None, 1, 2):
        out = nf_cbam_forward(x, params, kernel_size=7, dilation=1, batch_tile=bt)
        out = jax.block_until_ready(out)
        # Tolerance covers bf16 MXU operands (conv patches, SE FCs, tap matrix)
        # and the bf16 output store vs. the mostly-f32 XLA reference.
        np.testing.assert_allclose(np.asarray(out), np.asarray(ref),
                                   rtol=2e-2, atol=2e-2)

    print("KERNEL_OK")
</pallas_src>

<mosaic_0001>
module attributes {stable_mosaic.version = 11 : i64} {
  func.func @kernel(%arg0: i32, %arg1: memref<256x36xbf16, #tpu.memory_space<vmem>>, %arg2: memref<36x128xbf16, #tpu.memory_space<vmem>>, %arg3: memref<1x128xf32, #tpu.memory_space<vmem>>, %arg4: memref<128x128xbf16, #tpu.memory_space<vmem>>, %arg5: memref<1x128xf32, #tpu.memory_space<vmem>>, %arg6: memref<128x128xbf16, #tpu.memory_space<vmem>>, %arg7: memref<1x128xf32, #tpu.memory_space<vmem>>, %arg8: memref<512x256xbf16, #tpu.memory_space<vmem>>, %arg9: memref<1xf32, #tpu.memory_space<smem>>, %arg10: memref<256x128xbf16, #tpu.memory_space<vmem>>) attributes {dimension_semantics = [#tpu.dimension_semantics<parallel>], iteration_bounds = array<i64: 2>, scalar_prefetch = 0 : i64, scratch_operands = 0 : i64, tpu.core_type = #tpu.core_type<tc>, window_params = [{transform_indices = @transform_0, window_bounds = array<i64: 256, 36>}, {pipeline_mode = #tpu.pipeline_mode<synchronous>, transform_indices = @transform_1, window_bounds = array<i64: 36, 128>}, {pipeline_mode = #tpu.pipeline_mode<synchronous>, transform_indices = @transform_2, window_bounds = array<i64: 1, 128>}, {pipeline_mode = #tpu.pipeline_mode<synchronous>, transform_indices = @transform_3, window_bounds = array<i64: 128, 128>}, {pipeline_mode = #tpu.pipeline_mode<synchronous>, transform_indices = @transform_4, window_bounds = array<i64: 1, 128>}, {pipeline_mode = #tpu.pipeline_mode<synchronous>, transform_indices = @transform_5, window_bounds = array<i64: 128, 128>}, {pipeline_mode = #tpu.pipeline_mode<synchronous>, transform_indices = @transform_6, window_bounds = array<i64: 1, 128>}, {pipeline_mode = #tpu.pipeline_mode<synchronous>, transform_indices = @transform_7, window_bounds = array<i64: 512, 256>}, {transform_indices = @transform_8, window_bounds = array<i64: 1>}, {transform_indices = @transform_9, window_bounds = array<i64: 256, 128>}]} {
    %c0 = arith.constant 0 : index
    %c0_0 = arith.constant 0 : index
    %0 = vector.load %arg1[%c0, %c0_0] : memref<256x36xbf16, #tpu.memory_space<vmem>>, vector<256x36xbf16>
    %c0_1 = arith.constant 0 : index
    %c0_2 = arith.constant 0 : index
    %1 = vector.load %arg2[%c0_1, %c0_2] : memref<36x128xbf16, #tpu.memory_space<vmem>>, vector<36x128xbf16>
    %cst = arith.constant dense<0.000000e+00> : vector<256x128xf32>
    %2 = tpu.matmul %0, %1, %cst {dimension_numbers = #tpu.dot_dimension_numbers<[1], [0], [0], [1], [0, 0, 1, 1], [], []>} : vector<256x36xbf16>, vector<36x128xbf16>, vector<256x128xf32> -> vector<256x128xf32>
    %c0_3 = arith.constant 0 : index
    %c0_4 = arith.constant 0 : index
    %3 = vector.load %arg3[%c0_3, %c0_4] : memref<1x128xf32, #tpu.memory_space<vmem>>, vector<1x128xf32>
    %4 = vector.broadcast %3 : vector<1x128xf32> to vector<256x128xf32>
    %5 = arith.addf %2, %4 : vector<256x128xf32>
    %6 = vector.shape_cast %5 : vector<256x128xf32> to vector<1x256x128xf32>
    %cst_5 = arith.constant dense<0.000000e+00> : vector<1x128xf32>
    %7 = vector.multi_reduction <add>, %6, %cst_5 [1] : vector<1x256x128xf32> to vector<1x128xf32>
    %cst_6 = arith.constant 3.906250e-03 : f32
    %8 = vector.broadcast %cst_6 : f32 to vector<1x128xf32>
    %9 = arith.mulf %7, %8 : vector<1x128xf32>
    %10 = arith.truncf %9 : vector<1x128xf32> to vector<1x128xbf16>
    %c0_7 = arith.constant 0 : index
    %c0_8 = arith.constant 0 : index
    %11 = vector.load %arg4[%c0_7, %c0_8] : memref<128x128xbf16, #tpu.memory_space<vmem>>, vector<128x128xbf16>
    %cst_9 = arith.constant dense<0.000000e+00> : vector<1x128xf32>
    %12 = tpu.matmul %10, %11, %cst_9 {dimension_numbers = #tpu.dot_dimension_numbers<[1], [0], [0], [1], [0, 0, 1, 1], [], []>} : vector<1x128xbf16>, vector<128x128xbf16>, vector<1x128xf32> -> vector<1x128xf32>
    %c0_10 = arith.constant 0 : index
    %c0_11 = arith.constant 0 : index
    %13 = vector.load %arg5[%c0_10, %c0_11] : memref<1x128xf32, #tpu.memory_space<vmem>>, vector<1x128xf32>
    %14 = arith.addf %12, %13 : vector<1x128xf32>
    %cst_12 = arith.constant 0.000000e+00 : f32
    %15 = vector.broadcast %cst_12 : f32 to vector<1x128xf32>
    %16 = arith.maximumf %14, %15 : vector<1x128xf32>
    %17 = arith.truncf %16 : vector<1x128xf32> to vector<1x128xbf16>
    %c0_13 = arith.constant 0 : index
    %c0_14 = arith.constant 0 : index
    %18 = vector.load %arg6[%c0_13, %c0_14] : memref<128x128xbf16, #tpu.memory_space<vmem>>, vector<128x128xbf16>
    %cst_15 = arith.constant dense<0.000000e+00> : vector<1x128xf32>
    %19 = tpu.matmul %17, %18, %cst_15 {dimension_numbers = #tpu.dot_dimension_numbers<[1], [0], [0], [1], [0, 0, 1, 1], [], []>} : vector<1x128xbf16>, vector<128x128xbf16>, vector<1x128xf32> -> vector<1x128xf32>
    %c0_16 = arith.constant 0 : index
    %c0_17 = arith.constant 0 : index
    %20 = vector.load %arg7[%c0_16, %c0_17] : memref<1x128xf32, #tpu.memory_space<vmem>>, vector<1x128xf32>
    %21 = arith.addf %19, %20 : vector<1x128xf32>
    %22 = arith.negf %21 : vector<1x128xf32>
    %23 = math.exp %22 : vector<1x128xf32>
    %cst_18 = arith.constant 1.000000e+00 : f32
    %24 = vector.broadcast %cst_18 : f32 to vector<1x128xf32>
    %25 = arith.addf %24, %23 : vector<1x128xf32>
    %26 = arith.divf %24, %25 : vector<1x128xf32>
    %cst_19 = arith.constant 2.000000e+00 : f32
    %27 = vector.broadcast %cst_19 : f32 to vector<1x128xf32>
    %28 = arith.mulf %27, %26 : vector<1x128xf32>
    %29 = vector.shape_cast %28 : vector<1x128xf32> to vector<1x1x128xf32>
    %30 = vector.broadcast %29 : vector<1x1x128xf32> to vector<1x256x128xf32>
    %31 = arith.mulf %6, %30 : vector<1x256x128xf32>
    %32 = tpu.iota {dimensions = array<i32: 2>} : vector<1x1x128xi32>
    %cst_20 = arith.constant dense<0.000000e+00> : vector<1x256xf32>
    %33 = vector.multi_reduction <add>, %31, %cst_20 [2] : vector<1x256x128xf32> to vector<1x256xf32>
    %cst_21 = arith.constant 1.250000e-01 : f32
    %34 = vector.broadcast %cst_21 : f32 to vector<1x256xf32>
    %35 = arith.mulf %33, %34 : vector<1x256xf32>
    %c8_i32 = arith.constant 8 : i32
    %36 = vector.broadcast %c8_i32 : i32 to vector<1x1x128xi32>
    %37 = arith.cmpi slt, %32, %36 : vector<1x1x128xi32>
    %cst_22 = arith.constant 0xFF800000 : f32
    %38 = vector.shape_cast %37 : vector<1x1x128xi1> to vector<1x1x128xi1>
    %39 = vector.broadcast %38 : vector<1x1x128xi1> to vector<1x256x128xi1>
    %40 = vector.broadcast %cst_22 : f32 to vector<1x256x128xf32>
    %41 = arith.select %39, %31, %40 : vector<1x256x128xi1>, vector<1x256x128xf32>
    %cst_23 = arith.constant dense<0xFF800000> : vector<1x256xf32>
    %42 = vector.multi_reduction <maximumf>, %41, %cst_23 [2] : vector<1x256x128xf32> to vector<1x256xf32>
    %43 = tpu.concatenate %35, %42 in 1 : vector<1x256xf32>, vector<1x256xf32> -> vector<1x512xf32>
    %44 = arith.truncf %43 : vector<1x512xf32> to vector<1x512xbf16>
    %c0_24 = arith.constant 0 : index
    %c0_25 = arith.constant 0 : index
    %45 = vector.load %arg8[%c0_24, %c0_25] : memref<512x256xbf16, #tpu.memory_space<vmem>>, vector<512x256xbf16>
    %cst_26 = arith.constant dense<0.000000e+00> : vector<1x256xf32>
    %46 = tpu.matmul %44, %45, %cst_26 {dimension_numbers = #tpu.dot_dimension_numbers<[1], [0], [0], [1], [0, 0, 1, 1], [], []>} : vector<1x512xbf16>, vector<512x256xbf16>, vector<1x256xf32> -> vector<1x256xf32>
    %c0_27 = arith.constant 0 : index
    %47 = memref.load %arg9[%c0_27] : memref<1xf32, #tpu.memory_space<smem>>
    %48 = vector.broadcast %47 : f32 to vector<1x256xf32>
    %49 = arith.addf %46, %48 : vector<1x256xf32>
    %50 = arith.negf %49 : vector<1x256xf32>
    %51 = math.exp %50 : vector<1x256xf32>
    %cst_28 = arith.constant 1.000000e+00 : f32
    %52 = vector.broadcast %cst_28 : f32 to vector<1x256xf32>
    %53 = arith.addf %52, %51 : vector<1x256xf32>
    %54 = arith.divf %52, %53 : vector<1x256xf32>
    %55 = vector.shape_cast %54 : vector<1x256xf32> to vector<1x256x1xf32>
    %56 = vector.broadcast %55 : vector<1x256x1xf32> to vector<1x256x128xf32>
    %57 = arith.mulf %31, %56 : vector<1x256x128xf32>
    %58 = vector.shape_cast %57 : vector<1x256x128xf32> to vector<256x128xf32>
    %59 = arith.truncf %58 : vector<256x128xf32> to vector<256x128xbf16>
    %c0_29 = arith.constant 0 : index
    %c0_30 = arith.constant 0 : index
    %60 = vector.load %arg10[%c0_29, %c0_30] : memref<256x128xbf16, #tpu.memory_space<vmem>>, vector<256x128xbf16>
    tpu.vector_store %arg10[%c0_29, %c0_30], %59 {strides = array<i32>} : memref<256x128xbf16, #tpu.memory_space<vmem>>, vector<256x128xbf16>,
    return
  }
  func.func @transform_0(%arg0: i32) -> (i32, i32) {
    %c0_i32 = arith.constant 0 : i32
    %c0_i32_0 = arith.constant 0 : i32
    return %arg0, %c0_i32 : i32, i32
  }
  func.func @transform_1(%arg0: i32) -> (i32, i32) {
    %c0_i32 = arith.constant 0 : i32
    %c0_i32_0 = arith.constant 0 : i32
    %c0_i32_1 = arith.constant 0 : i32
    return %c0_i32, %c0_i32_0 : i32, i32
  }
  func.func @transform_2(%arg0: i32) -> (i32, i32) {
    %c0_i32 = arith.constant 0 : i32
    %c0_i32_0 = arith.constant 0 : i32
    %c0_i32_1 = arith.constant 0 : i32
    return %c0_i32, %c0_i32_0 : i32, i32
  }
  func.func @transform_3(%arg0: i32) -> (i32, i32) {
    %c0_i32 = arith.constant 0 : i32
    %c0_i32_0 = arith.constant 0 : i32
    %c0_i32_1 = arith.constant 0 : i32
    return %c0_i32, %c0_i32_0 : i32, i32
  }
  func.func @transform_4(%arg0: i32) -> (i32, i32) {
    %c0_i32 = arith.constant 0 : i32
    %c0_i32_0 = arith.constant 0 : i32
    %c0_i32_1 = arith.constant 0 : i32
    return %c0_i32, %c0_i32_0 : i32, i32
  }
  func.func @transform_5(%arg0: i32) -> (i32, i32) {
    %c0_i32 = arith.constant 0 : i32
    %c0_i32_0 = arith.constant 0 : i32
    %c0_i32_1 = arith.constant 0 : i32
    return %c0_i32, %c0_i32_0 : i32, i32
  }
  func.func @transform_6(%arg0: i32) -> (i32, i32) {
    %c0_i32 = arith.constant 0 : i32
    %c0_i32_0 = arith.constant 0 : i32
    %c0_i32_1 = arith.constant 0 : i32
    return %c0_i32, %c0_i32_0 : i32, i32
  }
  func.func @transform_7(%arg0: i32) -> (i32, i32) {
    %c0_i32 = arith.constant 0 : i32
    %c0_i32_0 = arith.constant 0 : i32
    %c0_i32_1 = arith.constant 0 : i32
    return %c0_i32, %c0_i32_0 : i32, i32
  }
  func.func @transform_8(%arg0: i32) -> i32 {
    %c0_i32 = arith.constant 0 : i32
    %c0_i32_0 = arith.constant 0 : i32
    return %c0_i32 : i32
  }
  func.func @transform_9(%arg0: i32) -> (i32, i32) {
    %c0_i32 = arith.constant 0 : i32
    %c0_i32_0 = arith.constant 0 : i32
    return %arg0, %c0_i32 : i32, i32
  }
}

module attributes {stable_mosaic.version = 11 : i64} {
  func.func @kernel(%arg0: i32, %arg1: memref<256x36xbf16, #tpu.memory_space<vmem>>, %arg2: memref<36x128xbf16, #tpu.memory_space<vmem>>, %arg3: memref<1x128xf32, #tpu.memory_space<vmem>>, %arg4: memref<128x128xbf16, #tpu.memory_space<vmem>>, %arg5: memref<1x128xf32, #tpu.memory_space<vmem>>, %arg6: memref<128x128xbf16, #tpu.memory_space<vmem>>, %arg7: memref<1x128xf32, #tpu.memory_space<vmem>>, %arg8: memref<512x256xbf16, #tpu.memory_space<vmem>>, %arg9: memref<1xf32, #tpu.memory_space<smem>>, %arg10: memref<256x128xbf16, #tpu.memory_space<vmem>>) attributes {dimension_semantics = [#tpu.dimension_semantics<parallel>], iteration_bounds = array<i64: 2>, scalar_prefetch = 0 : i64, scratch_operands = 0 : i64, tpu.core_type = #tpu.core_type<tc>, window_params = [{transform_indices = @transform_0, window_bounds = array<i64: 256, 36>}, {pipeline_mode = #tpu.pipeline_mode<synchronous>, transform_indices = @transform_1, window_bounds = array<i64: 36, 128>}, {pipeline_mode = #tpu.pipeline_mode<synchronous>, transform_indices = @transform_2, window_bounds = array<i64: 1, 128>}, {pipeline_mode = #tpu.pipeline_mode<synchronous>, transform_indices = @transform_3, window_bounds = array<i64: 128, 128>}, {pipeline_mode = #tpu.pipeline_mode<synchronous>, transform_indices = @transform_4, window_bounds = array<i64: 1, 128>}, {pipeline_mode = #tpu.pipeline_mode<synchronous>, transform_indices = @transform_5, window_bounds = array<i64: 128, 128>}, {pipeline_mode = #tpu.pipeline_mode<synchronous>, transform_indices = @transform_6, window_bounds = array<i64: 1, 128>}, {pipeline_mode = #tpu.pipeline_mode<synchronous>, transform_indices = @transform_7, window_bounds = array<i64: 512, 256>}, {transform_indices = @transform_8, window_bounds = array<i64: 1>}, {transform_indices = @transform_9, window_bounds = array<i64: 256, 128>}]} {
    %c0 = arith.constant 0 : index
    %c0_0 = arith.constant 0 : index
    %0 = vector.load %arg1[%c0, %c0_0] : memref<256x36xbf16, #tpu.memory_space<vmem>>, vector<256x36xbf16>
    %c0_1 = arith.constant 0 : index
    %c0_2 = arith.constant 0 : index
    %1 = vector.load %arg2[%c0_1, %c0_2] : memref<36x128xbf16, #tpu.memory_space<vmem>>, vector<36x128xbf16>
    %cst = arith.constant dense<0.000000e+00> : vector<256x128xf32>
    %2 = tpu.matmul %0, %1, %cst {dimension_numbers = #tpu.dot_dimension_numbers<[1], [0], [0], [1], [0, 0, 1, 1], [], []>} : vector<256x36xbf16>, vector<36x128xbf16>, vector<256x128xf32> -> vector<256x128xf32>
    %c0_3 = arith.constant 0 : index
    %c0_4 = arith.constant 0 : index
    %3 = vector.load %arg3[%c0_3, %c0_4] : memref<1x128xf32, #tpu.memory_space<vmem>>, vector<1x128xf32>
    %4 = vector.broadcast %3 : vector<1x128xf32> to vector<256x128xf32>
    %5 = arith.addf %2, %4 : vector<256x128xf32>
    %6 = vector.shape_cast %5 : vector<256x128xf32> to vector<1x256x128xf32>
    %cst_5 = arith.constant dense<0.000000e+00> : vector<1x128xf32>
    %7 = vector.multi_reduction <add>, %6, %cst_5 [1] : vector<1x256x128xf32> to vector<1x128xf32>
    %cst_6 = arith.constant 3.906250e-03 : f32
    %8 = vector.broadcast %cst_6 : f32 to vector<1x128xf32>
    %9 = arith.mulf %7, %8 : vector<1x128xf32>
    %10 = arith.truncf %9 : vector<1x128xf32> to vector<1x128xbf16>
    %c0_7 = arith.constant 0 : index
    %c0_8 = arith.constant 0 : index
    %11 = vector.load %arg4[%c0_7, %c0_8] : memref<128x128xbf16, #tpu.memory_space<vmem>>, vector<128x128xbf16>
    %cst_9 = arith.constant dense<0.000000e+00> : vector<1x128xf32>
    %12 = tpu.matmul %10, %11, %cst_9 {dimension_numbers = #tpu.dot_dimension_numbers<[1], [0], [0], [1], [0, 0, 1, 1], [], []>} : vector<1x128xbf16>, vector<128x128xbf16>, vector<1x128xf32> -> vector<1x128xf32>
    %c0_10 = arith.constant 0 : index
    %c0_11 = arith.constant 0 : index
    %13 = vector.load %arg5[%c0_10, %c0_11] : memref<1x128xf32, #tpu.memory_space<vmem>>, vector<1x128xf32>
    %14 = arith.addf %12, %13 : vector<1x128xf32>
    %cst_12 = arith.constant 0.000000e+00 : f32
    %15 = vector.broadcast %cst_12 : f32 to vector<1x128xf32>
    %16 = arith.maximumf %14, %15 : vector<1x128xf32>
    %17 = arith.truncf %16 : vector<1x128xf32> to vector<1x128xbf16>
    %c0_13 = arith.constant 0 : index
    %c0_14 = arith.constant 0 : index
    %18 = vector.load %arg6[%c0_13, %c0_14] : memref<128x128xbf16, #tpu.memory_space<vmem>>, vector<128x128xbf16>
    %cst_15 = arith.constant dense<0.000000e+00> : vector<1x128xf32>
    %19 = tpu.matmul %17, %18, %cst_15 {dimension_numbers = #tpu.dot_dimension_numbers<[1], [0], [0], [1], [0, 0, 1, 1], [], []>} : vector<1x128xbf16>, vector<128x128xbf16>, vector<1x128xf32> -> vector<1x128xf32>
    %c0_16 = arith.constant 0 : index
    %c0_17 = arith.constant 0 : index
    %20 = vector.load %arg7[%c0_16, %c0_17] : memref<1x128xf32, #tpu.memory_space<vmem>>, vector<1x128xf32>
    %21 = arith.addf %19, %20 : vector<1x128xf32>
    %22 = arith.negf %21 : vector<1x128xf32>
    %23 = math.exp %22 : vector<1x128xf32>
    %cst_18 = arith.constant 1.000000e+00 : f32
    %24 = vector.broadcast %cst_18 : f32 to vector<1x128xf32>
    %25 = arith.addf %24, %23 : vector<1x128xf32>
    %26 = arith.divf %24, %25 : vector<1x128xf32>
    %cst_19 = arith.constant 2.000000e+00 : f32
    %27 = vector.broadcast %cst_19 : f32 to vector<1x128xf32>
    %28 = arith.mulf %27, %26 : vector<1x128xf32>
    %29 = vector.shape_cast %28 : vector<1x128xf32> to vector<1x1x128xf32>
    %30 = vector.broadcast %29 : vector<1x1x128xf32> to vector<1x256x128xf32>
    %31 = arith.mulf %6, %30 : vector<1x256x128xf32>
    %32 = tpu.iota {dimensions = array<i32: 2>} : vector<1x1x128xi32>
    %cst_20 = arith.constant dense<0.000000e+00> : vector<1x256xf32>
    %33 = vector.multi_reduction <add>, %31, %cst_20 [2] : vector<1x256x128xf32> to vector<1x256xf32>
    %cst_21 = arith.constant 1.250000e-01 : f32
    %34 = vector.broadcast %cst_21 : f32 to vector<1x256xf32>
    %35 = arith.mulf %33, %34 : vector<1x256xf32>
    %c8_i32 = arith.constant 8 : i32
    %36 = vector.broadcast %c8_i32 : i32 to vector<1x1x128xi32>
    %37 = arith.cmpi slt, %32, %36 : vector<1x1x128xi32>
    %cst_22 = arith.constant 0xFF800000 : f32
    %38 = vector.shape_cast %37 : vector<1x1x128xi1> to vector<1x1x128xi1>
    %39 = vector.broadcast %38 : vector<1x1x128xi1> to vector<1x256x128xi1>
    %40 = vector.broadcast %cst_22 : f32 to vector<1x256x128xf32>
    %41 = arith.select %39, %31, %40 : vector<1x256x128xi1>, vector<1x256x128xf32>
    %cst_23 = arith.constant dense<0xFF800000> : vector<1x256xf32>
    %42 = vector.multi_reduction <maximumf>, %41, %cst_23 [2] : vector<1x256x128xf32> to vector<1x256xf32>
    %43 = tpu.concatenate %35, %42 in 1 : vector<1x256xf32>, vector<1x256xf32> -> vector<1x512xf32>
    %44 = arith.truncf %43 : vector<1x512xf32> to vector<1x512xbf16>
    %c0_24 = arith.constant 0 : index
    %c0_25 = arith.constant 0 : index
    %45 = vector.load %arg8[%c0_24, %c0_25] : memref<512x256xbf16, #tpu.memory_space<vmem>>, vector<512x256xbf16>
    %cst_26 = arith.constant dense<0.000000e+00> : vector<1x256xf32>
    %46 = tpu.matmul %44, %45, %cst_26 {dimension_numbers = #tpu.dot_dimension_numbers<[1], [0], [0], [1], [0, 0, 1, 1], [], []>} : vector<1x512xbf16>, vector<512x256xbf16>, vector<1x256xf32> -> vector<1x256xf32>
    %c0_27 = arith.constant 0 : index
    %47 = memref.load %arg9[%c0_27] : memref<1xf32, #tpu.memory_space<smem>>
    %48 = vector.broadcast %47 : f32 to vector<1x256xf32>
    %49 = arith.addf %46, %48 : vector<1x256xf32>
    %50 = arith.negf %49 : vector<1x256xf32>
    %51 = math.exp %50 : vector<1x256xf32>
    %cst_28 = arith.constant 1.000000e+00 : f32
    %52 = vector.broadcast %cst_28 : f32 to vector<1x256xf32>
    %53 = arith.addf %52, %51 : vector<1x256xf32>
    %54 = arith.divf %52, %53 : vector<1x256xf32>
    %55 = vector.shape_cast %54 : vector<1x256xf32> to vector<1x256x1xf32>
    %56 = vector.broadcast %55 : vector<1x256x1xf32> to vector<1x256x128xf32>
    %57 = arith.mulf %31, %56 : vector<1x256x128xf32>
    %58 = vector.shape_cast %57 : vector<1x256x128xf32> to vector<256x128xf32>
    %59 = arith.truncf %58 : vector<256x128xf32> to vector<256x128xbf16>
    %c0_29 = arith.constant 0 : index
    %c0_30 = arith.constant 0 : index
    %60 = vector.load %arg10[%c0_29, %c0_30] : memref<256x128xbf16, #tpu.memory_space<vmem>>, vector<256x128xbf16>
    tpu.vector_store %arg10[%c0_29, %c0_30], %59 {strides = array<i32>} : memref<256x128xbf16, #tpu.memory_space<vmem>>, vector<256x128xbf16>,
    return
  }
  func.func @transform_0(%arg0: i32) -> (i32, i32) {
    %c0_i32 = arith.constant 0 : i32
    %c0_i32_0 = arith.constant 0 : i32
    return %arg0, %c0_i32 : i32, i32
  }
  func.func @transform_1(%arg0: i32) -> (i32, i32) {
    %c0_i32 = arith.constant 0 : i32
    %c0_i32_0 = arith.constant 0 : i32
    %c0_i32_1 = arith.constant 0 : i32
    return %c0_i32, %c0_i32_0 : i32, i32
  }
  func.func @transform_2(%arg0: i32) -> (i32, i32) {
    %c0_i32 = arith.constant 0 : i32
    %c0_i32_0 = arith.constant 0 : i32
    %c0_i32_1 = arith.constant 0 : i32
    return %c0_i32, %c0_i32_0 : i32, i32
  }
  func.func @transform_3(%arg0: i32) -> (i32, i32) {
    %c0_i32 = arith.constant 0 : i32
    %c0_i32_0 = arith.constant 0 : i32
    %c0_i32_1 = arith.constant 0 : i32
    return %c0_i32, %c0_i32_0 : i32, i32
  }
  func.func @transform_4(%arg0: i32) -> (i32, i32) {
    %c0_i32 = arith.constant 0 : i32
    %c0_i32_0 = arith.constant 0 : i32
    %c0_i32_1 = arith.constant 0 : i32
    return %c0_i32, %c0_i32_0 : i32, i32
  }
  func.func @transform_5(%arg0: i32) -> (i32, i32) {
    %c0_i32 = arith.constant 0 : i32
    %c0_i32_0 = arith.constant 0 : i32
    %c0_i32_1 = arith.constant 0 : i32
    return %c0_i32, %c0_i32_0 : i32, i32
  }
  func.func @transform_6(%arg0: i32) -> (i32, i32) {
    %c0_i32 = arith.constant 0 : i32
    %c0_i32_0 = arith.constant 0 : i32
    %c0_i32_1 = arith.constant 0 : i32
    return %c0_i32, %c0_i32_0 : i32, i32
  }
  func.func @transform_7(%arg0: i32) -> (i32, i32) {
    %c0_i32 = arith.constant 0 : i32
    %c0_i32_0 = arith.constant 0 : i32
    %c0_i32_1 = arith.constant 0 : i32
    return %c0_i32, %c0_i32_0 : i32, i32
  }
  func.func @transform_8(%arg0: i32) -> i32 {
    %c0_i32 = arith.constant 0 : i32
    %c0_i32_0 = arith.constant 0 : i32
    return %c0_i32 : i32
  }
  func.func @transform_9(%arg0: i32) -> (i32, i32) {
    %c0_i32 = arith.constant 0 : i32
    %c0_i32_0 = arith.constant 0 : i32
    return %arg0, %c0_i32 : i32, i32
  }
}

</mosaic_0001>

<bundles_post_ra>
// kernel: tpu_custom_call.1
= control target key start
LH: loop header
LB: loop body
LE: loop exit
PB: predicated region body
PF: predicated region fallthrough
CT: control target
= control target key end

     0   :  { %s4089_s0 = inlined_call_operand.vmem [shape: bf16[512,36], index: 0, kind: input, shape index: {}]   ;;  %s4090_s1 = inlined_call_operand.vmem [shape: bf16[36,128], index: 1, kind: input, shape index: {}]   ;;  %s4091_s2 = inlined_call_operand.vmem [shape: f32[1,128], index: 2, kind: input, shape index: {}]   ;;  %s4092_s3 = inlined_call_operand.vmem [shape: bf16[128,128], index: 3, kind: input, shape index: {}]   ;;  %s4093_s4 = inlined_call_operand.vmem [shape: f32[1,128], index: 4, kind: input, shape index: {}]   ;;  %s4094_s5 = inlined_call_operand.vmem [shape: bf16[128,128], index: 5, kind: input, shape index: {}]   ;;  %s4095_s6 = inlined_call_operand.vmem [shape: f32[1,128], index: 6, kind: input, shape index: {}]   ;;  %s4096_s7 = inlined_call_operand.hbm [shape: bf16[512,256], index: 7, kind: input, shape index: {}]   ;;  %s4097_s8 = inlined_call_operand.<no memory space> [shape: f32[1], index: 8, kind: input, shape index: {}]   ;;  %s4098_s9 = inlined_call_operand.hbm [shape: bf16[512,128], index: 9, kind: output, shape index: {}]  }
   0x1   :  { %14 = sst [smem:[#allocation2]] %s4097_s8 }
   0x2   :  { %15 = vsyncpa [#allocation4], 0 }
   0x3   :  { %16 = vsyncpa [#allocation5], 0 }
   0x4   :  { %18 = vsyncpa [#allocation5 + $0x1], 0  ;;  %s3093_s11 = smov 0   ;;  %s3095_s12 = smov 0  }
   0x5   :  { %s3097_s13 = smov 0   ;;  %s3099_s14 = smov 0  }
   0x6 LB: > { %s3114_s8 = sadd.s32 4294967295, %s3033_s14   ;;  %s2212_s15 = sadd.s32 4294967294, %s3033_s14   ;;  %s3033_s14 = sphi %s3099_s14, %s4184_s14   ;;  %s3029_s13 = sphi %s3097_s13, %s4183_s13   ;;  %s3025_s12 = sphi %s3095_s12, %s4182_s12   ;;  %s3021_s11 = sphi %s3093_s11, %s4181_s11  }
   0x7   : > { %s3118_s16 = sadd.s32 1, %s3033_s14   ;;  %s225_s17 = sadd.s32 1, %s3029_s13 }
   0x8   : > { %s222_s18 = ssub.s32 %s3033_s14, %s3118_s16  ;;  %p235_p0 = scmp.ne.s32.totalorder %s3029_s13, %s3025_s12 }
   0x9   : > { %p223_p1 = scmp.eq.s32.totalorder %s222_s18, 0  ;;  %p236_p2 = scmp.eq.s32.totalorder %s3114_s8, 1 }
   0xa   : > { %p241_p3 = scmp.ne.s32.totalorder %s3025_s12, %s3021_s11  ;;  %p242_p4 = scmp.eq.s32.totalorder %s2212_s15, 1 }
   0xb   : > { %s3129_s19 = scalar_select %p223_p1, %s3029_s13, %s225_s17  }
   0xc   : > { %p3131_p5 = por %p236_p2, %p235_p0  ;;  %p3135_p6 = por %p242_p4, %p241_p3 }
   0xd   : > { %p2213_p7 = scmp.ge.s32.totalorder %s3033_s14, 1  ;;  %p249_p8 = scmp.lt.s32.totalorder %s3033_s14, 3 }
   0xe   : > { %p2851_p9 = scmp.eq.s32.totalorder %s3114_s8, 0  ;;  %s278_s24 = sshll.u32 %s4096_s7, 4  ;;  %s279_s24 = int_to_ptr.hbm [resolvable:$true] %s278_s24 }
   0xf   : > { %p250_p10 = pnand %p2213_p7, %p249_p8  ;;  %s3035_s25 = smov [#allocation3]  }
  0x10   : > { %s280_s26 = sshll.u32 %s3035_s25, 4  ;;  %s3036_s27 = smov 128   ;;  %s281_s26 = int_to_ptr.vmem [resolvable:$true] %s280_s26 }
  0x11   : > { %p2843_p11 = pneg %p250_p10  ;;  %s3037_s28 = smov 8  }
  0x12   : > { %308 = sbr.rel (%p250_p10) target bundleno = 1421 (0x58d), region = 56 }
  0x13   : > { %p2844_p12 = pnand %p2851_p9, %p2843_p11 }
  0x15   : > { %2846 = dma.hbm_to_vmem [thread:$0]  (!%p2844_p12), %s279_s24, 8192, %s281_s26, [#allocation4], %s3036_s27, %s3036_s27, %s3037_s28  }
  0x17   : > { %3012 = dma.done.wait (%p2851_p9), [#allocation4], 8192  }
  0x18   : > { %3014 = vsyncadd (%p2851_p9), [#allocation4], 4294959104  ;;  %s2219_s29 = sshll.u32 %s3114_s8, 5  ;;  %v389_v0 = vld [vmem:[%s4090_s1 + $0x10] sm:$0x3]  ;;  %vm538_vm0 = vcmask 1041408  }
  0x19   : > { %p346_p13 = scmp.lt.s32.totalorder %s2219_s29, 63  ;;  %v483_v1 = vunpack.c.l.b16 %v389_v0  ;;  %v2654_v4 = vld [vmem:[%s4090_s1 + $0x8] sm:$0xff]  ;;  %v2653_v5 = vld [vmem:[%s4090_s1] sm:$0xff]  ;;  %vm489_vm1 = vcmask 293888   ;;  %v2662_v62 = vld [vmem:[%s4092_s3 + $0x38] sm:$0xff]  ;;  %vm1113_vm7 = vcmask 130112  }
  0x1a   : > { %v3205_v38 = vld [vmem:[%s4091_s2] ss:$0 sm:$0xff]  ;;  %735 = vmatpush.bf16.msra.mxu1 %v2662_v62  ;;  %vm1117_vm8 = vcmask 195712   ;;  %vm1121_vm9 = vcmask 261312   ;;  %vm1125_vm10 = vcmask 326912   ;;  %vm1129_vm11 = vcmask 392512  }
  0x1b   : > { %v486_v2 = vpack.c.b16 %v483_v1, %v483_v1  ;;  %s4186_s29 = smov (!%p346_p13, %s2219_s29), 63  ;;  %vm1133_vm12 = vcmask 458112   ;;  %vm1137_vm13 = vcmask 523712   ;;  %vm1141_vm14 = vcmask 589312   ;;  %s342_s27 = sand.u32 1, %s3025_s12  }
  0x1c   : > { %s2220_s18 = sshll.u32 %s4186_s29, 2  ;;  %vm1145_vm15 = vcmask 654912   ;;  %s2218_s28 = sshll.u32 %s342_s27, 7 }
  0x1d   : > { %v540_v3 = vsel %vm538_vm0, %v486_v2, 0  ;;  %s3164_s26 = scalar_lea.vmem %s4089_s0, %s2220_s18  ;;  %vm1149_vm0 = vcmask 720512   ;;  %s3991_s29 = scalar_lea.vmem [#allocation6], %s2218_s28 }
  0x1e   : > { %547 = vmatpush.bf16.msra.mxu0 %v540_v3  ;;  %2831 = vmatpush.bf16.msra.mxu2 %v540_v3  ;;  %v2637_v6 = vld [vmem:[%s3164_s26] sm:$0xff]  ;;  %v2638_v7 = vld [vmem:[%s3164_s26 + $0x8] sm:$0xff]  ;;  %v2639_v8 = vld [vmem:[%s3164_s26 + $0x10] sm:$0xff]  ;;  %s2735_s30 = sshll.u32 %s3114_s8, 7  ;;  %s2135_s18 = sshll.u32 %s3991_s29, 4  ;;  %s2136_s18 = int_to_ptr.vmem [resolvable:$true] %s2135_s18 }
  0x1f   : > { %2832 = vmatpush.bf16.msra.mxu3 %v540_v3  ;;  %v2640_v9 = vld [vmem:[%s3164_s26 + $0x18] sm:$0xff]  ;;  %v2646_v10 = vld [vmem:[%s3164_s26 + $0x48] sm:$0xff]  ;;  %v2641_v11 = vld [vmem:[%s3164_s26 + $0x20] sm:$0xff]  ;;  %s2134_s17 = scalar_lea.hbm %s4098_s9, %s2735_s30  ;;  %s2123_s23 = scalar_lea.sflag [#allocation5], %s342_s27 }
  0x20   : > { %v2647_v12 = vld [vmem:[%s3164_s26 + $0x50] sm:$0xff]  ;;  %v2650_v13 = vld [vmem:[%s3164_s26 + $0x68] sm:$0xff]  ;;  %v2648_v15 = vld [vmem:[%s3164_s26 + $0x58] sm:$0xff]  ;;  %s2137_s22 = sshll.u32 %s2134_s17, 4  ;;  %s2987_s28 = scalar_lea.hbm %s4098_s9, 256  ;;  %s2138_s22 = int_to_ptr.hbm [resolvable:$true] %s2137_s22 }
  0x21   : > { %v2642_v14 = vld [vmem:[%s3164_s26 + $0x28] sm:$0xff]  ;;  %v2643_v16 = vld [vmem:[%s3164_s26 + $0x30] sm:$0xff]  ;;  %v2649_v18 = vld [vmem:[%s3164_s26 + $0x60] sm:$0xff]  ;;  %s2981_s8 = sshra.s32 %s2138_s22, 4  ;;  %s2982_s8 = int_to_ptr.hbm [resolvable:$true] %s2981_s8 }
  0x22   : > { %548 = vmatpush.bf16.msra.mxu0 %v2654_v4  ;;  %2833 = vmatpush.bf16.msra.mxu2 %v2654_v4  ;;  %v2651_v17 = vld [vmem:[%s3164_s26 + $0x70] sm:$0xff]  ;;  %v2644_v19 = vld [vmem:[%s3164_s26 + $0x38] sm:$0xff]  ;;  %v2645_v21 = vld [vmem:[%s3164_s26 + $0x40] sm:$0xff]  ;;  %s2983_s24 = scalar_lea.hbm %s2982_s8, 128  ;;  %p2988_p3 = scmp.lt.s32.totalorder %s2982_s8, %s4098_s9 }
  0x23   : > { %2834 = vmatpush.bf16.msra.mxu3 %v2654_v4  ;;  %v2652_v20 = vld [vmem:[%s3164_s26 + $0x78] sm:$0xff]  ;;  %v2661_v4 = vld [vmem:[%s4092_s3 + $0x30] sm:$0xff]  ;;  %s1368_s26 = sld [smem:[#allocation2]]  ;;  %p2984_p0 = scmp.ne.s32.totalorder %s2982_s8, %s2983_s24 }
  0x24   : > { %736 = vmatpush.bf16.msra.mxu1 %v2661_v4  ;;  %p2989_p4 = scmp.lt.s32.totalorder %s2987_s28, %s2983_s24 }
  0x25   : > { %p2985_p1 = pnand %p2984_p0, %p3131_p5 }
  0x26   : > { %549 = vmatpush.bf16.msra.mxu0 %v2653_v5  ;;  %2835 = vmatpush.bf16.msra.mxu2 %v2653_v5  ;;  %p2990_p7 = por %p2989_p4, %p2988_p3 }
  0x27   : > { %2836 = vmatpush.bf16.msra.mxu3 %v2653_v5  ;;  %p2986_p2 = pneg %p2985_p1 }
  0x29   : > { %2293 = vmatmul.msk.bf16.vlgmr.msra.gmra.mxu0 %vm489_vm1, %v2637_v6  ;;  %2302 = vmatmul.msk.bf16.vlgmr.msra.gmra.mxu2 %vm489_vm1, %v2646_v10  ;;  %v2660_v10 = vld [vmem:[%s4092_s3 + $0x28] sm:$0xff]  ;;  %p2991_p8 = pnand %p2990_p7, %p2986_p2 }
  0x2a   : > { %2306 = vmatmul.msk.bf16.vlgmr.msra.gmra.mxu3 %vm489_vm1, %v2650_v13  ;;  %737 = vmatpush.bf16.msra.mxu1 %v2660_v10 }
  0x39   : > { %2294 = vmatmul.msk.bf16.gmra.mxu0 %vm489_vm1, %v2638_v7  ;;  %2303 = vmatmul.msk.bf16.gmra.mxu2 %vm489_vm1, %v2647_v12 }
  0x3a   : > { %2307 = vmatmul.msk.bf16.gmra.mxu3 %vm489_vm1, %v2651_v17  ;;  %v2659_v17 = vld [vmem:[%s4092_s3 + $0x20] sm:$0xff] }
  0x3b   : > { %738 = vmatpush.bf16.msra.mxu1 %v2659_v17 }
  0x49   : > { %2295 = vmatmul.msk.bf16.gmra.mxu0 %vm489_vm1, %v2639_v8  ;;  %2304 = vmatmul.msk.bf16.gmra.mxu2 %vm489_vm1, %v2648_v15 }
  0x4a   : > { %2308 = vmatmul.msk.bf16.gmra.mxu3 %vm489_vm1, %v2652_v20 }
  0x59   : > { %2296 = vmatmul.msk.bf16.gmra.mxu0 %vm489_vm1, %v2640_v9  ;;  %2305 = vmatmul.msk.bf16.gmra.mxu2 %vm489_vm1, %v2649_v18 }
  0x69   : > { %2297 = vmatmul.msk.bf16.gmra.mxu0 %vm489_vm1, %v2641_v11 }
  0x79   : > { %2298 = vmatmul.msk.bf16.gmra.mxu0 %vm489_vm1, %v2642_v14 }
  0x89   : > { %2299 = vmatmul.msk.bf16.gmra.mxu0 %vm489_vm1, %v2643_v16 }
  0x99   : > { %2300 = vmatmul.msk.bf16.gmra.mxu0 %vm489_vm1, %v2644_v19 }
  0xa6   : > { %v551_v22 = vpop.f32.mrf.mxu0 }
  0xa7   : > { %v3211_v41 = vadd.f32 %v3205_v38, %v551_v22  ;;  %v2658_v22 = vld [vmem:[%s4092_s3 + $0x18] sm:$0xff] }
  0xa8   : > { %739 = vmatpush.bf16.msra.mxu1 %v2658_v22 }
  0xa9   : > { %2301 = vmatmul.msk.bf16.gmra.mxu0 %vm489_vm1, %v2645_v21  ;;  %vm1153_vm1 = vcmask 786112  }
  0xac   : > { %v596_v33 = vpop.f32.mrf.mxu2 }
  0xad   : > { %v3229_v51 = vpop.f32.mrf.mxu3 }
  0xae   : > { %v553_v23 = vpop.f32.mrf.mxu0 }
  0xaf   : > { %v3208_v39 = vadd.f32 %v3205_v38, %v553_v23 }
  0xb1   : > { %v631_v43 = vadd.f32 %v3208_v39, %v3211_v41 }
  0xb4   : > { %v3198_v35 = vpop.f32.mrf.mxu2 }
  0xb5   : > { %v618_v1 = vpop.f32.mrf.mxu3 }
  0xb6   : > { %v556_v24 = vpop.f32.mrf.mxu0 }
  0xb7   : > { %v3214_v42 = vadd.f32 %v3205_v38, %v556_v24 }
  0xb9   : > { %v632_v45 = vadd.f32 %v631_v43, %v3214_v42 }
  0xbc   : > { %v3200_v37 = vpop.f32.mrf.mxu2 }
  0xbd   : > { %v621_v16 = vpop.f32.mrf.mxu3 }
  0xbe   : > { %v558_v25 = vpop.f32.mrf.mxu0 }
  0xbf   : > { %v3219_v44 = vadd.f32 %v3205_v38, %v558_v25  ;;  %v3296_v25 = vadd.f32 %v3205_v38, %v596_v33  ;;  %v3312_v33 = vadd.f32 %v3205_v38, %v3200_v37 }
  0xc1   : > { %v633_v48 = vadd.f32 %v632_v45, %v3219_v44 }
  0xc4   : > { %v603_v47 = vpop.f32.mrf.mxu2 }
  0xc6   : > { %v561_v26 = vpop.f32.mrf.mxu0 }
  0xc7   : > { %v3223_v46 = vadd.f32 %v3205_v38, %v561_v26 }
  0xc9   : > { %v634_v52 = vadd.f32 %v633_v48, %v3223_v46 }
  0xcc   : > { %v606_v61 = vpop.f32.mrf.mxu2 }
  0xcd   : > { %v3323_v43 = vadd.f32 %v3205_v38, %v606_v61  ;;  %v3343_v61 = vadd.f32 %v3205_v38, %v3229_v51  ;;  %v2668_v51 = vld [vmem:[%s4094_s5 + $0x28] sm:$0xff] }
  0xce   : > { %v563_v27 = vpop.f32.mrf.mxu0 }
  0xcf   : > { %v3227_v49 = vadd.f32 %v3205_v38, %v563_v27  ;;  %v2657_v27 = vld [vmem:[%s4092_s3 + $0x10] sm:$0xff] }
  0xd0   : > { %740 = vmatpush.bf16.msra.mxu1 %v2657_v27 }
  0xd1   : > { %v635_v54 = vadd.f32 %v634_v52, %v3227_v49 }
  0xd4   : > { %v608_v13 = vpop.f32.mrf.mxu2 }
  0xd5   : > { %v3327_v37 = vadd.f32 %v3205_v38, %v608_v13 }
  0xd6   : > { %v566_v28 = vpop.f32.mrf.mxu0 }
  0xd7   : > { %v3233_v53 = vadd.f32 %v3205_v38, %v566_v28 }
  0xd9   : > { %v636_v56 = vadd.f32 %v635_v54, %v3233_v53 }
  0xdc   : > { %v611_v28 = vpop.f32.mrf.mxu2 }
  0xde   : > { %v568_v29 = vpop.f32.mrf.mxu0 }
  0xdf   : > { %v3237_v55 = vadd.f32 %v3205_v38, %v568_v29  ;;  %v3304_v29 = vadd.f32 %v3205_v38, %v3198_v35 }
  0xe1   : > { %v637_v58 = vadd.f32 %v636_v56, %v3237_v55 }
  0xe6   : > { %v571_v30 = vpop.f32.mrf.mxu0 }
  0xe7   : > { %v3241_v57 = vadd.f32 %v3205_v38, %v571_v30 }
  0xe9   : > { %v638_v63 = vadd.f32 %v637_v58, %v3241_v57 }
  0xee   : > { %v573_v31 = vpop.f32.mrf.mxu0 }
  0xef   : > { %v3245_v59 = vadd.f32 %v3205_v38, %v573_v31  ;;  %v623_v31 = vpop.f32.mrf.mxu3 }
  0xf1   : > { %v639_v2 = vadd.f32 %v638_v63, %v3245_v59  ;;  %v2669_v63 = vld [vmem:[%s4094_s5 + $0x30] sm:$0xff] }
  0xf6   : > { %v576_v32 = vpop.f32.mrf.mxu0 }
  0xf7   : > { %v3252_v0 = vadd.f32 %v3205_v38, %v576_v32  ;;  %v2656_v32 = vld [vmem:[%s4092_s3 + $0x8] sm:$0xff]  ;;  %v626_v54 = vpop.f32.mrf.mxu3 }
  0xf8   : > { %741 = vmatpush.bf16.msra.mxu1 %v2656_v32 }
  0xf9   : > { %v640_v5 = vadd.f32 %v639_v2, %v3252_v0  ;;  %v3350_v2 = vadd.f32 %v3205_v38, %v618_v1  ;;  %v3365_v1 = vadd.f32 %v3205_v38, %v626_v54  ;;  %v766_v54 = vld [vmem:[%s4095_s6] sm:$0x1] }
  0xfe   : > { %v578_v34 = vpop.f32.mrf.mxu0 }
  0xff   : > { %v3256_v3 = vadd.f32 %v3205_v38, %v578_v34 }
 0x101   : > { %v641_v7 = vadd.f32 %v640_v5, %v3256_v3  ;;  %v3354_v5 = vadd.f32 %v3205_v38, %v621_v16 }
 0x106   : > { %v581_v36 = vpop.f32.mrf.mxu0 }
 0x107   : > { %v3263_v6 = vadd.f32 %v3205_v38, %v581_v36  ;;  %v3316_v36 = vadd.f32 %v3205_v38, %v603_v47  ;;  %v3331_v47 = vadd.f32 %v3205_v38, %v611_v28 }
 0x109   : > { %v642_v11 = vadd.f32 %v641_v7, %v3263_v6 }
 0x10e   : > { %v583_v40 = vpop.f32.mrf.mxu0 }
 0x10f   : > { %v3267_v8 = vadd.f32 %v3205_v38, %v583_v40  ;;  %v2655_v40 = vld [vmem:[%s4092_s3] sm:$0xff] }
 0x110   : > { %742 = vmatpush.bf16.msra.mxu1 %v2655_v40 }
 0x111   : > { %v643_v14 = vadd.f32 %v642_v11, %v3267_v8  ;;  %v628_v11 = vpop.f32.mrf.mxu3 }
 0x112   : > { %v3373_v17 = vadd.f32 %v3205_v38, %v628_v11 }
 0x116   : > { %v586_v50 = vpop.f32.mrf.mxu0 }
 0x117   : > { %v3274_v12 = vadd.f32 %v3205_v38, %v586_v50  ;;  %v613_v50 = vpop.f32.mrf.mxu2 }
 0x118   : > { %v3336_v58 = vadd.f32 %v3205_v38, %v613_v50 }
 0x119   : > { %v644_v18 = vadd.f32 %v643_v14, %v3274_v12  ;;  %v2667_v14 = vld [vmem:[%s4094_s5 + $0x20] sm:$0xff] }
 0x11e   : > { %v588_v60 = vpop.f32.mrf.mxu0 }
 0x11f   : > { %v3278_v15 = vadd.f32 %v3205_v38, %v588_v60  ;;  %v2670_v60 = vld [vmem:[%s4094_s5 + $0x38] sm:$0xff] }
 0x120   : > { %815 = vmatpush.bf16.msrb.mxu2 %v2670_v60 }
 0x121   : > { %v645_v20 = vadd.f32 %v644_v18, %v3278_v15 }
 0x124   : > { %816 = vmatpush.bf16.msrb.mxu2 %v2669_v63 }
 0x126   : > { %v591_v9 = vpop.f32.mrf.mxu0 }
 0x127   : > { %v3285_v19 = vadd.f32 %v3205_v38, %v591_v9  ;;  %v3361_v9 = vadd.f32 %v3205_v38, %v623_v31  ;;  %v2663_v31 = vld [vmem:[%s4094_s5] sm:$0xff] }
 0x128   : > { %817 = vmatpush.bf16.msrb.mxu2 %v2668_v51 }
 0x129   : > { %v646_v23 = vadd.f32 %v645_v20, %v3285_v19  ;;  %v2666_v20 = vld [vmem:[%s4094_s5 + $0x18] sm:$0xff] }
 0x12c   : > { %818 = vmatpush.bf16.msrb.mxu2 %v2667_v14 }
 0x12e   : > { %v593_v21 = vpop.f32.mrf.mxu0 }
 0x12f   : > { %v3293_v24 = vadd.f32 %v3205_v38, %v593_v21  ;;  %v2664_v38 = vld [vmem:[%s4094_s5 + $0x8] sm:$0xff] }
 0x130   : > { %819 = vmatpush.bf16.msrb.mxu2 %v2666_v20 }
 0x131   : > { %v647_v26 = vadd.f32 %v646_v23, %v3293_v24  ;;  %v2665_v23 = vld [vmem:[%s4094_s5 + $0x10] sm:$0xff] }
 0x133   : > { %v648_v30 = vadd.f32 %v647_v26, %v3296_v25 }
 0x134   : > { %820 = vmatpush.bf16.msrb.mxu2 %v2665_v23 }
 0x135   : > { %v649_v34 = vadd.f32 %v648_v30, %v3304_v29 }
 0x137   : > { %v650_v35 = vadd.f32 %v649_v34, %v3312_v33 }
 0x138   : > { %821 = vmatpush.bf16.msrb.mxu2 %v2664_v38 }
 0x139   : > { %v651_v45 = vadd.f32 %v650_v35, %v3316_v36  ;;  %v686_v35 = vld [vmem:[%s4093_s4] sm:$0x1] }
 0x13b   : > { %v652_v48 = vadd.f32 %v651_v45, %v3323_v43 }
 0x13c   : > { %822 = vmatpush.bf16.msrb.mxu2 %v2663_v31 }
 0x13d   : > { %v653_v52 = vadd.f32 %v652_v48, %v3327_v37 }
 0x13f   : > { %v654_v56 = vadd.f32 %v653_v52, %v3331_v47 }
 0x141   : > { %v655_v62 = vadd.f32 %v654_v56, %v3336_v58 }
 0x143   : > { %v656_v4 = vadd.f32 %v655_v62, %v3343_v61 }
 0x145   : > { %v657_v7 = vadd.f32 %v656_v4, %v3350_v2 }
 0x147   : > { %v658_v10 = vadd.f32 %v657_v7, %v3354_v5 }
 0x149   : > { %v659_v13 = vadd.f32 %v658_v10, %v3361_v9 }
 0x14b   : > { %v660_v16 = vadd.f32 %v659_v13, %v3365_v1 }
 0x14d   : > { %v661_v18 = vadd.f32 %v660_v16, %v3373_v17 }
 0x14f   : > { %v662_v21 = vrot.slane %v661_v18, 4 }
 0x151   : > { %v663_v22 = vadd.f32 %v662_v21, %v661_v18 }
 0x153   : > { %v664_v26 = vrot.slane %v663_v22, 2 }
 0x155   : > { %v665_v27 = vadd.f32 %v664_v26, %v663_v22 }
 0x157   : > { %v666_v28 = vrot.slane %v665_v27, 1 }
 0x159   : > { %v667_v30 = vadd.f32 %v666_v28, %v665_v27 }
 0x15b   : > { %v668_v32 = vmul.f32 0.00390625, %v667_v30 }
 0x15d   : > { %v669_v34 = vpack.c.bf16 %v668_v32, %v668_v32 }
 0x15f   : > { %743 = vmatmul.bf16.vlgmr.msra.gmra.mxu1 %v669_v34 }
 0x1dc   : > { %v744_v40 = vpop.f32.mrf.mxu1 }
 0x1dd   : > { %v745_v45 = vadd.f32 %v744_v40, %v686_v35 }
 0x1df   : > { %v748_v48 = vmax.f32 %v745_v45, 0.0 }
 0x1e1   : > { %v749_v50 = vpack.c.bf16 %v748_v48, %v748_v48 }
 0x1e3   : > { %823 = vmatmul.bf16.vlgmr.msrb.gmra.mxu2 %v749_v50 }
 0x1e4   : > { %v746_v52 = vpop.f32.mrf.mxu1 }
 0x1e5   : > { %v2432_v52 = vld [vmem:[#allocation3 + $0x70] sm:$0xf] }
 0x266   : > { %v824_v56 = vpop.f32.mrf.mxu2 }
 0x267   : > { %v825_v60 = vadd.f32 %v824_v56, %v766_v54  ;;  %v2686_v54 = vld [vmem:[#allocation3 + $0x74] sm:$0xf0]  ;;  %v2424_v56 = vld [vmem:[#allocation3 + $0x60] sm:$0xf] }
 0x269   : > { %v2373_v62 = vmul.f32 -1.442695, %v825_v60  ;;  %v2433_v60 = vor.u32 %v2686_v54, %v2432_v52 }
 0x26b   : > { %2925 = vpow2.f32 %v2373_v62  ;;  %v2684_v62 = vld [vmem:[#allocation3 + $0x64] sm:$0xf0]  ;;  %1690 = vmatpush.bf16.msrb.mxu3 %v2433_v60 }
 0x26e   : > { %v826_v63 = vpop.f32.mrf.mxu2 }
 0x26f   : > { %v2425_v63 = vor.u32 %v2684_v62, %v2424_v56 }
 0x271   : > { %v2926_v4 = vpop.eup %2925  ;;  %1691 = vmatpush.bf16.msrb.mxu3 %v2425_v63 }
 0x272   : > { %v831_v7 = vadd.f32 1.0, %v2926_v4 }
 0x274   : > { %2927 = vrcp.f32 %v831_v7  ;;  %v843_v13 = vand.u32 2147483648, %v831_v7  ;;  %v841_v16 = vand.u32 2147483647, %v831_v7  ;;  %vm837_vm3 = vweird.f32 %v831_v7 }
 0x276   : > { %v844_v20 = vor.u32 1.1754944e-38, %v843_v13  ;;  %vm842_vm5 = vcmp.eq.f32.partialorder %v841_v16, 8.507059e+37  ;;  %v2682_v13 = vld [vmem:[#allocation3 + $0x54] sm:$0xf0] }
 0x27a   : > { %v2928_v51 = vpop.eup %2927 }
 0x27b   : > { %v833_v10 = vmul.f32 %v2928_v51, %v831_v7  ;;  %vm838_vm2 = vweird.f32 %v2928_v51 }
 0x27c   : > { %vm839_vm4 = vmor %vm837_vm3, %vm838_vm2  ;;  %vm1157_vm2 = vcmask 851712   ;;  %vm1161_vm3 = vcmask 917312  }
 0x27d   : > { %v834_v11 = vsub.f32 1.0, %v833_v10 }
 0x27f   : > { %v835_v14 = vmul.f32 %v2928_v51, %v834_v11  ;;  %v2416_v11 = vld [vmem:[#allocation3 + $0x50] sm:$0xf] }
 0x281   : > { %v836_v18 = vadd.f32 %v2928_v51, %v835_v14  ;;  %v2408_v14 = vld [vmem:[#allocation3 + $0x40] sm:$0xf] }
 0x283   : > { %v840_v21 = vsel %vm839_vm4, %v2928_v51, %v836_v18  ;;  %v2417_v18 = vor.u32 %v2682_v13, %v2416_v11  ;;  %vm1165_vm4 = vcmask 982912  }
 0x284   : > { %v845_v22 = vsel %vm842_vm5, %v844_v20, %v840_v21  ;;  %v2680_v20 = vld [vmem:[#allocation3 + $0x44] sm:$0xf0]  ;;  %vm1169_vm5 = vcmask 1048512  }
 0x285   : > { %v847_v23 = vmul.f32 2.0, %v845_v22  ;;  %1692 = vmatpush.bf16.msrb.mxu3 %v2417_v18  ;;  %v2409_v22 = vor.u32 %v2680_v20, %v2408_v14  ;;  %v2384_v20 = vld [vmem:[#allocation3 + $0x10] sm:$0xf] }
 0x287   : > { %v3394_v26 = vperm.slane %v847_v23, 0 }
 0x289   : > { %v3398_v27 = vmul.f32 %v3394_v26, %v3211_v41  ;;  %v3402_v38 = vmul.f32 %v3394_v26, %v3214_v42  ;;  %v3406_v28 = vmul.f32 %v3394_v26, %v3223_v46  ;;  %v3413_v30 = vmul.f32 %v3394_v26, %v3219_v44  ;;  %1693 = vmatpush.bf16.msrb.mxu3 %v2409_v22 }
 0x28a   : > { %v3417_v41 = vmul.f32 %v3394_v26, %v3227_v49  ;;  %v3421_v42 = vmul.f32 %v3394_v26, %v3208_v39  ;;  %v3428_v46 = vmul.f32 %v3394_v26, %v3237_v55  ;;  %v3432_v44 = vmul.f32 %v3394_v26, %v3241_v57 }
 0x28b   : > { %887 = vadd.xlane.f32.xlu1 %v3402_v38  ;;  %891 = vadd.xlane.f32.xlu2 %v3406_v28  ;;  %v3436_v49 = vmul.f32 %v3394_v26, %v3233_v53  ;;  %v3443_v39 = vmul.f32 %v3394_v26, %v3252_v0  ;;  %v3447_v55 = vmul.f32 %v3394_v26, %v3256_v3 }
 0x28c   : > { %883 = vadd.xlane.f32.xlu0 %v3398_v27  ;;  %4128 = vst [vmem:[#allocation9_spill] sm:$0xff] %v3428_v46  ;;  %v3451_v57 = vmul.f32 %v3394_v26, %v3245_v59  ;;  %v3458_v53 = vmul.f32 %v3394_v26, %v3267_v8  ;;  %v3462_v0 = vmul.f32 %v3394_v26, %v3274_v12 }
 0x28d   : > { %4129 = vst [vmem:[#allocation10_spill] sm:$0xff] %v3432_v44  ;;  %v3466_v3 = vmul.f32 %v3394_v26, %v3263_v6  ;;  %v3473_v59 = vmul.f32 %v3394_v26, %v3285_v19  ;;  %v3477_v8 = vmul.f32 %v3394_v26, %v3293_v24  ;;  %v3481_v12 = vmul.f32 %v3394_v26, %v3278_v15 }
 0x28e   : > { %4130 = vst [vmem:[#allocation11_spill] sm:$0xff] %v3436_v49  ;;  %v3488_v6 = vmul.f32 %v3394_v26, %v3304_v29  ;;  %v3492_v19 = vmul.f32 %v3394_v26, %v3312_v33  ;;  %v3496_v24 = vmul.f32 %v3394_v26, %v3296_v25  ;;  %v3503_v15 = vmul.f32 %v3394_v26, %v3323_v43 }
 0x28f   : > { %4131 = vst [vmem:[#allocation12_spill] sm:$0xff] %v3443_v39  ;;  %v3507_v29 = vmul.f32 %v3394_v26, %v3327_v37  ;;  %v3511_v33 = vmul.f32 %v3394_v26, %v3316_v36  ;;  %v3518_v25 = vmul.f32 %v3394_v26, %v3336_v58  ;;  %v3522_v43 = vmul.f32 %v3394_v26, %v3343_v61 }
 0x290   : > { %4132 = vst [vmem:[#allocation13_spill] sm:$0xff] %v3447_v55  ;;  %v3526_v37 = vmul.f32 %v3394_v26, %v3331_v47  ;;  %v4099_v36 = vlaneseq  ;;  %v3533_v31 = vmul.f32 %v3394_v26, %v3354_v5  ;;  %v3537_v58 = vmul.f32 %v3394_v26, %v3361_v9 }
 0x291   : > { %4133 = vst [vmem:[#allocation14_spill] sm:$0xff] %v3451_v57  ;;  %v3541_v61 = vmul.f32 %v3394_v26, %v3350_v2  ;;  %v3552_v5 = vmul.f32 %v3394_v26, %v3373_v17  ;;  %v3556_v9 = vmul.f32 %v3394_v26, %v3365_v1 }
 0x292   : > { %4134 = vst [vmem:[#allocation15_spill] sm:$0xff] %v3458_v53  ;;  %v3546_v47 = vand.u32 127, %v4099_v36 }
 0x293   : > { %889 = vadd.xlane.f32.xlu1 %v3413_v30  ;;  %893 = vadd.xlane.f32.xlu2 %v3417_v41  ;;  %4135 = vst [vmem:[#allocation16_spill] sm:$0xff] %v3462_v0 }
 0x294   : > { %885 = vadd.xlane.f32.xlu0 %v3421_v42  ;;  %4136 = vst [vmem:[#allocation17_spill] sm:$0xff] %v3466_v3  ;;  %vm979_vm6 = vcmp.lt.s32.totalorder %v3546_v47, 8  ;;  %v3612_v52 = vadd.s32 4294967280, %v3546_v47  ;;  %v3615_v63 = vadd.s32 4294967272, %v3546_v47  ;;  %v3626_v13 = vadd.s32 4294967264, %v3546_v47 }
 0x295   : > { %4137 = vst [vmem:[#allocation18_spill] sm:$0xff] %v3473_v59  ;;  %v982_v2 = vsel %vm979_vm6, %v3398_v27, -inf  ;;  %v984_v32 = vsel %vm979_vm6, %v3402_v38, -inf  ;;  %v985_v17 = vsel %vm979_vm6, %v3413_v30, -inf  ;;  %v983_v1 = vsel %vm979_vm6, %v3421_v42, -inf }
 0x296   : > { %4138 = vst [vmem:[#allocation19_spill] sm:$0xff] %v3477_v8  ;;  %v999_v34 = vsel %vm979_vm6, %v3477_v8, -inf  ;;  %v986_v35 = vsel %vm979_vm6, %v3406_v28, -inf  ;;  %v998_v40 = vsel %vm979_vm6, %v3473_v59, -inf  ;;  %v987_v45 = vsel %vm979_vm6, %v3417_v41, -inf }
 0x297   : > { %4139 = vst [vmem:[#allocation20_spill] sm:$0xff] %v3481_v12  ;;  %v1001_v48 = vsel %vm979_vm6, %v3488_v6, -inf  ;;  %v1000_v50 = vsel %vm979_vm6, %v3496_v24, -inf  ;;  %v1002_v4 = vsel %vm979_vm6, %v3492_v19, -inf  ;;  %v989_v7 = vsel %vm979_vm6, %v3428_v46, -inf }
 0x298   : > { %4140 = vst [vmem:[#allocation21_spill] sm:$0xff] %v3488_v6  ;;  %v988_v51 = vsel %vm979_vm6, %v3436_v49, -inf  ;;  %v990_v23 = vsel %vm979_vm6, %v3432_v44, -inf  ;;  %v1004_v26 = vsel %vm979_vm6, %v3503_v15, -inf  ;;  %v991_v18 = vsel %vm979_vm6, %v3451_v57, -inf }
 0x299   : > { %4141 = vst [vmem:[#allocation22_spill] sm:$0xff] %v3492_v19 }
 0x29a   : > { %4142 = vst [vmem:[#allocation23_spill] sm:$0xff] %v3496_v24 }
 0x29b   : > { %897 = vadd.xlane.f32.xlu1 %v3428_v46  ;;  %899 = vadd.xlane.f32.xlu2 %v3432_v44  ;;  %4143 = vst [vmem:[#allocation24_spill] sm:$0xff] %v3503_v15  ;;  %v2586_v46 = vld [vmem:[#allocation3 + $0x1a8] sm:$0xf0] }
 0x29c   : > { %895 = vadd.xlane.f32.xlu0 %v3436_v49  ;;  %4144 = vst [vmem:[#allocation25_spill] sm:$0xff] %v3507_v29  ;;  %v2723_v49 = vld [vmem:[#allocation3 + $0x1a4] sm:$0xf] }
 0x29d   : > { %4145 = vst [vmem:[#allocation26_spill] sm:$0xff] %v3511_v33 }
 0x29e   : > { %4146 = vst [vmem:[#allocation27_spill] sm:$0xff] %v3518_v25 }
 0x29f   : > { %4147 = vst [vmem:[#allocation28_spill] sm:$0xff] %v3522_v43 }
 0x2a0   : > { %4148 = vst [vmem:[#allocation29_spill] sm:$0xff] %v3526_v37 }
 0x2a1   : > { %4149 = vst [vmem:[#allocation30_spill] sm:$0xff] %v3533_v31 }
 0x2a2   : > { %4150 = vst [vmem:[#allocation31_spill] sm:$0xff] %v3537_v58 }
 0x2a3   : > { %903 = vadd.xlane.f32.xlu1 %v3443_v39  ;;  %905 = vadd.xlane.f32.xlu2 %v3447_v55  ;;  %4151 = vst [vmem:[#allocation32_spill] sm:$0xff] %v3541_v61 }
 0x2a4   : > { %901 = vadd.xlane.f32.xlu0 %v3451_v57  ;;  %4152 = vst [vmem:[#allocation33_spill] sm:$0xff] %v3552_v5  ;;  %v2554_v57 = vld [vmem:[#allocation3 + $0x168] sm:$0xf0] }
 0x2a5   : > { %4153 = vst [vmem:[#allocation34_spill] sm:$0xff] %v3556_v9 }
 0x2ab   : > { %909 = vadd.xlane.f32.xlu1 %v3458_v53  ;;  %911 = vadd.xlane.f32.xlu2 %v3462_v0 }
 0x2ac   : > { %907 = vadd.xlane.f32.xlu0 %v3466_v3 }
 0x2b3   : > { %915 = vadd.xlane.f32.xlu1 %v3473_v59  ;;  %917 = vadd.xlane.f32.xlu2 %v3477_v8  ;;  %v2731_v59 = vld [vmem:[#allocation3 + $0x1e4] sm:$0xf]  ;;  %v2618_v8 = vld [vmem:[#allocation3 + $0x1e8] sm:$0xf0] }
 0x2b4   : > { %913 = vadd.xlane.f32.xlu0 %v3481_v12 }
 0x2bb   : > { %921 = vadd.xlane.f32.xlu1 %v3488_v6  ;;  %923 = vadd.xlane.f32.xlu2 %v3492_v19 }
 0x2bc   : > { %919 = vadd.xlane.f32.xlu0 %v3496_v24 }
 0x2c3   : > { %927 = vadd.xlane.f32.xlu1 %v3503_v15  ;;  %929 = vadd.xlane.f32.xlu2 %v3507_v29 }
 0x2c4   : > { %925 = vadd.xlane.f32.xlu0 %v3511_v33 }
 0x2cb   : > { %933 = vadd.xlane.f32.xlu1 %v3518_v25  ;;  %935 = vadd.xlane.f32.xlu2 %v3522_v43 }
 0x2cc   : > { %931 = vadd.xlane.f32.xlu0 %v3526_v37 }
 0x2d3   : > { %939 = vadd.xlane.f32.xlu1 %v3533_v31  ;;  %941 = vadd.xlane.f32.xlu2 %v3537_v58 }
 0x2d4   : > { %937 = vadd.xlane.f32.xlu0 %v3541_v61 }
 0x2db   : > { %945 = vadd.xlane.f32.xlu1 %v3552_v5  ;;  %1014 = vmax.xlane.f32.xlu2 %v982_v2  ;;  %v1003_v2 = vsel %vm979_vm6, %v3511_v33, -inf  ;;  %v2730_v33 = vld [vmem:[#allocation3 + $0x1d4] sm:$0xf0] }
 0x2dc   : > { %943 = vadd.xlane.f32.xlu0 %v3556_v9 }
 0x2e3   : > { %1018 = vmax.xlane.f32.xlu1 %v984_v32  ;;  %1020 = vmax.xlane.f32.xlu2 %v985_v17  ;;  %v2400_v32 = vld [vmem:[#allocation3 + $0x30] sm:$0xf]  ;;  %v2678_v17 = vld [vmem:[#allocation3 + $0x34] sm:$0xf0] }
 0x2e4   : > { %1016 = vmax.xlane.f32.xlu0 %v983_v1 }
 0x2eb   : > { %1048 = vmax.xlane.f32.xlu1 %v999_v34  ;;  %1022 = vmax.xlane.f32.xlu2 %v986_v35  ;;  %v2401_v34 = vor.u32 %v2678_v17, %v2400_v32  ;;  %v2392_v35 = vld [vmem:[#allocation3 + $0x20] sm:$0xf] }
 0x2ec   : > { %1046 = vmax.xlane.f32.xlu0 %v998_v40  ;;  %v2676_v40 = vld [vmem:[#allocation3 + $0x24] sm:$0xf0] }
 0x2ed   : > { %1694 = vmatpush.bf16.msrb.mxu3 %v2401_v34  ;;  %v2393_v62 = vor.u32 %v2676_v40, %v2392_v35  ;;  %v2672_v34 = vld [vmem:[#allocation3 + $0x4] sm:$0xf0]  ;;  %v2702_v35 = vld [vmem:[#allocation3 + $0xf4] sm:$0xf0] }
 0x2f1   : > { %1695 = vmatpush.bf16.msrb.mxu3 %v2393_v62 }
 0x2f3   : > { %1024 = vmax.xlane.f32.xlu1 %v987_v45  ;;  %1052 = vmax.xlane.f32.xlu2 %v1001_v48 }
 0x2f4   : > { %1050 = vmax.xlane.f32.xlu0 %v1000_v50  ;;  %v3609_v50 = vadd.s32 4294967288, %v3546_v47 }
 0x2fb   : > { %1054 = vmax.xlane.f32.xlu1 %v1002_v4  ;;  %1028 = vmax.xlane.f32.xlu2 %v989_v7  ;;  %v1005_v4 = vsel %vm979_vm6, %v3507_v29, -inf  ;;  %v992_v7 = vsel %vm979_vm6, %v3443_v39, -inf }
 0x2fc   : > { %1026 = vmax.xlane.f32.xlu0 %v988_v51 }
 0x2fe   : > { %v888_v10 = vpop.xlane.xlu1 %887  ;;  %v892_v16 = vpop.xlane.xlu2 %891 }
 0x2ff   : > { %v884_v21 = vpop.xlane.xlu0 %883  ;;  %v949_v54 = vmul.f32 0.125, %v888_v10  ;;  %v951_v22 = vmul.f32 0.125, %v892_v16  ;;  %v3639_v16 = vadd.s32 4294967248, %v3546_v47 }
 0x300   : > { %v947_v45 = vmul.f32 0.125, %v884_v21  ;;  %v2674_v21 = vld [vmem:[#allocation3 + $0x14] sm:$0xf0] }
 0x301   : > { %v1116_v14 = vperm.slane %v949_v54, %v3612_v52 }
 0x302   : > { %v1110_v51 = vperm.slane %v947_v45, %v3546_v47 }
 0x303   : > { %1030 = vmax.xlane.f32.xlu1 %v990_v23  ;;  %1058 = vmax.xlane.f32.xlu2 %v1004_v26  ;;  %v2385_v26 = vor.u32 %v2674_v21, %v2384_v20 }
 0x304   : > { %1056 = vmax.xlane.f32.xlu0 %v1003_v2  ;;  %v2496_v2 = vld [vmem:[#allocation3 + $0xf0] sm:$0xf] }
 0x305   : > { %v2497_v54 = vor.u32 %v2702_v35, %v2496_v2  ;;  %1696 = vmatpush.bf16.msrb.mxu3 %v2385_v26  ;;  %v2488_v2 = vld [vmem:[#allocation3 + $0xe0] sm:$0xf] }
 0x306   : > { %v890_v1 = vpop.xlane.xlu1 %889  ;;  %v894_v48 = vpop.xlane.xlu2 %893 }
 0x307   : > { %v886_v56 = vpop.xlane.xlu0 %885  ;;  %v950_v11 = vmul.f32 0.125, %v890_v1  ;;  %v2376_v1 = vld [vmem:[#allocation3] sm:$0xf]  ;;  %v952_v62 = vmul.f32 0.125, %v894_v48  ;;  %1703 = vmatpush.bf16.msrb.mxu1 %v2497_v54  ;;  %v1007_v48 = vsel %vm979_vm6, %v3518_v25, -inf }
 0x308   : > { %v948_v60 = vmul.f32 0.125, %v886_v56  ;;  %v3636_v56 = vadd.s32 4294967256, %v3546_v47 }
 0x309   : > { %v1120_v40 = vperm.slane %v950_v11, %v3615_v63  ;;  %v993_v11 = vsel %vm979_vm6, %v3447_v55, -inf }
 0x30a   : > { %v1112_v10 = vperm.slane %v948_v60, %v3609_v50 }
 0x30b   : > { %1060 = vmax.xlane.f32.xlu1 %v1005_v4  ;;  %1034 = vmax.xlane.f32.xlu2 %v992_v7 }
 0x30c   : > { %v1114_v23 = vsel %vm1113_vm7, %v1112_v10, %v1110_v51  ;;  %1032 = vmax.xlane.f32.xlu0 %v991_v18  ;;  %v2377_v51 = vor.u32 %v2672_v34, %v2376_v1  ;;  %v1124_v10 = vperm.slane %v951_v22, %v3626_v13  ;;  %v1006_v22 = vsel %vm979_vm6, %v3526_v37, -inf }
 0x30d   : > { %v1118_v32 = vsel %vm1117_vm8, %v1116_v14, %v1114_v23  ;;  %v3647_v14 = vadd.s32 4294967240, %v3546_v47  ;;  %v1128_v23 = vperm.slane %v952_v62, %v3636_v56 }
 0x30e   : > { %v898_v17 = vpop.xlane.xlu1 %897  ;;  %v900_v45 = vpop.xlane.xlu2 %899  ;;  %v1122_v4 = vsel %vm1121_vm9, %v1120_v40, %v1118_v32  ;;  %1697 = vmatpush.bf16.msrb.mxu3 %v2377_v51  ;;  %v2700_v32 = vld [vmem:[#allocation3 + $0xe4] sm:$0xf0]  ;;  %v3661_v40 = vadd.s32 4294967224, %v3546_v47 }
 0x30f   : > { %v896_v60 = vpop.xlane.xlu0 %895  ;;  %v954_v18 = vmul.f32 0.125, %v898_v17  ;;  %v1126_v20 = vsel %vm1125_vm10, %v1124_v10, %v1122_v4  ;;  %v2480_v17 = vld [vmem:[#allocation3 + $0xd0] sm:$0xf]  ;;  %v2489_v54 = vor.u32 %v2700_v32, %v2488_v2  ;;  %v3664_v4 = vadd.s32 4294967232, %v3546_v47 }
 0x310   : > { %v953_v7 = vmul.f32 0.125, %v896_v60  ;;  %v1130_v34 = vsel %vm1129_vm11, %v1128_v23, %v1126_v20  ;;  %v2698_v60 = vld [vmem:[#allocation3 + $0xd4] sm:$0xf0]  ;;  %v955_v62 = vmul.f32 0.125, %v900_v45  ;;  %v1008_v20 = vsel %vm979_vm6, %v3522_v43, -inf }
 0x311   : > { %v1136_v1 = vperm.slane %v954_v18, %v3647_v14  ;;  %1704 = vmatpush.bf16.msrb.mxu1 %v2489_v54  ;;  %v3668_v18 = vadd.s32 4294967216, %v3546_v47  ;;  %v3683_v2 = vadd.s32 4294967208, %v3546_v47  ;;  %v2696_v54 = vld [vmem:[#allocation3 + $0xc4] sm:$0xf0] }
 0x312   : > { %v1132_v21 = vperm.slane %v953_v7, %v3639_v16  ;;  %v1140_v23 = vperm.slane %v955_v62, %v3664_v4 }
 0x313   : > { %1036 = vmax.xlane.f32.xlu1 %v993_v11  ;;  %1064 = vmax.xlane.f32.xlu2 %v1007_v48  ;;  %v2481_v11 = vor.u32 %v2698_v60, %v2480_v17  ;;  %v2464_v60 = vld [vmem:[#allocation3 + $0xb0] sm:$0xf] }
 0x314   : > { %1062 = vmax.xlane.f32.xlu0 %v1006_v22  ;;  %v1134_v7 = vsel %vm1133_vm12, %v1132_v21, %v1130_v34  ;;  %v995_v21 = vsel %vm979_vm6, %v3458_v53, -inf  ;;  %v2472_v34 = vld [vmem:[#allocation3 + $0xc0] sm:$0xf] }
 0x315   : > { %v1138_v22 = vsel %vm1137_vm13, %v1136_v1, %v1134_v7  ;;  %1705 = vmatpush.bf16.msrb.mxu1 %v2481_v11  ;;  %v3692_v11 = vadd.s32 4294967192, %v3546_v47 }
 0x316   : > { %v904_v26 = vpop.xlane.xlu1 %903  ;;  %v906_v35 = vpop.xlane.xlu2 %905  ;;  %v1142_v17 = vsel %vm1141_vm14, %v1140_v23, %v1138_v22 }
 0x317   : > { %v902_v51 = vpop.xlane.xlu0 %901  ;;  %v957_v48 = vmul.f32 0.125, %v904_v26  ;;  %v994_v26 = vsel %vm979_vm6, %v3466_v3, -inf  ;;  %v958_v62 = vmul.f32 0.125, %v906_v35  ;;  %v996_v35 = vsel %vm979_vm6, %v3462_v0, -inf  ;;  %v2704_v3 = vld [vmem:[#allocation3 + $0x104] sm:$0xf0] }
 0x318   : > { %v956_v10 = vmul.f32 0.125, %v902_v51  ;;  %v2602_v0 = vld [vmem:[#allocation3 + $0x1c8] sm:$0xf0] }
 0x319   : > { %v1148_v32 = vperm.slane %v957_v48, %v3668_v18 }
 0x31a   : > { %v1144_v45 = vperm.slane %v956_v10, %v3661_v40  ;;  %v3689_v10 = vadd.s32 4294967200, %v3546_v47 }
 0x31b   : > { %1066 = vmax.xlane.f32.xlu1 %v1008_v20  ;;  %1040 = vmax.xlane.f32.xlu2 %v995_v21  ;;  %v2473_v20 = vor.u32 %v2696_v54, %v2472_v34  ;;  %v2694_v21 = vld [vmem:[#allocation3 + $0xb4] sm:$0xf0] }
 0x31c   : > { %1038 = vmax.xlane.f32.xlu0 %v994_v26  ;;  %v1146_v7 = vsel %vm1145_vm15, %v1144_v45, %v1142_v17  ;;  %v2465_v22 = vor.u32 %v2694_v21, %v2464_v60  ;;  %v1152_v45 = vperm.slane %v958_v62, %v3683_v2  ;;  %v2692_v21 = vld [vmem:[#allocation3 + $0xa4] sm:$0xf0] }
 0x31d   : > { %1706 = vmatpush.bf16.msrb.mxu1 %v2473_v20  ;;  %v1150_v23 = vsel %vm1149_vm0, %v1148_v32, %v1146_v7  ;;  %v1009_v32 = vsel %vm979_vm6, %v3541_v61, -inf  ;;  %v2456_v20 = vld [vmem:[#allocation3 + $0xa0] sm:$0xf] }
 0x31e   : > { %v910_v1 = vpop.xlane.xlu1 %909  ;;  %v912_v51 = vpop.xlane.xlu2 %911  ;;  %v1154_v60 = vsel %vm1153_vm1, %v1152_v45, %v1150_v23  ;;  %v2457_v43 = vor.u32 %v2692_v21, %v2456_v20  ;;  %v1011_v45 = vsel %vm979_vm6, %v3537_v58, -inf  ;;  %v2688_v20 = vld [vmem:[#allocation3 + $0x84] sm:$0xf0]  ;;  %v2685_v21 = vld [vmem:[#allocation3 + $0x74] sm:$0xf] }
 0x31f   : > { %v908_v36 = vpop.xlane.xlu0 %907  ;;  %v960_v48 = vmul.f32 0.125, %v910_v1  ;;  %v1010_v1 = vsel %vm979_vm6, %v3533_v31, -inf  ;;  %v961_v34 = vmul.f32 0.125, %v912_v51  ;;  %v3713_v31 = vadd.s32 4294967176, %v3546_v47 }
 0x320   : > { %v959_v26 = vmul.f32 0.125, %v908_v36  ;;  %v3704_v36 = vadd.s32 4294967184, %v3546_v47 }
 0x321   : > { %v1160_v54 = vperm.slane %v960_v48, %v3692_v11  ;;  %1707 = vmatpush.bf16.msrb.mxu1 %v2465_v22 }
 0x322   : > { %v1156_v17 = vperm.slane %v959_v26, %v3689_v10  ;;  %v2448_v26 = vld [vmem:[#allocation3 + $0x90] sm:$0xf]  ;;  %v1164_v22 = vperm.slane %v961_v34, %v3704_v36 }
 0x323   : > { %1042 = vmax.xlane.f32.xlu1 %v996_v35  ;;  %1070 = vmax.xlane.f32.xlu2 %v1010_v1  ;;  %v2690_v1 = vld [vmem:[#allocation3 + $0x94] sm:$0xf0] }
 0x324   : > { %1068 = vmax.xlane.f32.xlu0 %v1009_v32  ;;  %v1158_v62 = vsel %vm1157_vm2, %v1156_v17, %v1154_v60  ;;  %v2449_v23 = vor.u32 %v2690_v1, %v2448_v26  ;;  %v1012_v32 = vsel %vm979_vm6, %v3556_v9, -inf }
 0x325   : > { %v1162_v48 = vsel %vm1161_vm3, %v1160_v54, %v1158_v62  ;;  %1708 = vmatpush.bf16.msrb.mxu1 %v2457_v43  ;;  %v997_v54 = vsel %vm979_vm6, %v3481_v12, -inf  ;;  %v2584_v12 = vld [vmem:[#allocation3 + $0x1a0] sm:$0xf] }
 0x326   : > { %v916_v7 = vpop.xlane.xlu1 %915  ;;  %v918_v35 = vpop.xlane.xlu2 %917  ;;  %v1166_v43 = vsel %vm1165_vm4, %v1164_v22, %v1162_v48  ;;  %v2426_v22 = vld [vmem:[#allocation3 + $0x68] sm:$0xf0] }
 0x327   : > { %v914_v51 = vpop.xlane.xlu0 %913  ;;  %v964_v9 = vmul.f32 0.125, %v918_v35  ;;  %v963_v58 = vmul.f32 0.125, %v916_v7  ;;  %v1013_v7 = vsel %vm979_vm6, %v3552_v5, -inf }
 0x328   : > { %v962_v61 = vmul.f32 0.125, %v914_v51  ;;  %v2434_v51 = vld [vmem:[#allocation3 + $0x78] sm:$0xf0] }
 0x329   : > { %1709 = vmatpush.bf16.msrb.mxu1 %v2449_v23  ;;  %v2437_v48 = vor.u32 %v2685_v21, %v2434_v51  ;;  %v1171_v29 = vperm.slane %v963_v58, %v3546_v47  ;;  %v2679_v51 = vld [vmem:[#allocation3 + $0x44] sm:$0xf] }
 0x32a   : > { %v1168_v17 = vperm.slane %v962_v61, %v3713_v31  ;;  %v2440_v61 = vld [vmem:[#allocation3 + $0x80] sm:$0xf] }
 0x32b   : > { %1072 = vmax.xlane.f32.xlu1 %v1011_v45  ;;  %1074 = vmax.xlane.f32.xlu2 %v1012_v32  ;;  %v2441_v1 = vor.u32 %v2688_v20, %v2440_v61  ;;  %v2683_v45 = vld [vmem:[#allocation3 + $0x64] sm:$0xf] }
 0x32c   : > { %1044 = vmax.xlane.f32.xlu0 %v997_v54  ;;  %v1170_v34 = vsel %vm1169_vm5, %v1168_v17, %v1166_v43  ;;  %v2429_v23 = vor.u32 %v2683_v45, %v2426_v22  ;;  %v2681_v17 = vld [vmem:[#allocation3 + $0x54] sm:$0xf]  ;;  %v2418_v43 = vld [vmem:[#allocation3 + $0x58] sm:$0xf0]  ;;  %v2410_v45 = vld [vmem:[#allocation3 + $0x48] sm:$0xf0] }
 0x32d   : > { %v3729_v62 = vpack.c.bf16 %v1170_v34, %v1170_v34  ;;  %1710 = vmatpush.bf16.msrb.mxu1 %v2441_v1  ;;  %v1172_v34 = vperm.slane %v964_v9, %v3609_v50  ;;  %v2421_v21 = vor.u32 %v2681_v17, %v2418_v43  ;;  %v2413_v5 = vor.u32 %v2679_v51, %v2410_v45  ;;  %v2677_v43 = vld [vmem:[#allocation3 + $0x34] sm:$0xf] }
 0x32e   : > { %v922_v60 = vpop.xlane.xlu1 %921  ;;  %v924_v26 = vpop.xlane.xlu2 %923 }
 0x32f   : > { %1698 = vmatmul.bf16.vlgmr.msrb.gmra.mxu3 %v3729_v62  ;;  %v920_v32 = vpop.xlane.xlu0 %919  ;;  %v966_v61 = vmul.f32 0.125, %v922_v60  ;;  %v967_v58 = vmul.f32 0.125, %v924_v26 }
 0x330   : > { %v965_v54 = vmul.f32 0.125, %v920_v32  ;;  %v1173_v32 = vsel %vm1113_vm7, %v1172_v34, %v1171_v29 }
 0x331   : > { %1742 = vmatpush.bf16.msra.mxu1 %v2437_v48  ;;  %v1176_v9 = vperm.slane %v966_v61, %v3615_v63  ;;  %v1178_v17 = vperm.slane %v967_v58, %v3626_v13 }
 0x332   : > { %v1174_v35 = vperm.slane %v965_v54, %v3612_v52 }
 0x334   : > { %1076 = vmax.xlane.f32.xlu0 %v1013_v7  ;;  %v1175_v60 = vsel %vm1117_vm8, %v1174_v35, %v1173_v32  ;;  %v2402_v7 = vld [vmem:[#allocation3 + $0x38] sm:$0xf0]  ;;  %v2675_v35 = vld [vmem:[#allocation3 + $0x24] sm:$0xf] }
 0x335   : > { %1743 = vmatpush.bf16.msra.mxu1 %v2429_v23  ;;  %v1177_v54 = vsel %vm1121_vm9, %v1176_v9, %v1175_v60  ;;  %v2405_v29 = vor.u32 %v2677_v43, %v2402_v7  ;;  %v2673_v60 = vld [vmem:[#allocation3 + $0x14] sm:$0xf] }
 0x336   : > { %v928_v20 = vpop.xlane.xlu1 %927  ;;  %v930_v1 = vpop.xlane.xlu2 %929  ;;  %v1179_v26 = vsel %vm1125_vm10, %v1178_v17, %v1177_v54 }
 0x337   : > { %v926_v48 = vpop.xlane.xlu0 %925  ;;  %v969_v15 = vmul.f32 0.125, %v928_v20  ;;  %v970_v51 = vmul.f32 0.125, %v930_v1 }
 0x338   : > { %v968_v22 = vmul.f32 0.125, %v926_v48 }
 0x339   : > { %1744 = vmatpush.bf16.msra.mxu1 %v2421_v21  ;;  %v1182_v34 = vperm.slane %v969_v15, %v3639_v16  ;;  %v2394_v21 = vld [vmem:[#allocation3 + $0x28] sm:$0xf0]  ;;  %v1184_v15 = vperm.slane %v970_v51, %v3647_v14 }
 0x33a   : > { %v1180_v23 = vperm.slane %v968_v22, %v3636_v56  ;;  %v2397_v48 = vor.u32 %v2675_v35, %v2394_v21  ;;  %v2386_v22 = vld [vmem:[#allocation3 + $0x18] sm:$0xf0] }
 0x33c   : > { %v1181_v20 = vsel %vm1129_vm11, %v1180_v23, %v1179_v26  ;;  %v2389_v23 = vor.u32 %v2673_v60, %v2386_v22  ;;  %v2378_v26 = vld [vmem:[#allocation3 + $0x8] sm:$0xf0] }
 0x33d   : > { %1745 = vmatpush.bf16.msra.mxu1 %v2413_v5  ;;  %v1183_v58 = vsel %vm1133_vm12, %v1182_v34, %v1181_v20 }
 0x33e   : > { %v934_v25 = vpop.xlane.xlu1 %933  ;;  %v936_v61 = vpop.xlane.xlu2 %935  ;;  %v1185_v17 = vsel %vm1137_vm13, %v1184_v15, %v1183_v58 }
 0x33f   : > { %v932_v45 = vpop.xlane.xlu0 %931  ;;  %v972_v9 = vmul.f32 0.125, %v934_v25  ;;  %v973_v43 = vmul.f32 0.125, %v936_v61 }
 0x340   : > { %v971_v32 = vmul.f32 0.125, %v932_v45 }
 0x341   : > { %1746 = vmatpush.bf16.msra.mxu1 %v2405_v29  ;;  %v1188_v54 = vperm.slane %v972_v9, %v3661_v40  ;;  %v2671_v29 = vld [vmem:[#allocation3 + $0x4] sm:$0xf]  ;;  %v1190_v45 = vperm.slane %v973_v43, %v3668_v18 }
 0x342   : > { %v1186_v5 = vperm.slane %v971_v32, %v3664_v4  ;;  %v2381_v51 = vor.u32 %v2671_v29, %v2378_v26 }
 0x344   : > { %v1187_v25 = vsel %vm1141_vm14, %v1186_v5, %v1185_v17 }
 0x345   : > { %1747 = vmatpush.bf16.msra.mxu1 %v2397_v48  ;;  %v1189_v20 = vsel %vm1145_vm15, %v1188_v54, %v1187_v25 }
 0x346   : > { %v940_v1 = vpop.xlane.xlu1 %939  ;;  %v942_v7 = vpop.xlane.xlu2 %941  ;;  %v1191_v61 = vsel %vm1149_vm0, %v1190_v45, %v1189_v20  ;;  %v2560_v20 = vld [vmem:[#allocation3 + $0x170] sm:$0xf]  ;;  %v2552_v45 = vld [vmem:[#allocation3 + $0x160] sm:$0xf] }
 0x347   : > { %v938_v34 = vpop.xlane.xlu0 %937  ;;  %v975_v35 = vmul.f32 0.125, %v940_v1  ;;  %v976_v48 = vmul.f32 0.125, %v942_v7 }
 0x348   : > { %v974_v21 = vmul.f32 0.125, %v938_v34 }
 0x349   : > { %1748 = vmatpush.bf16.msra.mxu1 %v2389_v23  ;;  %v1194_v9 = vperm.slane %v975_v35, %v3689_v10  ;;  %v1196_v1 = vperm.slane %v976_v48, %v3692_v11 }
 0x34a   : > { %v1192_v32 = vperm.slane %v974_v21, %v3683_v2 }
 0x34c   : > { %v1193_v58 = vsel %vm1153_vm1, %v1192_v32, %v1191_v61 }
 0x34d   : > { %1749 = vmatpush.bf16.msra.mxu1 %v2381_v51  ;;  %v1195_v54 = vsel %vm1157_vm2, %v1194_v9, %v1193_v58  ;;  %v2718_v51 = vld [vmem:[#allocation3 + $0x174] sm:$0xf0]  ;;  %v2716_v9 = vld [vmem:[#allocation3 + $0x164] sm:$0xf0] }
 0x34e   : > { %v946_v5 = vpop.xlane.xlu1 %945  ;;  %v3759_v22 = vpop.xlane.xlu2 %1014  ;;  %v1197_v25 = vsel %vm1161_vm3, %v1196_v1, %v1195_v54  ;;  %v2561_v32 = vor.u32 %v2718_v51, %v2560_v20  ;;  %v2553_v58 = vor.u32 %v2716_v9, %v2552_v45  ;;  %v2624_v54 = vld [vmem:[#allocation3 + $0x1f0] sm:$0xf]  ;;  %v2734_v1 = vld [vmem:[#allocation3 + $0x1f4] sm:$0xf0]  ;;  %v2732_v20 = vld [vmem:[#allocation3 + $0x1e4] sm:$0xf0] }
 0x34f   : > { %v978_v60 = vmul.f32 0.125, %v946_v5  ;;  %v944_v15 = vpop.xlane.xlu0 %943 }
 0x350   : > { %v977_v17 = vmul.f32 0.125, %v944_v15  ;;  %1716 = vmatpush.bf16.msra.mxu2 %v2561_v32  ;;  %v2714_v15 = vld [vmem:[#allocation3 + $0x154] sm:$0xf0] }
 0x351   : > { %v1200_v23 = vperm.slane %v978_v60, %v3713_v31  ;;  %v2544_v60 = vld [vmem:[#allocation3 + $0x150] sm:$0xf] }
 0x352   : > { %v1198_v43 = vperm.slane %v977_v17, %v3704_v36  ;;  %v2545_v17 = vor.u32 %v2714_v15, %v2544_v60  ;;  %v2710_v60 = vld [vmem:[#allocation3 + $0x134] sm:$0xf0]  ;;  %v2608_v15 = vld [vmem:[#allocation3 + $0x1d0] sm:$0xf] }
 0x353   : > { %v2609_v24 = vor.u32 %v2730_v33, %v2608_v15  ;;  %v2726_v15 = vld [vmem:[#allocation3 + $0x1b4] sm:$0xf0] }
 0x354   : > { %v1199_v7 = vsel %vm1165_vm4, %v1198_v43, %v1197_v25  ;;  %1717 = vmatpush.bf16.msra.mxu2 %v2553_v58  ;;  %v2712_v43 = vld [vmem:[#allocation3 + $0x144] sm:$0xf0]  ;;  %v2528_v58 = vld [vmem:[#allocation3 + $0x130] sm:$0xf] }
 0x355   : > { %v1201_v26 = vsel %vm1169_vm5, %v1200_v23, %v1199_v7  ;;  %v2536_v23 = vld [vmem:[#allocation3 + $0x140] sm:$0xf]  ;;  %v2625_v7 = vor.u32 %v2734_v1, %v2624_v54  ;;  %v2529_v37 = vor.u32 %v2710_v60, %v2528_v58  ;;  %v2708_v1 = vld [vmem:[#allocation3 + $0x124] sm:$0xf0]  ;;  %v2706_v58 = vld [vmem:[#allocation3 + $0x114] sm:$0xf0] }
 0x356   : > { %v3767_v29 = vpop.xlane.xlu1 %1018  ;;  %v3770_v34 = vpop.xlane.xlu2 %1020  ;;  %v3772_v35 = vpack.c.bf16 %v1201_v26, %v1201_v26  ;;  %v2616_v26 = vld [vmem:[#allocation3 + $0x1e0] sm:$0xf]  ;;  %v2537_v32 = vor.u32 %v2712_v43, %v2536_v23  ;;  %v2728_v23 = vld [vmem:[#allocation3 + $0x1c4] sm:$0xf0]  ;;  %v2733_v43 = vld [vmem:[#allocation3 + $0x1f4] sm:$0xf] }
 0x357   : > { %v3774_v21 = vpop.xlane.xlu0 %1016  ;;  %1729 = vmatpush.bf16.msra.mxu3 %v2625_v7  ;;  %v2617_v9 = vor.u32 %v2732_v20, %v2616_v26  ;;  %v2520_v54 = vld [vmem:[#allocation3 + $0x120] sm:$0xf]  ;;  %v2592_v60 = vld [vmem:[#allocation3 + $0x1b0] sm:$0xf] }
 0x358   : > { %1711 = vmatmul.bf16.vlgmr.msrb.gmra.mxu1 %v3772_v35  ;;  %1718 = vmatpush.bf16.msra.mxu2 %v2545_v17  ;;  %v2600_v17 = vld [vmem:[#allocation3 + $0x1c0] sm:$0xf]  ;;  %v2521_v7 = vor.u32 %v2708_v1, %v2520_v54  ;;  %v2621_v54 = vor.u32 %v2731_v59, %v2618_v8  ;;  %v2576_v59 = vld [vmem:[#allocation3 + $0x190] sm:$0xf]  ;;  %v2722_v8 = vld [vmem:[#allocation3 + $0x194] sm:$0xf0] }
 0x359   : > { %v2601_v20 = vor.u32 %v2728_v23, %v2600_v17  ;;  %v2504_v1 = vld [vmem:[#allocation3 + $0x100] sm:$0xf]  ;;  %v2724_v23 = vld [vmem:[#allocation3 + $0x1a4] sm:$0xf0] }
 0x35a   : > { %v2505_v17 = vor.u32 %v2704_v3, %v2504_v1  ;;  %v2577_v3 = vor.u32 %v2722_v8, %v2576_v59  ;;  %v2727_v1 = vld [vmem:[#allocation3 + $0x1c4] sm:$0xf]  ;;  %v2725_v59 = vld [vmem:[#allocation3 + $0x1b4] sm:$0xf]  ;;  %v2594_v8 = vld [vmem:[#allocation3 + $0x1b8] sm:$0xf0] }
 0x35b   : > { %1730 = vmatpush.bf16.msra.mxu3 %v2617_v9  ;;  %v2512_v9 = vld [vmem:[#allocation3 + $0x110] sm:$0xf] }
 0x35c   : > { %1719 = vmatpush.bf16.msra.mxu2 %v2537_v32  ;;  %v2513_v33 = vor.u32 %v2706_v58, %v2512_v9  ;;  %v2729_v9 = vld [vmem:[#allocation3 + $0x1d4] sm:$0xf]  ;;  %v2610_v58 = vld [vmem:[#allocation3 + $0x1d8] sm:$0xf0] }
 0x35e   : > { %v3777_v61 = vpop.xlane.xlu1 %1048  ;;  %v3779_v48 = vpop.xlane.xlu2 %1022 }
 0x35f   : > { %v3781_v5 = vpop.xlane.xlu0 %1046  ;;  %1731 = vmatpush.bf16.msra.mxu3 %v2609_v24 }
 0x360   : > { %1720 = vmatpush.bf16.msra.mxu2 %v2529_v37  ;;  %v2593_v37 = vor.u32 %v2726_v15, %v2592_v60  ;;  %v2613_v60 = vor.u32 %v2729_v9, %v2610_v58  ;;  %v2699_v15 = vld [vmem:[#allocation3 + $0xe4] sm:$0xf] }
 0x363   : > { %1732 = vmatpush.bf16.msra.mxu3 %v2601_v20  ;;  %v2585_v20 = vor.u32 %v2724_v23, %v2584_v12  ;;  %v2568_v12 = vld [vmem:[#allocation3 + $0x180] sm:$0xf]  ;;  %v2720_v23 = vld [vmem:[#allocation3 + $0x184] sm:$0xf0] }
 0x364   : > { %1721 = vmatpush.bf16.msra.mxu2 %v2521_v7  ;;  %v2498_v7 = vld [vmem:[#allocation3 + $0xf8] sm:$0xf0]  ;;  %v2569_v58 = vor.u32 %v2720_v23, %v2568_v12  ;;  %v2693_v23 = vld [vmem:[#allocation3 + $0xb4] sm:$0xf] }
 0x366   : > { %v3783_v25 = vpop.xlane.xlu1 %1024  ;;  %v3785_v51 = vpop.xlane.xlu2 %1052 }
 0x367   : > { %v3787_v45 = vpop.xlane.xlu0 %1050  ;;  %1733 = vmatpush.bf16.msra.mxu3 %v2593_v37 }
 0x368   : > { %1750 = vmatmul.bf16.vlgmr.msra.gmra.mxu1 %v3729_v62  ;;  %v2626_v62 = vld [vmem:[#allocation3 + $0x1f8] sm:$0xf0]  ;;  %1722 = vmatpush.bf16.msra.mxu2 %v2513_v33  ;;  %v2490_v33 = vld [vmem:[#allocation3 + $0xe8] sm:$0xf0] }
 0x369   : > { %v2629_v32 = vor.u32 %v2733_v43, %v2626_v62  ;;  %v2701_v43 = vld [vmem:[#allocation3 + $0xf4] sm:$0xf]  ;;  %v2493_v37 = vor.u32 %v2699_v15, %v2490_v33  ;;  %v2597_v15 = vor.u32 %v2725_v59, %v2594_v8  ;;  %v2474_v33 = vld [vmem:[#allocation3 + $0xc8] sm:$0xf0] }
 0x36b   : > { %1781 = vmatpush.bf16.msrb.mxu1 %v2629_v32  ;;  %v2501_v32 = vor.u32 %v2701_v43, %v2498_v7  ;;  %1734 = vmatpush.bf16.msra.mxu3 %v2585_v20  ;;  %v2697_v43 = vld [vmem:[#allocation3 + $0xd4] sm:$0xf] }
 0x36c   : > { %1723 = vmatpush.bf16.msra.mxu2 %v2505_v17  ;;  %v2482_v17 = vld [vmem:[#allocation3 + $0xd8] sm:$0xf0]  ;;  %v2717_v20 = vld [vmem:[#allocation3 + $0x174] sm:$0xf] }
 0x36e   : > { %v3790_v19 = vpop.xlane.xlu1 %1054  ;;  %v3792_v6 = vpop.xlane.xlu2 %1028 }
 0x36f   : > { %v3794_v26 = vpop.xlane.xlu0 %1026  ;;  %1782 = vmatpush.bf16.msrb.mxu1 %v2621_v54  ;;  %v2605_v54 = vor.u32 %v2727_v1, %v2602_v0  ;;  %1735 = vmatpush.bf16.msra.mxu3 %v2577_v3  ;;  %v2695_v0 = vld [vmem:[#allocation3 + $0xc4] sm:$0xf]  ;;  %v1237_v3 = vperm.slane %v3774_v21, %v3609_v50  ;;  %v1239_v21 = vperm.slane %v3767_v29, %v3612_v52 }
 0x370   : > { %1755 = vmatpush.bf16.msrb.mxu2 %v2501_v32  ;;  %v2562_v32 = vld [vmem:[#allocation3 + $0x178] sm:$0xf0]  ;;  %v2715_v1 = vld [vmem:[#allocation3 + $0x164] sm:$0xf]  ;;  %v2477_v44 = vor.u32 %v2695_v0, %v2474_v33  ;;  %v2458_v0 = vld [vmem:[#allocation3 + $0xa8] sm:$0xf0] }
 0x371   : > { %v2565_v39 = vor.u32 %v2717_v20, %v2562_v32  ;;  %v2557_v12 = vor.u32 %v2715_v1, %v2554_v57  ;;  %v2546_v32 = vld [vmem:[#allocation3 + $0x158] sm:$0xf0]  ;;  %v2711_v33 = vld [vmem:[#allocation3 + $0x144] sm:$0xf] }
 0x372   : > { %v2719_v29 = vld [vmem:[#allocation3 + $0x184] sm:$0xf] }
 0x373   : > { %1783 = vmatpush.bf16.msrb.mxu1 %v2613_v60  ;;  %v2485_v60 = vor.u32 %v2697_v43, %v2482_v17  ;;  %1736 = vmatpush.bf16.msra.mxu3 %v2569_v58  ;;  %v2466_v43 = vld [vmem:[#allocation3 + $0xb8] sm:$0xf0]  ;;  %v2713_v17 = vld [vmem:[#allocation3 + $0x154] sm:$0xf] }
 0x374   : > { %1756 = vmatpush.bf16.msrb.mxu2 %v2493_v37  ;;  %v2721_v58 = vld [vmem:[#allocation3 + $0x194] sm:$0xf]  ;;  %v2469_v8 = vor.u32 %v2693_v23, %v2466_v43  ;;  %v2538_v23 = vld [vmem:[#allocation3 + $0x148] sm:$0xf0] }
 0x376   : > { %v3796_v53 = vpop.xlane.xlu1 %1030  ;;  %v3798_v24 = vpop.xlane.xlu2 %1058 }
 0x377   : > { %v3800_v62 = vpop.xlane.xlu0 %1056  ;;  %1784 = vmatpush.bf16.msrb.mxu1 %v2605_v54  ;;  %1768 = vmatpush.bf16.msrb.mxu3 %v2565_v39  ;;  %v2589_v54 = vor.u32 %v2723_v49, %v2586_v46  ;;  %v2578_v39 = vld [vmem:[#allocation3 + $0x198] sm:$0xf0]  ;;  %v2549_v46 = vor.u32 %v2713_v17, %v2546_v32  ;;  %v2541_v17 = vor.u32 %v2711_v33, %v2538_v23 }
 0x378   : > { %1757 = vmatpush.bf16.msrb.mxu2 %v2485_v60  ;;  %v1236_v60 = vperm.slane %v3759_v22, %v3546_v47  ;;  %v2581_v49 = vor.u32 %v2721_v58, %v2578_v39  ;;  %v1268_v22 = vperm.slane %v3777_v61, %v3609_v50  ;;  %v2689_v58 = vld [vmem:[#allocation3 + $0x94] sm:$0xf]  ;;  %v2450_v39 = vld [vmem:[#allocation3 + $0x98] sm:$0xf0]  ;;  %v1241_v50 = vperm.slane %v3770_v34, %v3615_v63 }
 0x379   : > { %v1245_v61 = vperm.slane %v3783_v25, %v3636_v56 }
 0x37a   : > { %v1238_v57 = vsel %vm1113_vm7, %v1237_v3, %v1236_v60  ;;  %v1243_v3 = vperm.slane %v3779_v48, %v3626_v13  ;;  %v2709_v60 = vld [vmem:[#allocation3 + $0x134] sm:$0xf]  ;;  %v1247_v48 = vperm.slane %v3794_v26, %v3639_v16  ;;  %v1274_v26 = vperm.slane %v3790_v19, %v3626_v13  ;;  %v2522_v13 = vld [vmem:[#allocation3 + $0x128] sm:$0xf0] }
 0x37b   : > { %1785 = vmatpush.bf16.msrb.mxu1 %v2597_v15  ;;  %1769 = vmatpush.bf16.msrb.mxu3 %v2557_v12  ;;  %v2691_v15 = vld [vmem:[#allocation3 + $0xa4] sm:$0xf]  ;;  %v1240_v1 = vsel %vm1117_vm8, %v1239_v21, %v1238_v57  ;;  %v2570_v12 = vld [vmem:[#allocation3 + $0x188] sm:$0xf0] }
 0x37c   : > { %1758 = vmatpush.bf16.msrb.mxu2 %v2477_v44  ;;  %v2461_v44 = vor.u32 %v2691_v15, %v2458_v0  ;;  %v2573_v32 = vor.u32 %v2719_v29, %v2570_v12  ;;  %v1249_v0 = vperm.slane %v3792_v6, %v3647_v14 }
 0x37e   : > { %v3802_v55 = vpop.xlane.xlu1 %1060  ;;  %v3804_v7 = vpop.xlane.xlu2 %1034 }
 0x37f   : > { %v3806_v9 = vpop.xlane.xlu0 %1032  ;;  %1786 = vmatpush.bf16.msrb.mxu1 %v2589_v54  ;;  %1770 = vmatpush.bf16.msrb.mxu3 %v2549_v46  ;;  %v1267_v54 = vperm.slane %v3781_v5, %v3546_v47  ;;  %v2530_v5 = vld [vmem:[#allocation3 + $0x138] sm:$0xf0]  ;;  %v2453_v46 = vor.u32 %v2689_v58, %v2450_v39  ;;  %v1255_v58 = vperm.slane %v3804_v7, %v3668_v18 }
 0x380   : > { %1759 = vmatpush.bf16.msrb.mxu2 %v2469_v8  ;;  %v1270_v8 = vperm.slane %v3787_v45, %v3612_v52  ;;  %v2533_v34 = vor.u32 %v2709_v60, %v2530_v5  ;;  %v1272_v52 = vperm.slane %v3785_v51, %v3615_v63  ;;  %v2687_v63 = vld [vmem:[#allocation3 + $0x84] sm:$0xf]  ;;  %v2442_v51 = vld [vmem:[#allocation3 + $0x88] sm:$0xf0]  ;;  %v1253_v23 = vperm.slane %v3806_v9, %v3661_v40 }
 0x381   : > { %v1269_v57 = vsel %vm1113_vm7, %v1268_v22, %v1267_v54  ;;  %v1276_v22 = vperm.slane %v3800_v62, %v3636_v56  ;;  %v2445_v19 = vor.u32 %v2687_v63, %v2442_v51  ;;  %v2705_v54 = vld [vmem:[#allocation3 + $0x114] sm:$0xf]  ;;  %v1278_v62 = vperm.slane %v3798_v24, %v3639_v16  ;;  %v2506_v5 = vld [vmem:[#allocation3 + $0x108] sm:$0xf0] }
 0x382   : > { %v1271_v15 = vsel %vm1117_vm8, %v1270_v8, %v1269_v57 }
 0x383   : > { %1787 = vmatpush.bf16.msrb.mxu1 %v2581_v49  ;;  %v1242_v49 = vsel %vm1121_vm9, %v1241_v50, %v1240_v1  ;;  %1771 = vmatpush.bf16.msrb.mxu3 %v2541_v17  ;;  %v1251_v1 = vperm.slane %v3796_v53, %v3664_v4  ;;  %v1273_v6 = vsel %vm1121_vm9, %v1272_v52, %v1271_v15 }
 0x384   : > { %1760 = vmatpush.bf16.msrb.mxu2 %v2461_v44  ;;  %v1244_v25 = vsel %vm1125_vm10, %v1243_v3, %v1242_v49  ;;  %v2707_v44 = vld [vmem:[#allocation3 + $0x124] sm:$0xf]  ;;  %v2514_v3 = vld [vmem:[#allocation3 + $0x118] sm:$0xf0]  ;;  %v1275_v53 = vsel %vm1125_vm10, %v1274_v26, %v1273_v6 }
 0x385   : > { %v1246_v45 = vsel %vm1129_vm11, %v1245_v61, %v1244_v25  ;;  %v2525_v12 = vor.u32 %v2707_v44, %v2522_v13  ;;  %v1277_v9 = vsel %vm1129_vm11, %v1276_v22, %v1275_v53  ;;  %v2517_v16 = vor.u32 %v2705_v54, %v2514_v3 }
 0x386   : > { %v3810_v37 = vpop.xlane.xlu1 %1036  ;;  %v3812_v20 = vpop.xlane.xlu2 %1064  ;;  %v1248_v33 = vsel %vm1133_vm12, %v1247_v48, %v1246_v45 }
 0x387   : > { %v3816_v59 = vpop.xlane.xlu0 %1062  ;;  %1788 = vmatpush.bf16.msrb.mxu1 %v2573_v32  ;;  %1772 = vmatpush.bf16.msrb.mxu3 %v2533_v34  ;;  %v1250_v56 = vsel %vm1137_vm13, %v1249_v0, %v1248_v33  ;;  %v1280_v32 = vperm.slane %v3802_v55, %v3647_v14  ;;  %v1257_v50 = vperm.slane %v3810_v37, %v3683_v2  ;;  %v2703_v14 = vld [vmem:[#allocation3 + $0x104] sm:$0xf] }
 0x388   : > { %1761 = vmatpush.bf16.msrb.mxu2 %v2453_v46  ;;  %v1252_v17 = vsel %vm1141_vm14, %v1251_v1, %v1250_v56  ;;  %v1282_v24 = vperm.slane %v3816_v59, %v3664_v4  ;;  %v1279_v55 = vsel %vm1133_vm12, %v1278_v62, %v1277_v9  ;;  %v1284_v37 = vperm.slane %v3812_v20, %v3661_v40 }
 0x389   : > { %v1254_v60 = vsel %vm1145_vm15, %v1253_v23, %v1252_v17  ;;  %v1281_v7 = vsel %vm1137_vm13, %v1280_v32, %v1279_v55  ;;  %v2509_v4 = vor.u32 %v2703_v14, %v2506_v5 }
 0x38a   : > { %v1256_v48 = vsel %vm1149_vm0, %v1255_v58, %v1254_v60  ;;  %v1283_v59 = vsel %vm1141_vm14, %v1282_v24, %v1281_v7  ;;  %v4154_v58 = vlaneseq }
 0x38b   : > { %1773 = vmatpush.bf16.msrb.mxu3 %v2525_v12  ;;  %v1258_v46 = vsel %vm1153_vm1, %v1257_v50, %v1256_v48  ;;  %v1285_v40 = vsel %vm1145_vm15, %v1284_v37, %v1283_v59 }
 0x38c   : > { %1762 = vmatpush.bf16.msrb.mxu2 %v2445_v19 }
 0x38e   : > { %v3828_v43 = vpop.xlane.xlu1 %1066  ;;  %v3836_v47 = vpop.xlane.xlu2 %1040 }
 0x38f   : > { %v1039_v21 = vpop.xlane.xlu0 %1038  ;;  %v1261_v49 = vperm.slane %v3836_v47, %v3692_v11  ;;  %1774 = vmatpush.bf16.msrb.mxu3 %v2517_v16 }
 0x390   : > { %v1259_v8 = vperm.slane %v1039_v21, %v3689_v10  ;;  %v1286_v21 = vperm.slane %v3828_v43, %v3668_v18 }
 0x392   : > { %v1260_v34 = vsel %vm1157_vm2, %v1259_v8, %v1258_v46  ;;  %v1287_v15 = vsel %vm1149_vm0, %v1286_v21, %v1285_v40 }
 0x393   : > { %v1262_v20 = vsel %vm1161_vm3, %v1261_v49, %v1260_v34  ;;  %1775 = vmatpush.bf16.msrb.mxu3 %v2509_v4 }
 0x396   : > { %v1043_v29 = vpop.xlane.xlu1 %1042  ;;  %v1071_v61 = vpop.xlane.xlu2 %1070 }
 0x397   : > { %v1069_v39 = vpop.xlane.xlu0 %1068  ;;  %v1263_v57 = vperm.slane %v1043_v29, %v3704_v36  ;;  %v1290_v18 = vperm.slane %v1071_v61, %v3689_v10 }
 0x398   : > { %v1288_v25 = vperm.slane %v1069_v39, %v3683_v2  ;;  %v3906_v39 = vshrl.u32 %v4154_v58, 7 }
 0x399   : > { %v1264_v26 = vsel %vm1165_vm4, %v1263_v57, %v1262_v20 }
 0x39a   : > { %v1289_v43 = vsel %vm1153_vm1, %v1288_v25, %v1287_v15  ;;  %2891 = vset.pattern.permute.xlu1 %v3906_v39  ;;  %v3910_v50 = vadd.s32 16, %v3906_v39  ;;  %v3913_v61 = vadd.s32 8, %v3906_v39 }
 0x39b   : > { %v1291_v22 = vsel %vm1157_vm2, %v1290_v18, %v1289_v43  ;;  %v3923_v18 = vadd.s32 72, %v3906_v39  ;;  %v1853_v43 = vadd.s32 24, %v3906_v39 }
 0x39c   : > { %2893 = vset.pattern.permute.xlu0 %v3910_v50  ;;  %2892 = vset.pattern.permute.xlu2 %v3913_v61 }
 0x39e   : > { %v1073_v52 = vpop.xlane.xlu1 %1072  ;;  %v1075_v33 = vpop.xlane.xlu2 %1074 }
 0x39f   : > { %v1045_v45 = vpop.xlane.xlu0 %1044  ;;  %v1292_v0 = vperm.slane %v1073_v52, %v3692_v11  ;;  %v1294_v63 = vperm.slane %v1075_v33, %v3704_v36  ;;  %v1369_v36 = vstv %s1368_s26 }
 0x3a0   : > { %v1265_v47 = vperm.slane %v1045_v45, %v3713_v31 }
 0x3a1   : > { %v1293_v51 = vsel %vm1161_vm3, %v1292_v0, %v1291_v22  ;;  %v3927_v0 = vadd.s32 32, %v3906_v39  ;;  %v3938_v22 = vadd.s32 40, %v3906_v39 }
 0x3a2   : > { %v1266_v2 = vsel %vm1169_vm5, %v1265_v47, %v1264_v26  ;;  %v1295_v10 = vsel %vm1165_vm4, %v1294_v63, %v1293_v51  ;;  %v3941_v51 = vadd.s32 48, %v3906_v39 }
 0x3a3   : > { %v1302_v1 = vpack.c.bf16 %v1266_v2, %v1266_v2 }
 0x3a5   : > { %1724 = vmatmul.bf16.vlgmr.msra.gmra.mxu2 %v1302_v1 }
 0x3a7   : > { %v1077_v44 = vpop.xlane.xlu0 %1076 }
 0x3a8   : > { %v1296_v23 = vperm.slane %v1077_v44, %v3713_v31 }
 0x3aa   : > { %v1297_v19 = vsel %vm1169_vm5, %v1296_v23, %v1295_v10 }
 0x3ab   : > { %v1303_v13 = vpack.c.bf16 %v1297_v19, %v1297_v19 }
 0x3ad   : > { %1737 = vmatmul.bf16.vlgmr.msra.gmra.mxu3 %v1303_v13  ;;  %1789 = vmatmul.bf16.vlgmr.msrb.gmra.mxu1 %v1303_v13  ;;  %v3950_v13 = vadd.s32 56, %v3906_v39 }
 0x3b2   : > { %v1699_v11 = vpop.f32.mrf.mxu3 }
 0x3b3   : > { %v1700_v29 = vadd.f32 %v1699_v11, %v1369_v36 }
 0x3b5   : > { %1763 = vmatmul.bf16.vlgmr.msrb.gmra.mxu2 %v3772_v35 }
 0x3ba   : > { %v1701_v6 = vpop.f32.mrf.mxu3 }
 0x3bb   : > { %v1883_v6 = vadd.s32 64, %v3906_v39 }
 0x3bd   : > { %1776 = vmatmul.bf16.vlgmr.msrb.gmra.mxu3 %v1302_v1  ;;  %v3935_v1 = vadd.s32 112, %v3906_v39 }
 0x3d5   : > { %v1712_v12 = vpop.f32.mrf.mxu1 }
 0x3d6   : > { %v1713_v54 = vadd.f32 %v1712_v12, %v1700_v29 }
 0x3dd   : > { %v1714_v3 = vpop.f32.mrf.mxu1 }
 0x3e5   : > { %v1751_v53 = vpop.f32.mrf.mxu1 }
 0x3e6   : > { %v1752_v48 = vadd.f32 %v1751_v53, %v1369_v36  ;;  %v1895_v53 = vadd.s32 80, %v3906_v39 }
 0x3ed   : > { %v1753_v31 = vpop.f32.mrf.mxu1 }
 0x3ee   : > { %v3961_v31 = vadd.s32 88, %v3906_v39 }
 0x428   : > { %v1725_v56 = vpop.f32.mrf.mxu2 }
 0x429   : > { %v1726_v17 = vadd.f32 %v1725_v56, %v1713_v54  ;;  %v1913_v56 = vadd.s32 104, %v3906_v39 }
 0x42a   : > { %v1790_v62 = vpop.f32.mrf.mxu1 }
 0x430   : > { %v1727_v9 = vpop.f32.mrf.mxu2  ;;  %v1738_v32 = vpop.f32.mrf.mxu3 }
 0x431   : > { %v1739_v60 = vadd.f32 %v1738_v32, %v1726_v17  ;;  %v3973_v17 = vadd.s32 120, %v3906_v39 }
 0x432   : > { %v1792_v35 = vpop.f32.mrf.mxu1 }
 0x433   : > { %v2630_v16 = vmul.f32 -1.442695, %v1739_v60 }
 0x435   : > { %2929 = vpow2.f32 %v2630_v16 }
 0x438   : > { %v1740_v24 = vpop.f32.mrf.mxu3  ;;  %v1764_v8 = vpop.f32.mrf.mxu2 }
 0x439   : > { %v1765_v49 = vadd.f32 %v1764_v8, %v1752_v48  ;;  %v4156_v48 = vld [vmem:[#allocation11_spill] sm:$0xff] }
 0x43b   : > { %v2930_v55 = vpop.eup %2929 }
 0x43c   : > { %v1800_v14 = vadd.f32 1.0, %v2930_v55 }
 0x43e   : > { %2931 = vrcp.f32 %v1800_v14  ;;  %v1813_v21 = vand.u32 2147483648, %v1800_v14  ;;  %v1811_v25 = vand.u32 2147483647, %v1800_v14  ;;  %vm1807_vm7 = vweird.f32 %v1800_v14 }
 0x440   : > { %v1766_v5 = vpop.f32.mrf.mxu2  ;;  %v1777_v7 = vpop.f32.mrf.mxu3  ;;  %v1814_v40 = vor.u32 1.1754944e-38, %v1813_v21  ;;  %vm1812_vm9 = vcmp.eq.f32.partialorder %v1811_v25, 8.507059e+37 }
 0x441   : > { %v1778_v59 = vadd.f32 %v1777_v7, %v1765_v49  ;;  %v4155_v5 = vld [vmem:[#allocation9_spill] sm:$0xff]  ;;  %v4157_v49 = vld [vmem:[#allocation14_spill] sm:$0xff] }
 0x443   : > { %v1791_v45 = vadd.f32 %v1790_v62, %v1778_v59  ;;  %v1907_v62 = vadd.s32 96, %v3906_v39  ;;  %v4158_v59 = vld [vmem:[#allocation10_spill] sm:$0xff] }
 0x444   : > { %v2932_v46 = vpop.eup %2931 }
 0x445   : > { %v1803_v37 = vmul.f32 %v2932_v46, %v1800_v14  ;;  %vm1808_vm6 = vweird.f32 %v2932_v46  ;;  %v2631_v26 = vmul.f32 -1.442695, %v1791_v45  ;;  %v4159_v45 = vld [vmem:[#allocation12_spill] sm:$0xff] }
 0x446   : > { %vm1809_vm8 = vmor %vm1807_vm7, %vm1808_vm6 }
 0x447   : > { %v1804_v4 = vsub.f32 1.0, %v1803_v37  ;;  %2933 = vpow2.f32 %v2631_v26 }
 0x448   : > { %v1779_v34 = vpop.f32.mrf.mxu3 }
 0x449   : > { %v1805_v57 = vmul.f32 %v2932_v46, %v1804_v4 }
 0x44b   : > { %v1806_v52 = vadd.f32 %v2932_v46, %v1805_v57 }
 0x44d   : > { %v1810_v20 = vsel %vm1809_vm8, %v2932_v46, %v1806_v52  ;;  %v2934_v2 = vpop.eup %2933 }
 0x44e   : > { %v1815_v47 = vsel %vm1812_vm9, %v1814_v40, %v1810_v20  ;;  %v1801_v33 = vadd.f32 1.0, %v2934_v2  ;;  %v4160_v20 = vld [vmem:[#allocation13_spill] sm:$0xff]  ;;  %v4162_v2 = vld [vmem:[#allocation20_spill] sm:$0xff] }
 0x44f   : > { %v3917_v15 = vperm.slane %v1815_v47, 0 }
 0x450   : > { %2935 = vrcp.f32 %v1801_v33  ;;  %v1828_v11 = vand.u32 2147483648, %v1801_v33  ;;  %vm1822_vm11 = vweird.f32 %v1801_v33  ;;  %v1826_v36 = vand.u32 2147483647, %v1801_v33 }
 0x451   : > { %1849 = vperm.xlu0 %2893, %v3917_v15   ;;  %1843 = vperm.xlu2 %2892, %v3917_v15  }
 0x452   : > { %1837 = vperm.xlu1 %2891, %v3917_v15   ;;  %v1829_v12 = vor.u32 1.1754944e-38, %v1828_v11  ;;  %vm1827_vm13 = vcmp.eq.f32.partialorder %v1826_v36, 8.507059e+37  ;;  %v4165_v11 = vld [vmem:[#allocation19_spill] sm:$0xff]  ;;  %v4166_v36 = vld [vmem:[#allocation18_spill] sm:$0xff] }
 0x456   : > { %v2936_v63 = vpop.eup %2935 }
 0x457   : > { %v1818_v44 = vmul.f32 %v2936_v63, %v1801_v33  ;;  %vm1823_vm10 = vweird.f32 %v2936_v63 }
 0x458   : > { %vm1824_vm12 = vmor %vm1822_vm11, %vm1823_vm10 }
 0x459   : > { %2900 = vset.pattern.permute.xlu0 %v3923_v18  ;;  %2894 = vset.pattern.permute.xlu2 %v1853_v43  ;;  %v1819_v23 = vsub.f32 1.0, %v1818_v44 }
 0x45a   : > { %2895 = vset.pattern.permute.xlu1 %v3927_v0 }
 0x45b   : > { %v1820_v10 = vmul.f32 %v2936_v63, %v1819_v23  ;;  %v4164_v23 = vld [vmem:[#allocation15_spill] sm:$0xff] }
 0x45d   : > { %v1821_v19 = vadd.f32 %v2936_v63, %v1820_v10 }
 0x45f   : > { %v1825_v29 = vsel %vm1824_vm12, %v2936_v63, %v1821_v19 }
 0x460   : > { %v1830_v54 = vsel %vm1827_vm13, %v1829_v12, %v1825_v29 }
 0x461   : > { %1891 = vperm.xlu0 %2900, %v3917_v15   ;;  %1855 = vperm.xlu2 %2894, %v3917_v15   ;;  %v3954_v3 = vperm.slane %v1830_v54, 0 }
 0x462   : > { %1861 = vperm.xlu1 %2895, %v3917_v15  }
 0x469   : > { %2905 = vset.pattern.permute.xlu0 %v3935_v1  ;;  %2896 = vset.pattern.permute.xlu2 %v3938_v22 }
 0x46a   : > { %2897 = vset.pattern.permute.xlu1 %v3941_v51 }
 0x471   : > { %1921 = vperm.xlu0 %2905, %v3917_v15   ;;  %1867 = vperm.xlu2 %2896, %v3917_v15  }
 0x472   : > { %1873 = vperm.xlu1 %2897, %v3917_v15  }
 0x479   : > { %2910 = vset.pattern.permute.xlu0 %v1853_v43  ;;  %2898 = vset.pattern.permute.xlu2 %v3950_v13  ;;  %v4161_v43 = vld [vmem:[#allocation16_spill] sm:$0xff] }
 0x47a   : > { %2899 = vset.pattern.permute.xlu1 %v1883_v6 }
 0x481   : > { %1952 = vperm.xlu0 %2910, %v3954_v3   ;;  %1879 = vperm.xlu2 %2898, %v3917_v15  }
 0x482   : > { %1885 = vperm.xlu1 %2899, %v3917_v15  }
 0x489   : > { %2915 = vset.pattern.permute.xlu0 %v1883_v6  ;;  %2901 = vset.pattern.permute.xlu2 %v1895_v53 }
 0x48a   : > { %2902 = vset.pattern.permute.xlu1 %v3961_v31 }
 0x491   : > { %1982 = vperm.xlu0 %2915, %v3954_v3   ;;  %1897 = vperm.xlu2 %2901, %v3917_v15  }
 0x492   : > { %1903 = vperm.xlu1 %2902, %v3917_v15  }
 0x499   : > { %2920 = vset.pattern.permute.xlu0 %v1913_v56  ;;  %2903 = vset.pattern.permute.xlu2 %v1907_v62 }
 0x49a   : > { %2904 = vset.pattern.permute.xlu1 %v1913_v56  ;;  %v4168_v56 = vld [vmem:[#allocation23_spill] sm:$0xff] }
 0x4a1   : > { %2012 = vperm.xlu0 %2920, %v3954_v3   ;;  %1909 = vperm.xlu2 %2903, %v3917_v15  }
 0x4a2   : > { %1915 = vperm.xlu1 %2904, %v3917_v15  }
 0x4a9   : > { %2906 = vset.pattern.permute.xlu2 %v3973_v17  ;;  %2923 = vset.pattern.permute.xlu0 %v3973_v17 }
 0x4aa   : > { %2907 = vset.pattern.permute.xlu1 %v3906_v39 }
 0x4ab   : > { %v1844_v9 = vpop.permute.xlu2 %1843 }
 0x4ac   : > { %v2027_v16 = vmul.f32 %v1844_v9, %v3421_v42 }
 0x4b1   : > { %1927 = vperm.xlu2 %2906, %v3917_v15  }
 0x4b2   : > { %1934 = vperm.xlu1 %2907, %v3954_v3  }
 0x4b9   : > { %2908 = vset.pattern.permute.xlu2 %v3913_v61 }
 0x4ba   : > { %2909 = vset.pattern.permute.xlu1 %v3910_v50 }
 0x4bb   : > { %v1856_v32 = vpop.permute.xlu2 %1855 }
 0x4bc   : > { %v2029_v39 = vmul.f32 %v1856_v32, %v3413_v30 }
 0x4c1   : > { %1940 = vperm.xlu2 %2908, %v3954_v3  }
 0x4c2   : > { %1946 = vperm.xlu1 %2909, %v3954_v3  }
 0x4c3   : > { %v1850_v58 = vpop.permute.xlu0 %1849 }
 0x4c4   : > { %v2028_v60 = vmul.f32 %v1850_v58, %v3402_v38  ;;  %v1838_v35 = vpop.permute.xlu1 %1837 }
 0x4c5   : > { %v2026_v61 = vmul.f32 %v1838_v35, %v3398_v27  ;;  %v4170_v35 = vld [vmem:[#allocation26_spill] sm:$0xff] }
 0x4c6   : > { %v2744_v24 = vpack.c.bf16 %v2029_v39, %v2028_v60  ;;  %v4169_v39 = vld [vmem:[#allocation22_spill] sm:$0xff] }
 0x4c7   : > { %v2739_v50 = vpack.c.bf16 %v2027_v16, %v2026_v61 }
 0x4c8   : > { %2816 = vst [vmem:[%s3991_s29 + $0x8] sm:$0xff] %v2744_v24  }
 0x4c9   : > { %2740 = vst [vmem:[%s3991_s29] sm:$0xff] %v2739_v50   ;;  %2911 = vset.pattern.permute.xlu2 %v3927_v0 }
 0x4ca   : > { %2912 = vset.pattern.permute.xlu1 %v3938_v22 }
 0x4cb   : > { %v1868_v38 = vpop.permute.xlu2 %1867 }
 0x4cc   : > { %v2031_v30 = vmul.f32 %v1868_v38, %v3417_v41  ;;  %v4171_v38 = vld [vmem:[#allocation29_spill] sm:$0xff] }
 0x4d1   : > { %1958 = vperm.xlu2 %2911, %v3954_v3  }
 0x4d2   : > { %1964 = vperm.xlu1 %2912, %v3954_v3  }
 0x4d4   : > { %v1862_v27 = vpop.permute.xlu1 %1861 }
 0x4d5   : > { %v2030_v42 = vmul.f32 %v1862_v27, %v3406_v28  ;;  %v1892_v28 = vpop.permute.xlu0 %1891 }
 0x4d6   : > { %v2035_v4 = vmul.f32 %v1892_v28, %v4157_v49 }
 0x4d7   : > { %v2749_v8 = vpack.c.bf16 %v2031_v30, %v2030_v42  ;;  %v4172_v30 = vld [vmem:[#allocation27_spill] sm:$0xff] }
 0x4d9   : > { %2817 = vst [vmem:[%s3991_s29 + $0x10] sm:$0xff] %v2749_v8   ;;  %2913 = vset.pattern.permute.xlu2 %v3941_v51  ;;  %v4163_v51 = vld [vmem:[#allocation17_spill] sm:$0xff] }
 0x4da   : > { %2914 = vset.pattern.permute.xlu1 %v3950_v13 }
 0x4db   : > { %v1880_v55 = vpop.permute.xlu2 %1879 }
 0x4dc   : > { %v2033_v7 = vmul.f32 %v1880_v55, %v4155_v5 }
 0x4e1   : > { %1970 = vperm.xlu2 %2913, %v3954_v3  }
 0x4e2   : > { %1976 = vperm.xlu1 %2914, %v3954_v3  }
 0x4e3   : > { %v1922_v26 = vpop.permute.xlu0 %1921 }
 0x4e4   : > { %v1874_v14 = vpop.permute.xlu1 %1873  ;;  %v2040_v0 = vmul.f32 %v1922_v26, %v4161_v43  ;;  %v4179_v26 = vld [vmem:[#allocation34_spill] sm:$0xff]  ;;  %v4180_v43 = vld [vmem:[#allocation33_spill] sm:$0xff] }
 0x4e5   : > { %v2032_v46 = vmul.f32 %v1874_v14, %v4156_v48  ;;  %v4173_v14 = vld [vmem:[#allocation24_spill] sm:$0xff] }
 0x4e7   : > { %v2754_v41 = vpack.c.bf16 %v2033_v7, %v2032_v46  ;;  %v4174_v7 = vld [vmem:[#allocation25_spill] sm:$0xff] }
 0x4e9   : > { %2818 = vst [vmem:[%s3991_s29 + $0x18] sm:$0xff] %v2754_v41   ;;  %2916 = vset.pattern.permute.xlu2 %v3923_v18 }
 0x4ea   : > { %2917 = vset.pattern.permute.xlu1 %v1895_v53 }
 0x4eb   : > { %v1898_v57 = vpop.permute.xlu2 %1897 }
 0x4ec   : > { %v2036_v40 = vmul.f32 %v1898_v57, %v4159_v45  ;;  %v4178_v45 = vld [vmem:[#allocation30_spill] sm:$0xff] }
 0x4f1   : > { %1988 = vperm.xlu2 %2916, %v3954_v3  }
 0x4f2   : > { %1994 = vperm.xlu1 %2917, %v3954_v3  }
 0x4f3   : > { %v1953_v54 = vpop.permute.xlu0 %1952 }
 0x4f4   : > { %v1886_v37 = vpop.permute.xlu1 %1885 }
 0x4f5   : > { %v2034_v21 = vmul.f32 %v1886_v37, %v4158_v59  ;;  %v4175_v37 = vld [vmem:[#allocation32_spill] sm:$0xff] }
 0x4f7   : > { %v2759_v34 = vpack.c.bf16 %v2035_v4, %v2034_v21  ;;  %v4176_v4 = vld [vmem:[#allocation28_spill] sm:$0xff] }
 0x4f9   : > { %2819 = vst [vmem:[%s3991_s29 + $0x20] sm:$0xff] %v2759_v34   ;;  %2918 = vset.pattern.permute.xlu2 %v3961_v31 }
 0x4fa   : > { %2919 = vset.pattern.permute.xlu1 %v1907_v62 }
 0x4fb   : > { %v1910_v25 = vpop.permute.xlu2 %1909 }
 0x4fc   : > { %v2038_v44 = vmul.f32 %v1910_v25, %v4163_v51  ;;  %v4177_v25 = vld [vmem:[#allocation31_spill] sm:$0xff] }
 0x501   : > { %2000 = vperm.xlu2 %2918, %v3954_v3  }
 0x502   : > { %2006 = vperm.xlu1 %2919, %v3954_v3  }
 0x503   : > { %v1983_v24 = vpop.permute.xlu0 %1982 }
 0x504   : > { %v1904_v52 = vpop.permute.xlu1 %1903  ;;  %v2050_v27 = vmul.f32 %v1983_v24, %v4171_v38 }
 0x505   : > { %v2037_v47 = vmul.f32 %v1904_v52, %v4160_v20 }
 0x507   : > { %v2764_v15 = vpack.c.bf16 %v2037_v47, %v2036_v40 }
 0x509   : > { %2820 = vst [vmem:[%s3991_s29 + $0x28] sm:$0xff] %v2764_v15   ;;  %2921 = vset.pattern.permute.xlu2 %v3935_v1 }
 0x50a   : > { %2922 = vset.pattern.permute.xlu1 %v3973_v17 }
 0x50b   : > { %v1928_v18 = vpop.permute.xlu2 %1927 }
 0x50c   : > { %v2041_v33 = vmul.f32 %v1928_v18, %v4162_v2 }
 0x50e   : > { %v2774_v22 = vpack.c.bf16 %v2041_v33, %v2040_v0 }
 0x510   : > { %2822 = vst [vmem:[%s3991_s29 + $0x38] sm:$0xff] %v2774_v22  }
 0x511   : > { %2018 = vperm.xlu2 %2921, %v3954_v3  }
 0x512   : > { %2024 = vperm.xlu1 %2922, %v3954_v3   ;;  %v4167_v3 = vld [vmem:[#allocation21_spill] sm:$0xff] }
 0x513   : > { %v2045_v31 = vmul.f32 %v1953_v54, %v4167_v3  ;;  %v2013_v34 = vpop.permute.xlu0 %2012 }
 0x514   : > { %v1916_v63 = vpop.permute.xlu1 %1915  ;;  %v2055_v52 = vmul.f32 %v2013_v34, %v4177_v25 }
 0x515   : > { %v2039_v1 = vmul.f32 %v1916_v63, %v4164_v23 }
 0x517   : > { %v2769_v10 = vpack.c.bf16 %v2039_v1, %v2038_v44 }
 0x519   : > { %2821 = vst [vmem:[%s3991_s29 + $0x30] sm:$0xff] %v2769_v10  }
 0x51b   : > { %v1941_v19 = vpop.permute.xlu2 %1940 }
 0x51c   : > { %v2043_v6 = vmul.f32 %v1941_v19, %v4165_v11 }
 0x524   : > { %v1935_v13 = vpop.permute.xlu1 %1934 }
 0x525   : > { %v2042_v29 = vmul.f32 %v1935_v13, %v4166_v36 }
 0x527   : > { %v2779_v12 = vpack.c.bf16 %v2043_v6, %v2042_v29 }
 0x529   : > { %2823 = vst [vmem:[%s3991_s29 + $0x40] sm:$0xff] %v2779_v12  }
 0x52b   : > { %v1959_v9 = vpop.permute.xlu2 %1958 }
 0x52c   : > { %v2046_v60 = vmul.f32 %v1959_v9, %v4169_v39 }
 0x534   : > { %v1947_v53 = vpop.permute.xlu1 %1946 }
 0x535   : > { %v2044_v62 = vmul.f32 %v1947_v53, %v4168_v56 }
 0x537   : > { %v2784_v17 = vpack.c.bf16 %v2045_v31, %v2044_v62 }
 0x539   : > { %2824 = vst [vmem:[%s3991_s29 + $0x48] sm:$0xff] %v2784_v17  }
 0x53b   : > { %v1971_v32 = vpop.permute.xlu2 %1970 }
 0x53c   : > { %v2048_v5 = vmul.f32 %v1971_v32, %v4173_v14 }
 0x544   : > { %v1965_v58 = vpop.permute.xlu1 %1964 }
 0x545   : > { %v2047_v16 = vmul.f32 %v1965_v58, %v4170_v35 }
 0x547   : > { %v2789_v61 = vpack.c.bf16 %v2047_v16, %v2046_v60 }
 0x549   : > { %2825 = vst [vmem:[%s3991_s29 + $0x50] sm:$0xff] %v2789_v61  }
 0x54b   : > { %v1989_v50 = vpop.permute.xlu2 %1988 }
 0x54c   : > { %v2051_v42 = vmul.f32 %v1989_v50, %v4172_v30 }
 0x54e   : > { %v2799_v8 = vpack.c.bf16 %v2051_v42, %v2050_v27 }
 0x550   : > { %2827 = vst [vmem:[%s3991_s29 + $0x60] sm:$0xff] %v2799_v8  }
 0x554   : > { %v1977_v55 = vpop.permute.xlu1 %1976 }
 0x555   : > { %v2049_v48 = vmul.f32 %v1977_v55, %v4174_v7 }
 0x557   : > { %v2794_v46 = vpack.c.bf16 %v2049_v48, %v2048_v5 }
 0x559   : > { %2826 = vst [vmem:[%s3991_s29 + $0x58] sm:$0xff] %v2794_v46  }
 0x55b   : > { %v2001_v41 = vpop.permute.xlu2 %2000 }
 0x55c   : > { %v2053_v49 = vmul.f32 %v2001_v41, %v4175_v37 }
 0x564   : > { %v1995_v28 = vpop.permute.xlu1 %1994 }
 0x565   : > { %v2052_v59 = vmul.f32 %v1995_v28, %v4176_v4 }
 0x567   : > { %v2804_v21 = vpack.c.bf16 %v2053_v49, %v2052_v59 }
 0x569   : > { %2828 = vst [vmem:[%s3991_s29 + $0x68] sm:$0xff] %v2804_v21  }
 0x56b   : > { %v2019_v47 = vpop.permute.xlu2 %2018 }
 0x56c   : > { %v2056_v18 = vmul.f32 %v2019_v47, %v4179_v26 }
 0x574   : > { %v2007_v57 = vpop.permute.xlu1 %2006 }
 0x575   : > { %v2054_v40 = vmul.f32 %v2007_v57, %v4178_v45 }
 0x577   : > { %v2809_v20 = vpack.c.bf16 %v2055_v52, %v2054_v40 }
 0x579   : > { %2829 = vst [vmem:[%s3991_s29 + $0x70] sm:$0xff] %v2809_v20  }
 0x584   : > { %v2025_v15 = vpop.permute.xlu1 %2024 }
 0x585   : > { %v2057_v0 = vmul.f32 %v2025_v15, %v4180_v43 }
 0x587   : > { %v2814_v2 = vpack.c.bf16 %v2057_v0, %v2056_v18 }
 0x589   : > { %2830 = vst [vmem:[%s3991_s29 + $0x78] sm:$0xff] %v2814_v2  }
 0x58a   : > { %2994 = shalt.err (!%p2991_p8)
}
 0x58b   : > { %s3038_s27 = smov 64   ;;  %s3039_s29 = smov 4  }
 0x58c   : > { %2841 = dma.vmem_to_hbm [thread:$0]  (%p3131_p5), %s2136_s18, 2048, %s2138_s22, %s2123_s23, %s3038_s27, %s3038_s27, %s3039_s29  }
 0x58d PF: > { %p2853_p9 = scmp.ge.s32.totalorder %s3033_s14, 2  ;;  %s2152_s15 = sand.u32 1, %s3021_s11  }
 0x58e   : > { %s2153_s17 = scalar_lea.sflag [#allocation5], %s2152_s15 }
 0x58f   : > { %p2848_p10 = pnand %p2853_p9, %p3135_p6 }
 0x591   : > { %p2849_p11 = pneg %p2848_p10 }
 0x593   : > { %3016 = dma.done.wait (%p2849_p11), %s2153_s17, 2048  }
 0x594   : > { %3018 = vsyncadd (%p2849_p11), %s2153_s17, 4294965248  ;;  %p21_p12 = scmp.ge.s32.totalorder %s3118_s16, 4   ;;  %s4181_s11 = smov %s3025_s12 }
 0x595   : > { %s4182_s12 = smov %s3029_s13  ;;  %s4183_s13 = smov %s3129_s19 }
 0x596   : > { %s4184_s14 = smov %s3118_s16  ;;  %23 = sbr.rel (!%p21_p12) target bundleno = 6 (0x6), region = 96 }
 0x59b   :  { %2159 = vsyncpa [#allocation4], 1 }
 0x59c   :  { %2161 = vsyncpa [#allocation4 + $0x1], 1 }
 0x59d   :  { %2162 = vsyncpa [#allocation5], 1 }
 0x59e   :  { %2164 = vsyncpa [#allocation5 + $0x1], 1 }

// kernel: tpu_custom_call.1
= control target key start
LH: loop header
LB: loop body
LE: loop exit
PB: predicated region body
PF: predicated region fallthrough
CT: control target
= control target key end

     0   :  { %s4089_s0 = inlined_call_operand.vmem [shape: bf16[512,36], index: 0, kind: input, shape index: {}]   ;;  %s4090_s1 = inlined_call_operand.vmem [shape: bf16[36,128], index: 1, kind: input, shape index: {}]   ;;  %s4091_s2 = inlined_call_operand.vmem [shape: f32[1,128], index: 2, kind: input, shape index: {}]   ;;  %s4092_s3 = inlined_call_operand.vmem [shape: bf16[128,128], index: 3, kind: input, shape index: {}]   ;;  %s4093_s4 = inlined_call_operand.vmem [shape: f32[1,128], index: 4, kind: input, shape index: {}]   ;;  %s4094_s5 = inlined_call_operand.vmem [shape: bf16[128,128], index: 5, kind: input, shape index: {}]   ;;  %s4095_s6 = inlined_call_operand.vmem [shape: f32[1,128], index: 6, kind: input, shape index: {}]   ;;  %s4096_s7 = inlined_call_operand.hbm [shape: bf16[512,256], index: 7, kind: input, shape index: {}]   ;;  %s4097_s8 = inlined_call_operand.<no memory space> [shape: f32[1], index: 8, kind: input, shape index: {}]   ;;  %s4098_s9 = inlined_call_operand.hbm [shape: bf16[512,128], index: 9, kind: output, shape index: {}]  }
   0x1   :  { %14 = sst [smem:[#allocation2]] %s4097_s8 }
   0x2   :  { %15 = vsyncpa [#allocation4], 0 }
   0x3   :  { %16 = vsyncpa [#allocation5], 0 }
   0x4   :  { %18 = vsyncpa [#allocation5 + $0x1], 0  ;;  %s3093_s11 = smov 0   ;;  %s3095_s12 = smov 0  }
   0x5   :  { %s3097_s13 = smov 0   ;;  %s3099_s14 = smov 0  }
   0x6 LB: > { %s3114_s8 = sadd.s32 4294967295, %s3033_s14   ;;  %s2212_s15 = sadd.s32 4294967294, %s3033_s14   ;;  %s3033_s14 = sphi %s3099_s14, %s4184_s14   ;;  %s3029_s13 = sphi %s3097_s13, %s4183_s13   ;;  %s3025_s12 = sphi %s3095_s12, %s4182_s12   ;;  %s3021_s11 = sphi %s3093_s11, %s4181_s11  }
   0x7   : > { %s3118_s16 = sadd.s32 1, %s3033_s14   ;;  %s225_s17 = sadd.s32 1, %s3029_s13 }
   0x8   : > { %s222_s18 = ssub.s32 %s3033_s14, %s3118_s16  ;;  %p235_p0 = scmp.ne.s32.totalorder %s3029_s13, %s3025_s12 }
   0x9   : > { %p223_p1 = scmp.eq.s32.totalorder %s222_s18, 0  ;;  %p236_p2 = scmp.eq.s32.totalorder %s3114_s8, 1 }
   0xa   : > { %p241_p3 = scmp.ne.s32.totalorder %s3025_s12, %s3021_s11  ;;  %p242_p4 = scmp.eq.s32.totalorder %s2212_s15, 1 }
   0xb   : > { %s3129_s19 = scalar_select %p223_p1, %s3029_s13, %s225_s17  }
   0xc   : > { %p3131_p5 = por %p236_p2, %p235_p0  ;;  %p3135_p6 = por %p242_p4, %p241_p3 }
   0xd   : > { %p2213_p7 = scmp.ge.s32.totalorder %s3033_s14, 1  ;;  %p249_p8 = scmp.lt.s32.totalorder %s3033_s14, 3 }
   0xe   : > { %p2851_p9 = scmp.eq.s32.totalorder %s3114_s8, 0  ;;  %s278_s24 = sshll.u32 %s4096_s7, 4  ;;  %s279_s24 = int_to_ptr.hbm [resolvable:$true] %s278_s24 }
   0xf   : > { %p250_p10 = pnand %p2213_p7, %p249_p8  ;;  %s3035_s25 = smov [#allocation3]  }
  0x10   : > { %s280_s26 = sshll.u32 %s3035_s25, 4  ;;  %s3036_s27 = smov 128   ;;  %s281_s26 = int_to_ptr.vmem [resolvable:$true] %s280_s26 }
  0x11   : > { %p2843_p11 = pneg %p250_p10  ;;  %s3037_s28 = smov 8  }
  0x12   : > { %308 = sbr.rel (%p250_p10) target bundleno = 1421 (0x58d), region = 56 }
  0x13   : > { %p2844_p12 = pnand %p2851_p9, %p2843_p11 }
  0x15   : > { %2846 = dma.hbm_to_vmem [thread:$0]  (!%p2844_p12), %s279_s24, 8192, %s281_s26, [#allocation4], %s3036_s27, %s3036_s27, %s3037_s28  }
  0x17   : > { %3012 = dma.done.wait (%p2851_p9), [#allocation4], 8192  }
  0x18   : > { %3014 = vsyncadd (%p2851_p9), [#allocation4], 4294959104  ;;  %s2219_s29 = sshll.u32 %s3114_s8, 5  ;;  %v389_v0 = vld [vmem:[%s4090_s1 + $0x10] sm:$0x3]  ;;  %vm538_vm0 = vcmask 1041408  }
  0x19   : > { %p346_p13 = scmp.lt.s32.totalorder %s2219_s29, 63  ;;  %v483_v1 = vunpack.c.l.b16 %v389_v0  ;;  %v2654_v4 = vld [vmem:[%s4090_s1 + $0x8] sm:$0xff]  ;;  %v2653_v5 = vld [vmem:[%s4090_s1] sm:$0xff]  ;;  %vm489_vm1 = vcmask 293888   ;;  %v2662_v62 = vld [vmem:[%s4092_s3 + $0x38] sm:$0xff]  ;;  %vm1113_vm7 = vcmask 130112  }
  0x1a   : > { %v3205_v38 = vld [vmem:[%s4091_s2] ss:$0 sm:$0xff]  ;;  %735 = vmatpush.bf16.msra.mxu1 %v2662_v62  ;;  %vm1117_vm8 = vcmask 195712   ;;  %vm1121_vm9 = vcmask 261312   ;;  %vm1125_vm10 = vcmask 326912   ;;  %vm1129_vm11 = vcmask 392512  }
  0x1b   : > { %v486_v2 = vpack.c.b16 %v483_v1, %v483_v1  ;;  %s4186_s29 = smov (!%p346_p13, %s2219_s29), 63  ;;  %vm1133_vm12 = vcmask 458112   ;;  %vm1137_vm13 = vcmask 523712   ;;  %vm1141_vm14 = vcmask 589312   ;;  %s342_s27 = sand.u32 1, %s3025_s12  }
  0x1c   : > { %s2220_s18 = sshll.u32 %s4186_s29, 2  ;;  %vm1145_vm15 = vcmask 654912   ;;  %s2218_s28 = sshll.u32 %s342_s27, 7 }
  0x1d   : > { %v540_v3 = vsel %vm538_vm0, %v486_v2, 0  ;;  %s3164_s26 = scalar_lea.vmem %s4089_s0, %s2220_s18  ;;  %vm1149_vm0 = vcmask 720512   ;;  %s3991_s29 = scalar_lea.vmem [#allocation6], %s2218_s28 }
  0x1e   : > { %547 = vmatpush.bf16.msra.mxu0 %v540_v3  ;;  %2831 = vmatpush.bf16.msra.mxu2 %v540_v3  ;;  %v2637_v6 = vld [vmem:[%s3164_s26] sm:$0xff]  ;;  %v2638_v7 = vld [vmem:[%s3164_s26 + $0x8] sm:$0xff]  ;;  %v2639_v8 = vld [vmem:[%s3164_s26 + $0x10] sm:$0xff]  ;;  %s2735_s30 = sshll.u32 %s3114_s8, 7  ;;  %s2135_s18 = sshll.u32 %s3991_s29, 4  ;;  %s2136_s18 = int_to_ptr.vmem [resolvable:$true] %s2135_s18 }
  0x1f   : > { %2832 = vmatpush.bf16.msra.mxu3 %v540_v3  ;;  %v2640_v9 = vld [vmem:[%s3164_s26 + $0x18] sm:$0xff]  ;;  %v2646_v10 = vld [vmem:[%s3164_s26 + $0x48] sm:$0xff]  ;;  %v2641_v11 = vld [vmem:[%s3164_s26 + $0x20] sm:$0xff]  ;;  %s2134_s17 = scalar_lea.hbm %s4098_s9, %s2735_s30  ;;  %s2123_s23 = scalar_lea.sflag [#allocation5], %s342_s27 }
  0x20   : > { %v2647_v12 = vld [vmem:[%s3164_s26 + $0x50] sm:$0xff]  ;;  %v2650_v13 = vld [vmem:[%s3164_s26 + $0x68] sm:$0xff]  ;;  %v2648_v15 = vld [vmem:[%s3164_s26 + $0x58] sm:$0xff]  ;;  %s2137_s22 = sshll.u32 %s2134_s17, 4  ;;  %s2987_s28 = scalar_lea.hbm %s4098_s9, 256  ;;  %s2138_s22 = int_to_ptr.hbm [resolvable:$true] %s2137_s22 }
  0x21   : > { %v2642_v14 = vld [vmem:[%s3164_s26 + $0x28] sm:$0xff]  ;;  %v2643_v16 = vld [vmem:[%s3164_s26 + $0x30] sm:$0xff]  ;;  %v2649_v18 = vld [vmem:[%s3164_s26 + $0x60] sm:$0xff]  ;;  %s2981_s8 = sshra.s32 %s2138_s22, 4  ;;  %s2982_s8 = int_to_ptr.hbm [resolvable:$true] %s2981_s8 }
  0x22   : > { %548 = vmatpush.bf16.msra.mxu0 %v2654_v4  ;;  %2833 = vmatpush.bf16.msra.mxu2 %v2654_v4  ;;  %v2651_v17 = vld [vmem:[%s3164_s26 + $0x70] sm:$0xff]  ;;  %v2644_v19 = vld [vmem:[%s3164_s26 + $0x38] sm:$0xff]  ;;  %v2645_v21 = vld [vmem:[%s3164_s26 + $0x40] sm:$0xff]  ;;  %s2983_s24 = scalar_lea.hbm %s2982_s8, 128  ;;  %p2988_p3 = scmp.lt.s32.totalorder %s2982_s8, %s4098_s9 }
  0x23   : > { %2834 = vmatpush.bf16.msra.mxu3 %v2654_v4  ;;  %v2652_v20 = vld [vmem:[%s3164_s26 + $0x78] sm:$0xff]  ;;  %v2661_v4 = vld [vmem:[%s4092_s3 + $0x30] sm:$0xff]  ;;  %s1368_s26 = sld [smem:[#allocation2]]  ;;  %p2984_p0 = scmp.ne.s32.totalorder %s2982_s8, %s2983_s24 }
  0x24   : > { %736 = vmatpush.bf16.msra.mxu1 %v2661_v4  ;;  %p2989_p4 = scmp.lt.s32.totalorder %s2987_s28, %s2983_s24 }
  0x25   : > { %p2985_p1 = pnand %p2984_p0, %p3131_p5 }
  0x26   : > { %549 = vmatpush.bf16.msra.mxu0 %v2653_v5  ;;  %2835 = vmatpush.bf16.msra.mxu2 %v2653_v5  ;;  %p2990_p7 = por %p2989_p4, %p2988_p3 }
  0x27   : > { %2836 = vmatpush.bf16.msra.mxu3 %v2653_v5  ;;  %p2986_p2 = pneg %p2985_p1 }
  0x29   : > { %2293 = vmatmul.msk.bf16.vlgmr.msra.gmra.mxu0 %vm489_vm1, %v2637_v6  ;;  %2302 = vmatmul.msk.bf16.vlgmr.msra.gmra.mxu2 %vm489_vm1, %v2646_v10  ;;  %v2660_v10 = vld [vmem:[%s4092_s3 + $0x28] sm:$0xff]  ;;  %p2991_p8 = pnand %p2990_p7, %p2986_p2 }
  0x2a   : > { %2306 = vmatmul.msk.bf16.vlgmr.msra.gmra.mxu3 %vm489_vm1, %v2650_v13  ;;  %737 = vmatpush.bf16.msra.mxu1 %v2660_v10 }
  0x39   : > { %2294 = vmatmul.msk.bf16.gmra.mxu0 %vm489_vm1, %v2638_v7  ;;  %2303 = vmatmul.msk.bf16.gmra.mxu2 %vm489_vm1, %v2647_v12 }
  0x3a   : > { %2307 = vmatmul.msk.bf16.gmra.mxu3 %vm489_vm1, %v2651_v17  ;;  %v2659_v17 = vld [vmem:[%s4092_s3 + $0x20] sm:$0xff] }
  0x3b   : > { %738 = vmatpush.bf16.msra.mxu1 %v2659_v17 }
  0x49   : > { %2295 = vmatmul.msk.bf16.gmra.mxu0 %vm489_vm1, %v2639_v8  ;;  %2304 = vmatmul.msk.bf16.gmra.mxu2 %vm489_vm1, %v2648_v15 }
  0x4a   : > { %2308 = vmatmul.msk.bf16.gmra.mxu3 %vm489_vm1, %v2652_v20 }
  0x59   : > { %2296 = vmatmul.msk.bf16.gmra.mxu0 %vm489_vm1, %v2640_v9  ;;  %2305 = vmatmul.msk.bf16.gmra.mxu2 %vm489_vm1, %v2649_v18 }
  0x69   : > { %2297 = vmatmul.msk.bf16.gmra.mxu0 %vm489_vm1, %v2641_v11 }
  0x79   : > { %2298 = vmatmul.msk.bf16.gmra.mxu0 %vm489_vm1, %v2642_v14 }
  0x89   : > { %2299 = vmatmul.msk.bf16.gmra.mxu0 %vm489_vm1, %v2643_v16 }
  0x99   : > { %2300 = vmatmul.msk.bf16.gmra.mxu0 %vm489_vm1, %v2644_v19 }
  0xa6   : > { %v551_v22 = vpop.f32.mrf.mxu0 }
  0xa7   : > { %v3211_v41 = vadd.f32 %v3205_v38, %v551_v22  ;;  %v2658_v22 = vld [vmem:[%s4092_s3 + $0x18] sm:$0xff] }
  0xa8   : > { %739 = vmatpush.bf16.msra.mxu1 %v2658_v22 }
  0xa9   : > { %2301 = vmatmul.msk.bf16.gmra.mxu0 %vm489_vm1, %v2645_v21  ;;  %vm1153_vm1 = vcmask 786112  }
  0xac   : > { %v596_v33 = vpop.f32.mrf.mxu2 }
  0xad   : > { %v3229_v51 = vpop.f32.mrf.mxu3 }
  0xae   : > { %v553_v23 = vpop.f32.mrf.mxu0 }
  0xaf   : > { %v3208_v39 = vadd.f32 %v3205_v38, %v553_v23 }
  0xb1   : > { %v631_v43 = vadd.f32 %v3208_v39, %v3211_v41 }
  0xb4   : > { %v3198_v35 = vpop.f32.mrf.mxu2 }
  0xb5   : > { %v618_v1 = vpop.f32.mrf.mxu3 }
  0xb6   : > { %v556_v24 = vpop.f32.mrf.mxu0 }
  0xb7   : > { %v3214_v42 = vadd.f32 %v3205_v38, %v556_v24 }
  0xb9   : > { %v632_v45 = vadd.f32 %v631_v43, %v3214_v42 }
  0xbc   : > { %v3200_v37 = vpop.f32.mrf.mxu2 }
  0xbd   : > { %v621_v16 = vpop.f32.mrf.mxu3 }
  0xbe   : > { %v558_v25 = vpop.f32.mrf.mxu0 }
  0xbf   : > { %v3219_v44 = vadd.f32 %v3205_v38, %v558_v25  ;;  %v3296_v25 = vadd.f32 %v3205_v38, %v596_v33  ;;  %v3312_v33 = vadd.f32 %v3205_v38, %v3200_v37 }
  0xc1   : > { %v633_v48 = vadd.f32 %v632_v45, %v3219_v44 }
  0xc4   : > { %v603_v47 = vpop.f32.mrf.mxu2 }
  0xc6   : > { %v561_v26 = vpop.f32.mrf.mxu0 }
  0xc7   : > { %v3223_v46 = vadd.f32 %v3205_v38, %v561_v26 }
  0xc9   : > { %v634_v52 = vadd.f32 %v633_v48, %v3223_v46 }
  0xcc   : > { %v606_v61 = vpop.f32.mrf.mxu2 }
  0xcd   : > { %v3323_v43 = vadd.f32 %v3205_v38, %v606_v61  ;;  %v3343_v61 = vadd.f32 %v3205_v38, %v3229_v51  ;;  %v2668_v51 = vld [vmem:[%s4094_s5 + $0x28] sm:$0xff] }
  0xce   : > { %v563_v27 = vpop.f32.mrf.mxu0 }
  0xcf   : > { %v3227_v49 = vadd.f32 %v3205_v38, %v563_v27  ;;  %v2657_v27 = vld [vmem:[%s4092_s3 + $0x10] sm:$0xff] }
  0xd0   : > { %740 = vmatpush.bf16.msra.mxu1 %v2657_v27 }
  0xd1   : > { %v635_v54 = vadd.f32 %v634_v52, %v3227_v49 }
  0xd4   : > { %v608_v13 = vpop.f32.mrf.mxu2 }
  0xd5   : > { %v3327_v37 = vadd.f32 %v3205_v38, %v608_v13 }
  0xd6   : > { %v566_v28 = vpop.f32.mrf.mxu0 }
  0xd7   : > { %v3233_v53 = vadd.f32 %v3205_v38, %v566_v28 }
  0xd9   : > { %v636_v56 = vadd.f32 %v635_v54, %v3233_v53 }
  0xdc   : > { %v611_v28 = vpop.f32.mrf.mxu2 }
  0xde   : > { %v568_v29 = vpop.f32.mrf.mxu0 }
  0xdf   : > { %v3237_v55 = vadd.f32 %v3205_v38, %v568_v29  ;;  %v3304_v29 = vadd.f32 %v3205_v38, %v3198_v35 }
  0xe1   : > { %v637_v58 = vadd.f32 %v636_v56, %v3237_v55 }
  0xe6   : > { %v571_v30 = vpop.f32.mrf.mxu0 }
  0xe7   : > { %v3241_v57 = vadd.f32 %v3205_v38, %v571_v30 }
  0xe9   : > { %v638_v63 = vadd.f32 %v637_v58, %v3241_v57 }
  0xee   : > { %v573_v31 = vpop.f32.mrf.mxu0 }
  0xef   : > { %v3245_v59 = vadd.f32 %v3205_v38, %v573_v31  ;;  %v623_v31 = vpop.f32.mrf.mxu3 }
  0xf1   : > { %v639_v2 = vadd.f32 %v638_v63, %v3245_v59  ;;  %v2669_v63 = vld [vmem:[%s4094_s5 + $0x30] sm:$0xff] }
  0xf6   : > { %v576_v32 = vpop.f32.mrf.mxu0 }
  0xf7   : > { %v3252_v0 = vadd.f32 %v3205_v38, %v576_v32  ;;  %v2656_v32 = vld [vmem:[%s4092_s3 + $0x8] sm:$0xff]  ;;  %v626_v54 = vpop.f32.mrf.mxu3 }
  0xf8   : > { %741 = vmatpush.bf16.msra.mxu1 %v2656_v32 }
  0xf9   : > { %v640_v5 = vadd.f32 %v639_v2, %v3252_v0  ;;  %v3350_v2 = vadd.f32 %v3205_v38, %v618_v1  ;;  %v3365_v1 = vadd.f32 %v3205_v38, %v626_v54  ;;  %v766_v54 = vld [vmem:[%s4095_s6] sm:$0x1] }
  0xfe   : > { %v578_v34 = vpop.f32.mrf.mxu0 }
  0xff   : > { %v3256_v3 = vadd.f32 %v3205_v38, %v578_v34 }
 0x101   : > { %v641_v7 = vadd.f32 %v640_v5, %v3256_v3  ;;  %v3354_v5 = vadd.f32 %v3205_v38, %v621_v16 }
 0x106   : > { %v581_v36 = vpop.f32.mrf.mxu0 }
 0x107   : > { %v3263_v6 = vadd.f32 %v3205_v38, %v581_v36  ;;  %v3316_v36 = vadd.f32 %v3205_v38, %v603_v47  ;;  %v3331_v47 = vadd.f32 %v3205_v38, %v611_v28 }
 0x109   : > { %v642_v11 = vadd.f32 %v641_v7, %v3263_v6 }
 0x10e   : > { %v583_v40 = vpop.f32.mrf.mxu0 }
 0x10f   : > { %v3267_v8 = vadd.f32 %v3205_v38, %v583_v40  ;;  %v2655_v40 = vld [vmem:[%s4092_s3] sm:$0xff] }
 0x110   : > { %742 = vmatpush.bf16.msra.mxu1 %v2655_v40 }
 0x111   : > { %v643_v14 = vadd.f32 %v642_v11, %v3267_v8  ;;  %v628_v11 = vpop.f32.mrf.mxu3 }
 0x112   : > { %v3373_v17 = vadd.f32 %v3205_v38, %v628_v11 }
 0x116   : > { %v586_v50 = vpop.f32.mrf.mxu0 }
 0x117   : > { %v3274_v12 = vadd.f32 %v3205_v38, %v586_v50  ;;  %v613_v50 = vpop.f32.mrf.mxu2 }
 0x118   : > { %v3336_v58 = vadd.f32 %v3205_v38, %v613_v50 }
 0x119   : > { %v644_v18 = vadd.f32 %v643_v14, %v3274_v12  ;;  %v2667_v14 = vld [vmem:[%s4094_s5 + $0x20] sm:$0xff] }
 0x11e   : > { %v588_v60 = vpop.f32.mrf.mxu0 }
 0x11f   : > { %v3278_v15 = vadd.f32 %v3205_v38, %v588_v60  ;;  %v2670_v60 = vld [vmem:[%s4094_s5 + $0x38] sm:$0xff] }
 0x120   : > { %815 = vmatpush.bf16.msrb.mxu2 %v2670_v60 }
 0x121   : > { %v645_v20 = vadd.f32 %v644_v18, %v3278_v15 }
 0x124   : > { %816 = vmatpush.bf16.msrb.mxu2 %v2669_v63 }
 0x126   : > { %v591_v9 = vpop.f32.mrf.mxu0 }
 0x127   : > { %v3285_v19 = vadd.f32 %v3205_v38, %v591_v9  ;;  %v3361_v9 = vadd.f32 %v3205_v38, %v623_v31  ;;  %v2663_v31 = vld [vmem:[%s4094_s5] sm:$0xff] }
 0x128   : > { %817 = vmatpush.bf16.msrb.mxu2 %v2668_v51 }
 0x129   : > { %v646_v23 = vadd.f32 %v645_v20, %v3285_v19  ;;  %v2666_v20 = vld [vmem:[%s4094_s5 + $0x18] sm:$0xff] }
 0x12c   : > { %818 = vmatpush.bf16.msrb.mxu2 %v2667_v14 }
 0x12e   : > { %v593_v21 = vpop.f32.mrf.mxu0 }
 0x12f   : > { %v3293_v24 = vadd.f32 %v3205_v38, %v593_v21  ;;  %v2664_v38 = vld [vmem:[%s4094_s5 + $0x8] sm:$0xff] }
 0x130   : > { %819 = vmatpush.bf16.msrb.mxu2 %v2666_v20 }
 0x131   : > { %v647_v26 = vadd.f32 %v646_v23, %v3293_v24  ;;  %v2665_v23 = vld [vmem:[%s4094_s5 + $0x10] sm:$0xff] }
 0x133   : > { %v648_v30 = vadd.f32 %v647_v26, %v3296_v25 }
 0x134   : > { %820 = vmatpush.bf16.msrb.mxu2 %v2665_v23 }
 0x135   : > { %v649_v34 = vadd.f32 %v648_v30, %v3304_v29 }
 0x137   : > { %v650_v35 = vadd.f32 %v649_v34, %v3312_v33 }
 0x138   : > { %821 = vmatpush.bf16.msrb.mxu2 %v2664_v38 }
 0x139   : > { %v651_v45 = vadd.f32 %v650_v35, %v3316_v36  ;;  %v686_v35 = vld [vmem:[%s4093_s4] sm:$0x1] }
 0x13b   : > { %v652_v48 = vadd.f32 %v651_v45, %v3323_v43 }
 0x13c   : > { %822 = vmatpush.bf16.msrb.mxu2 %v2663_v31 }
 0x13d   : > { %v653_v52 = vadd.f32 %v652_v48, %v3327_v37 }
 0x13f   : > { %v654_v56 = vadd.f32 %v653_v52, %v3331_v47 }
 0x141   : > { %v655_v62 = vadd.f32 %v654_v56, %v3336_v58 }
 0x143   : > { %v656_v4 = vadd.f32 %v655_v62, %v3343_v61 }
 0x145   : > { %v657_v7 = vadd.f32 %v656_v4, %v3350_v2 }
 0x147   : > { %v658_v10 = vadd.f32 %v657_v7, %v3354_v5 }
 0x149   : > { %v659_v13 = vadd.f32 %v658_v10, %v3361_v9 }
 0x14b   : > { %v660_v16 = vadd.f32 %v659_v13, %v3365_v1 }
 0x14d   : > { %v661_v18 = vadd.f32 %v660_v16, %v3373_v17 }
 0x14f   : > { %v662_v21 = vrot.slane %v661_v18, 4 }
 0x151   : > { %v663_v22 = vadd.f32 %v662_v21, %v661_v18 }
 0x153   : > { %v664_v26 = vrot.slane %v663_v22, 2 }
 0x155   : > { %v665_v27 = vadd.f32 %v664_v26, %v663_v22 }
 0x157   : > { %v666_v28 = vrot.slane %v665_v27, 1 }
 0x159   : > { %v667_v30 = vadd.f32 %v666_v28, %v665_v27 }
 0x15b   : > { %v668_v32 = vmul.f32 0.00390625, %v667_v30 }
 0x15d   : > { %v669_v34 = vpack.c.bf16 %v668_v32, %v668_v32 }
 0x15f   : > { %743 = vmatmul.bf16.vlgmr.msra.gmra.mxu1 %v669_v34 }
 0x1dc   : > { %v744_v40 = vpop.f32.mrf.mxu1 }
 0x1dd   : > { %v745_v45 = vadd.f32 %v744_v40, %v686_v35 }
 0x1df   : > { %v748_v48 = vmax.f32 %v745_v45, 0.0 }
 0x1e1   : > { %v749_v50 = vpack.c.bf16 %v748_v48, %v748_v48 }
 0x1e3   : > { %823 = vmatmul.bf16.vlgmr.msrb.gmra.mxu2 %v749_v50 }
 0x1e4   : > { %v746_v52 = vpop.f32.mrf.mxu1 }
 0x1e5   : > { %v2432_v52 = vld [vmem:[#allocation3 + $0x70] sm:$0xf] }
 0x266   : > { %v824_v56 = vpop.f32.mrf.mxu2 }
 0x267   : > { %v825_v60 = vadd.f32 %v824_v56, %v766_v54  ;;  %v2686_v54 = vld [vmem:[#allocation3 + $0x74] sm:$0xf0]  ;;  %v2424_v56 = vld [vmem:[#allocation3 + $0x60] sm:$0xf] }
 0x269   : > { %v2373_v62 = vmul.f32 -1.442695, %v825_v60  ;;  %v2433_v60 = vor.u32 %v2686_v54, %v2432_v52 }
 0x26b   : > { %2925 = vpow2.f32 %v2373_v62  ;;  %v2684_v62 = vld [vmem:[#allocation3 + $0x64] sm:$0xf0]  ;;  %1690 = vmatpush.bf16.msrb.mxu3 %v2433_v60 }
 0x26e   : > { %v826_v63 = vpop.f32.mrf.mxu2 }
 0x26f   : > { %v2425_v63 = vor.u32 %v2684_v62, %v2424_v56 }
 0x271   : > { %v2926_v4 = vpop.eup %2925  ;;  %1691 = vmatpush.bf16.msrb.mxu3 %v2425_v63 }
 0x272   : > { %v831_v7 = vadd.f32 1.0, %v2926_v4 }
 0x274   : > { %2927 = vrcp.f32 %v831_v7  ;;  %v843_v13 = vand.u32 2147483648, %v831_v7  ;;  %v841_v16 = vand.u32 2147483647, %v831_v7  ;;  %vm837_vm3 = vweird.f32 %v831_v7 }
 0x276   : > { %v844_v20 = vor.u32 1.1754944e-38, %v843_v13  ;;  %vm842_vm5 = vcmp.eq.f32.partialorder %v841_v16, 8.507059e+37  ;;  %v2682_v13 = vld [vmem:[#allocation3 + $0x54] sm:$0xf0] }
 0x27a   : > { %v2928_v51 = vpop.eup %2927 }
 0x27b   : > { %v833_v10 = vmul.f32 %v2928_v51, %v831_v7  ;;  %vm838_vm2 = vweird.f32 %v2928_v51 }
 0x27c   : > { %vm839_vm4 = vmor %vm837_vm3, %vm838_vm2  ;;  %vm1157_vm2 = vcmask 851712   ;;  %vm1161_vm3 = vcmask 917312  }
 0x27d   : > { %v834_v11 = vsub.f32 1.0, %v833_v10 }
 0x27f   : > { %v835_v14 = vmul.f32 %v2928_v51, %v834_v11  ;;  %v2416_v11 = vld [vmem:[#allocation3 + $0x50] sm:$0xf] }
 0x281   : > { %v836_v18 = vadd.f32 %v2928_v51, %v835_v14  ;;  %v2408_v14 = vld [vmem:[#allocation3 + $0x40] sm:$0xf] }
 0x283   : > { %v840_v21 = vsel %vm839_vm4, %v2928_v51, %v836_v18  ;;  %v2417_v18 = vor.u32 %v2682_v13, %v2416_v11  ;;  %vm1165_vm4 = vcmask 982912  }
 0x284   : > { %v845_v22 = vsel %vm842_vm5, %v844_v20, %v840_v21  ;;  %v2680_v20 = vld [vmem:[#allocation3 + $0x44] sm:$0xf0]  ;;  %vm1169_vm5 = vcmask 1048512  }
 0x285   : > { %v847_v23 = vmul.f32 2.0, %v845_v22  ;;  %1692 = vmatpush.bf16.msrb.mxu3 %v2417_v18  ;;  %v2409_v22 = vor.u32 %v2680_v20, %v2408_v14  ;;  %v2384_v20 = vld [vmem:[#allocation3 + $0x10] sm:$0xf] }
 0x287   : > { %v3394_v26 = vperm.slane %v847_v23, 0 }
 0x289   : > { %v3398_v27 = vmul.f32 %v3394_v26, %v3211_v41  ;;  %v3402_v38 = vmul.f32 %v3394_v26, %v3214_v42  ;;  %v3406_v28 = vmul.f32 %v3394_v26, %v3223_v46  ;;  %v3413_v30 = vmul.f32 %v3394_v26, %v3219_v44  ;;  %1693 = vmatpush.bf16.msrb.mxu3 %v2409_v22 }
 0x28a   : > { %v3417_v41 = vmul.f32 %v3394_v26, %v3227_v49  ;;  %v3421_v42 = vmul.f32 %v3394_v26, %v3208_v39  ;;  %v3428_v46 = vmul.f32 %v3394_v26, %v3237_v55  ;;  %v3432_v44 = vmul.f32 %v3394_v26, %v3241_v57 }
 0x28b   : > { %887 = vadd.xlane.f32.xlu1 %v3402_v38  ;;  %891 = vadd.xlane.f32.xlu2 %v3406_v28  ;;  %v3436_v49 = vmul.f32 %v3394_v26, %v3233_v53  ;;  %v3443_v39 = vmul.f32 %v3394_v26, %v3252_v0  ;;  %v3447_v55 = vmul.f32 %v3394_v26, %v3256_v3 }
 0x28c   : > { %883 = vadd.xlane.f32.xlu0 %v3398_v27  ;;  %4128 = vst [vmem:[#allocation9_spill] sm:$0xff] %v3428_v46  ;;  %v3451_v57 = vmul.f32 %v3394_v26, %v3245_v59  ;;  %v3458_v53 = vmul.f32 %v3394_v26, %v3267_v8  ;;  %v3462_v0 = vmul.f32 %v3394_v26, %v3274_v12 }
 0x28d   : > { %4129 = vst [vmem:[#allocation10_spill] sm:$0xff] %v3432_v44  ;;  %v3466_v3 = vmul.f32 %v3394_v26, %v3263_v6  ;;  %v3473_v59 = vmul.f32 %v3394_v26, %v3285_v19  ;;  %v3477_v8 = vmul.f32 %v3394_v26, %v3293_v24  ;;  %v3481_v12 = vmul.f32 %v3394_v26, %v3278_v15 }
 0x28e   : > { %4130 = vst [vmem:[#allocation11_spill] sm:$0xff] %v3436_v49  ;;  %v3488_v6 = vmul.f32 %v3394_v26, %v3304_v29  ;;  %v3492_v19 = vmul.f32 %v3394_v26, %v3312_v33  ;;  %v3496_v24 = vmul.f32 %v3394_v26, %v3296_v25  ;;  %v3503_v15 = vmul.f32 %v3394_v26, %v3323_v43 }
 0x28f   : > { %4131 = vst [vmem:[#allocation12_spill] sm:$0xff] %v3443_v39  ;;  %v3507_v29 = vmul.f32 %v3394_v26, %v3327_v37  ;;  %v3511_v33 = vmul.f32 %v3394_v26, %v3316_v36  ;;  %v3518_v25 = vmul.f32 %v3394_v26, %v3336_v58  ;;  %v3522_v43 = vmul.f32 %v3394_v26, %v3343_v61 }
 0x290   : > { %4132 = vst [vmem:[#allocation13_spill] sm:$0xff] %v3447_v55  ;;  %v3526_v37 = vmul.f32 %v3394_v26, %v3331_v47  ;;  %v4099_v36 = vlaneseq  ;;  %v3533_v31 = vmul.f32 %v3394_v26, %v3354_v5  ;;  %v3537_v58 = vmul.f32 %v3394_v26, %v3361_v9 }
 0x291   : > { %4133 = vst [vmem:[#allocation14_spill] sm:$0xff] %v3451_v57  ;;  %v3541_v61 = vmul.f32 %v3394_v26, %v3350_v2  ;;  %v3552_v5 = vmul.f32 %v3394_v26, %v3373_v17  ;;  %v3556_v9 = vmul.f32 %v3394_v26, %v3365_v1 }
 0x292   : > { %4134 = vst [vmem:[#allocation15_spill] sm:$0xff] %v3458_v53  ;;  %v3546_v47 = vand.u32 127, %v4099_v36 }
 0x293   : > { %889 = vadd.xlane.f32.xlu1 %v3413_v30  ;;  %893 = vadd.xlane.f32.xlu2 %v3417_v41  ;;  %4135 = vst [vmem:[#allocation16_spill] sm:$0xff] %v3462_v0 }
 0x294   : > { %885 = vadd.xlane.f32.xlu0 %v3421_v42  ;;  %4136 = vst [vmem:[#allocation17_spill] sm:$0xff] %v3466_v3  ;;  %vm979_vm6 = vcmp.lt.s32.totalorder %v3546_v47, 8  ;;  %v3612_v52 = vadd.s32 4294967280, %v3546_v47  ;;  %v3615_v63 = vadd.s32 4294967272, %v3546_v47  ;;  %v3626_v13 = vadd.s32 4294967264, %v3546_v47 }
 0x295   : > { %4137 = vst [vmem:[#allocation18_spill] sm:$0xff] %v3473_v59  ;;  %v982_v2 = vsel %vm979_vm6, %v3398_v27, -inf  ;;  %v984_v32 = vsel %vm979_vm6, %v3402_v38, -inf  ;;  %v985_v17 = vsel %vm979_vm6, %v3413_v30, -inf  ;;  %v983_v1 = vsel %vm979_vm6, %v3421_v42, -inf }
 0x296   : > { %4138 = vst [vmem:[#allocation19_spill] sm:$0xff] %v3477_v8  ;;  %v999_v34 = vsel %vm979_vm6, %v3477_v8, -inf  ;;  %v986_v35 = vsel %vm979_vm6, %v3406_v28, -inf  ;;  %v998_v40 = vsel %vm979_vm6, %v3473_v59, -inf  ;;  %v987_v45 = vsel %vm979_vm6, %v3417_v41, -inf }
 0x297   : > { %4139 = vst [vmem:[#allocation20_spill] sm:$0xff] %v3481_v12  ;;  %v1001_v48 = vsel %vm979_vm6, %v3488_v6, -inf  ;;  %v1000_v50 = vsel %vm979_vm6, %v3496_v24, -inf  ;;  %v1002_v4 = vsel %vm979_vm6, %v3492_v19, -inf  ;;  %v989_v7 = vsel %vm979_vm6, %v3428_v46, -inf }
 0x298   : > { %4140 = vst [vmem:[#allocation21_spill] sm:$0xff] %v3488_v6  ;;  %v988_v51 = vsel %vm979_vm6, %v3436_v49, -inf  ;;  %v990_v23 = vsel %vm979_vm6, %v3432_v44, -inf  ;;  %v1004_v26 = vsel %vm979_vm6, %v3503_v15, -inf  ;;  %v991_v18 = vsel %vm979_vm6, %v3451_v57, -inf }
 0x299   : > { %4141 = vst [vmem:[#allocation22_spill] sm:$0xff] %v3492_v19 }
 0x29a   : > { %4142 = vst [vmem:[#allocation23_spill] sm:$0xff] %v3496_v24 }
 0x29b   : > { %897 = vadd.xlane.f32.xlu1 %v3428_v46  ;;  %899 = vadd.xlane.f32.xlu2 %v3432_v44  ;;  %4143 = vst [vmem:[#allocation24_spill] sm:$0xff] %v3503_v15  ;;  %v2586_v46 = vld [vmem:[#allocation3 + $0x1a8] sm:$0xf0] }
 0x29c   : > { %895 = vadd.xlane.f32.xlu0 %v3436_v49  ;;  %4144 = vst [vmem:[#allocation25_spill] sm:$0xff] %v3507_v29  ;;  %v2723_v49 = vld [vmem:[#allocation3 + $0x1a4] sm:$0xf] }
 0x29d   : > { %4145 = vst [vmem:[#allocation26_spill] sm:$0xff] %v3511_v33 }
 0x29e   : > { %4146 = vst [vmem:[#allocation27_spill] sm:$0xff] %v3518_v25 }
 0x29f   : > { %4147 = vst [vmem:[#allocation28_spill] sm:$0xff] %v3522_v43 }
 0x2a0   : > { %4148 = vst [vmem:[#allocation29_spill] sm:$0xff] %v3526_v37 }
 0x2a1   : > { %4149 = vst [vmem:[#allocation30_spill] sm:$0xff] %v3533_v31 }
 0x2a2   : > { %4150 = vst [vmem:[#allocation31_spill] sm:$0xff] %v3537_v58 }
 0x2a3   : > { %903 = vadd.xlane.f32.xlu1 %v3443_v39  ;;  %905 = vadd.xlane.f32.xlu2 %v3447_v55  ;;  %4151 = vst [vmem:[#allocation32_spill] sm:$0xff] %v3541_v61 }
 0x2a4   : > { %901 = vadd.xlane.f32.xlu0 %v3451_v57  ;;  %4152 = vst [vmem:[#allocation33_spill] sm:$0xff] %v3552_v5  ;;  %v2554_v57 = vld [vmem:[#allocation3 + $0x168] sm:$0xf0] }
 0x2a5   : > { %4153 = vst [vmem:[#allocation34_spill] sm:$0xff] %v3556_v9 }
 0x2ab   : > { %909 = vadd.xlane.f32.xlu1 %v3458_v53  ;;  %911 = vadd.xlane.f32.xlu2 %v3462_v0 }
 0x2ac   : > { %907 = vadd.xlane.f32.xlu0 %v3466_v3 }
 0x2b3   : > { %915 = vadd.xlane.f32.xlu1 %v3473_v59  ;;  %917 = vadd.xlane.f32.xlu2 %v3477_v8  ;;  %v2731_v59 = vld [vmem:[#allocation3 + $0x1e4] sm:$0xf]  ;;  %v2618_v8 = vld [vmem:[#allocation3 + $0x1e8] sm:$0xf0] }
 0x2b4   : > { %913 = vadd.xlane.f32.xlu0 %v3481_v12 }
 0x2bb   : > { %921 = vadd.xlane.f32.xlu1 %v3488_v6  ;;  %923 = vadd.xlane.f32.xlu2 %v3492_v19 }
 0x2bc   : > { %919 = vadd.xlane.f32.xlu0 %v3496_v24 }
 0x2c3   : > { %927 = vadd.xlane.f32.xlu1 %v3503_v15  ;;  %929 = vadd.xlane.f32.xlu2 %v3507_v29 }
 0x2c4   : > { %925 = vadd.xlane.f32.xlu0 %v3511_v33 }
 0x2cb   : > { %933 = vadd.xlane.f32.xlu1 %v3518_v25  ;;  %935 = vadd.xlane.f32.xlu2 %v3522_v43 }
 0x2cc   : > { %931 = vadd.xlane.f32.xlu0 %v3526_v37 }
 0x2d3   : > { %939 = vadd.xlane.f32.xlu1 %v3533_v31  ;;  %941 = vadd.xlane.f32.xlu2 %v3537_v58 }
 0x2d4   : > { %937 = vadd.xlane.f32.xlu0 %v3541_v61 }
 0x2db   : > { %945 = vadd.xlane.f32.xlu1 %v3552_v5  ;;  %1014 = vmax.xlane.f32.xlu2 %v982_v2  ;;  %v1003_v2 = vsel %vm979_vm6, %v3511_v33, -inf  ;;  %v2730_v33 = vld [vmem:[#allocation3 + $0x1d4] sm:$0xf0] }
 0x2dc   : > { %943 = vadd.xlane.f32.xlu0 %v3556_v9 }
 0x2e3   : > { %1018 = vmax.xlane.f32.xlu1 %v984_v32  ;;  %1020 = vmax.xlane.f32.xlu2 %v985_v17  ;;  %v2400_v32 = vld [vmem:[#allocation3 + $0x30] sm:$0xf]  ;;  %v2678_v17 = vld [vmem:[#allocation3 + $0x34] sm:$0xf0] }
 0x2e4   : > { %1016 = vmax.xlane.f32.xlu0 %v983_v1 }
 0x2eb   : > { %1048 = vmax.xlane.f32.xlu1 %v999_v34  ;;  %1022 = vmax.xlane.f32.xlu2 %v986_v35  ;;  %v2401_v34 = vor.u32 %v2678_v17, %v2400_v32  ;;  %v2392_v35 = vld [vmem:[#allocation3 + $0x20] sm:$0xf] }
 0x2ec   : > { %1046 = vmax.xlane.f32.xlu0 %v998_v40  ;;  %v2676_v40 = vld [vmem:[#allocation3 + $0x24] sm:$0xf0] }
 0x2ed   : > { %1694 = vmatpush.bf16.msrb.mxu3 %v2401_v34  ;;  %v2393_v62 = vor.u32 %v2676_v40, %v2392_v35  ;;  %v2672_v34 = vld [vmem:[#allocation3 + $0x4] sm:$0xf0]  ;;  %v2702_v35 = vld [vmem:[#allocation3 + $0xf4] sm:$0xf0] }
 0x2f1   : > { %1695 = vmatpush.bf16.msrb.mxu3 %v2393_v62 }
 0x2f3   : > { %1024 = vmax.xlane.f32.xlu1 %v987_v45  ;;  %1052 = vmax.xlane.f32.xlu2 %v1001_v48 }
 0x2f4   : > { %1050 = vmax.xlane.f32.xlu0 %v1000_v50  ;;  %v3609_v50 = vadd.s32 4294967288, %v3546_v47 }
 0x2fb   : > { %1054 = vmax.xlane.f32.xlu1 %v1002_v4  ;;  %1028 = vmax.xlane.f32.xlu2 %v989_v7  ;;  %v1005_v4 = vsel %vm979_vm6, %v3507_v29, -inf  ;;  %v992_v7 = vsel %vm979_vm6, %v3443_v39, -inf }
 0x2fc   : > { %1026 = vmax.xlane.f32.xlu0 %v988_v51 }
 0x2fe   : > { %v888_v10 = vpop.xlane.xlu1 %887  ;;  %v892_v16 = vpop.xlane.xlu2 %891 }
 0x2ff   : > { %v884_v21 = vpop.xlane.xlu0 %883  ;;  %v949_v54 = vmul.f32 0.125, %v888_v10  ;;  %v951_v22 = vmul.f32 0.125, %v892_v16  ;;  %v3639_v16 = vadd.s32 4294967248, %v3546_v47 }
 0x300   : > { %v947_v45 = vmul.f32 0.125, %v884_v21  ;;  %v2674_v21 = vld [vmem:[#allocation3 + $0x14] sm:$0xf0] }
 0x301   : > { %v1116_v14 = vperm.slane %v949_v54, %v3612_v52 }
 0x302   : > { %v1110_v51 = vperm.slane %v947_v45, %v3546_v47 }
 0x303   : > { %1030 = vmax.xlane.f32.xlu1 %v990_v23  ;;  %1058 = vmax.xlane.f32.xlu2 %v1004_v26  ;;  %v2385_v26 = vor.u32 %v2674_v21, %v2384_v20 }
 0x304   : > { %1056 = vmax.xlane.f32.xlu0 %v1003_v2  ;;  %v2496_v2 = vld [vmem:[#allocation3 + $0xf0] sm:$0xf] }
 0x305   : > { %v2497_v54 = vor.u32 %v2702_v35, %v2496_v2  ;;  %1696 = vmatpush.bf16.msrb.mxu3 %v2385_v26  ;;  %v2488_v2 = vld [vmem:[#allocation3 + $0xe0] sm:$0xf] }
 0x306   : > { %v890_v1 = vpop.xlane.xlu1 %889  ;;  %v894_v48 = vpop.xlane.xlu2 %893 }
 0x307   : > { %v886_v56 = vpop.xlane.xlu0 %885  ;;  %v950_v11 = vmul.f32 0.125, %v890_v1  ;;  %v2376_v1 = vld [vmem:[#allocation3] sm:$0xf]  ;;  %v952_v62 = vmul.f32 0.125, %v894_v48  ;;  %1703 = vmatpush.bf16.msrb.mxu1 %v2497_v54  ;;  %v1007_v48 = vsel %vm979_vm6, %v3518_v25, -inf }
 0x308   : > { %v948_v60 = vmul.f32 0.125, %v886_v56  ;;  %v3636_v56 = vadd.s32 4294967256, %v3546_v47 }
 0x309   : > { %v1120_v40 = vperm.slane %v950_v11, %v3615_v63  ;;  %v993_v11 = vsel %vm979_vm6, %v3447_v55, -inf }
 0x30a   : > { %v1112_v10 = vperm.slane %v948_v60, %v3609_v50 }
 0x30b   : > { %1060 = vmax.xlane.f32.xlu1 %v1005_v4  ;;  %1034 = vmax.xlane.f32.xlu2 %v992_v7 }
 0x30c   : > { %v1114_v23 = vsel %vm1113_vm7, %v1112_v10, %v1110_v51  ;;  %1032 = vmax.xlane.f32.xlu0 %v991_v18  ;;  %v2377_v51 = vor.u32 %v2672_v34, %v2376_v1  ;;  %v1124_v10 = vperm.slane %v951_v22, %v3626_v13  ;;  %v1006_v22 = vsel %vm979_vm6, %v3526_v37, -inf }
 0x30d   : > { %v1118_v32 = vsel %vm1117_vm8, %v1116_v14, %v1114_v23  ;;  %v3647_v14 = vadd.s32 4294967240, %v3546_v47  ;;  %v1128_v23 = vperm.slane %v952_v62, %v3636_v56 }
 0x30e   : > { %v898_v17 = vpop.xlane.xlu1 %897  ;;  %v900_v45 = vpop.xlane.xlu2 %899  ;;  %v1122_v4 = vsel %vm1121_vm9, %v1120_v40, %v1118_v32  ;;  %1697 = vmatpush.bf16.msrb.mxu3 %v2377_v51  ;;  %v2700_v32 = vld [vmem:[#allocation3 + $0xe4] sm:$0xf0]  ;;  %v3661_v40 = vadd.s32 4294967224, %v3546_v47 }
 0x30f   : > { %v896_v60 = vpop.xlane.xlu0 %895  ;;  %v954_v18 = vmul.f32 0.125, %v898_v17  ;;  %v1126_v20 = vsel %vm1125_vm10, %v1124_v10, %v1122_v4  ;;  %v2480_v17 = vld [vmem:[#allocation3 + $0xd0] sm:$0xf]  ;;  %v2489_v54 = vor.u32 %v2700_v32, %v2488_v2  ;;  %v3664_v4 = vadd.s32 4294967232, %v3546_v47 }
 0x310   : > { %v953_v7 = vmul.f32 0.125, %v896_v60  ;;  %v1130_v34 = vsel %vm1129_vm11, %v1128_v23, %v1126_v20  ;;  %v2698_v60 = vld [vmem:[#allocation3 + $0xd4] sm:$0xf0]  ;;  %v955_v62 = vmul.f32 0.125, %v900_v45  ;;  %v1008_v20 = vsel %vm979_vm6, %v3522_v43, -inf }
 0x311   : > { %v1136_v1 = vperm.slane %v954_v18, %v3647_v14  ;;  %1704 = vmatpush.bf16.msrb.mxu1 %v2489_v54  ;;  %v3668_v18 = vadd.s32 4294967216, %v3546_v47  ;;  %v3683_v2 = vadd.s32 4294967208, %v3546_v47  ;;  %v2696_v54 = vld [vmem:[#allocation3 + $0xc4] sm:$0xf0] }
 0x312   : > { %v1132_v21 = vperm.slane %v953_v7, %v3639_v16  ;;  %v1140_v23 = vperm.slane %v955_v62, %v3664_v4 }
 0x313   : > { %1036 = vmax.xlane.f32.xlu1 %v993_v11  ;;  %1064 = vmax.xlane.f32.xlu2 %v1007_v48  ;;  %v2481_v11 = vor.u32 %v2698_v60, %v2480_v17  ;;  %v2464_v60 = vld [vmem:[#allocation3 + $0xb0] sm:$0xf] }
 0x314   : > { %1062 = vmax.xlane.f32.xlu0 %v1006_v22  ;;  %v1134_v7 = vsel %vm1133_vm12, %v1132_v21, %v1130_v34  ;;  %v995_v21 = vsel %vm979_vm6, %v3458_v53, -inf  ;;  %v2472_v34 = vld [vmem:[#allocation3 + $0xc0] sm:$0xf] }
 0x315   : > { %v1138_v22 = vsel %vm1137_vm13, %v1136_v1, %v1134_v7  ;;  %1705 = vmatpush.bf16.msrb.mxu1 %v2481_v11  ;;  %v3692_v11 = vadd.s32 4294967192, %v3546_v47 }
 0x316   : > { %v904_v26 = vpop.xlane.xlu1 %903  ;;  %v906_v35 = vpop.xlane.xlu2 %905  ;;  %v1142_v17 = vsel %vm1141_vm14, %v1140_v23, %v1138_v22 }
 0x317   : > { %v902_v51 = vpop.xlane.xlu0 %901  ;;  %v957_v48 = vmul.f32 0.125, %v904_v26  ;;  %v994_v26 = vsel %vm979_vm6, %v3466_v3, -inf  ;;  %v958_v62 = vmul.f32 0.125, %v906_v35  ;;  %v996_v35 = vsel %vm979_vm6, %v3462_v0, -inf  ;;  %v2704_v3 = vld [vmem:[#allocation3 + $0x104] sm:$0xf0] }
 0x318   : > { %v956_v10 = vmul.f32 0.125, %v902_v51  ;;  %v2602_v0 = vld [vmem:[#allocation3 + $0x1c8] sm:$0xf0] }
 0x319   : > { %v1148_v32 = vperm.slane %v957_v48, %v3668_v18 }
 0x31a   : > { %v1144_v45 = vperm.slane %v956_v10, %v3661_v40  ;;  %v3689_v10 = vadd.s32 4294967200, %v3546_v47 }
 0x31b   : > { %1066 = vmax.xlane.f32.xlu1 %v1008_v20  ;;  %1040 = vmax.xlane.f32.xlu2 %v995_v21  ;;  %v2473_v20 = vor.u32 %v2696_v54, %v2472_v34  ;;  %v2694_v21 = vld [vmem:[#allocation3 + $0xb4] sm:$0xf0] }
 0x31c   : > { %1038 = vmax.xlane.f32.xlu0 %v994_v26  ;;  %v1146_v7 = vsel %vm1145_vm15, %v1144_v45, %v1142_v17  ;;  %v2465_v22 = vor.u32 %v2694_v21, %v2464_v60  ;;  %v1152_v45 = vperm.slane %v958_v62, %v3683_v2  ;;  %v2692_v21 = vld [vmem:[#allocation3 + $0xa4] sm:$0xf0] }
 0x31d   : > { %1706 = vmatpush.bf16.msrb.mxu1 %v2473_v20  ;;  %v1150_v23 = vsel %vm1149_vm0, %v1148_v32, %v1146_v7  ;;  %v1009_v32 = vsel %vm979_vm6, %v3541_v61, -inf  ;;  %v2456_v20 = vld [vmem:[#allocation3 + $0xa0] sm:$0xf] }
 0x31e   : > { %v910_v1 = vpop.xlane.xlu1 %909  ;;  %v912_v51 = vpop.xlane.xlu2 %911  ;;  %v1154_v60 = vsel %vm1153_vm1, %v1152_v45, %v1150_v23  ;;  %v2457_v43 = vor.u32 %v2692_v21, %v2456_v20  ;;  %v1011_v45 = vsel %vm979_vm6, %v3537_v58, -inf  ;;  %v2688_v20 = vld [vmem:[#allocation3 + $0x84] sm:$0xf0]  ;;  %v2685_v21 = vld [vmem:[#allocation3 + $0x74] sm:$0xf] }
 0x31f   : > { %v908_v36 = vpop.xlane.xlu0 %907  ;;  %v960_v48 = vmul.f32 0.125, %v910_v1  ;;  %v1010_v1 = vsel %vm979_vm6, %v3533_v31, -inf  ;;  %v961_v34 = vmul.f32 0.125, %v912_v51  ;;  %v3713_v31 = vadd.s32 4294967176, %v3546_v47 }
 0x320   : > { %v959_v26 = vmul.f32 0.125, %v908_v36  ;;  %v3704_v36 = vadd.s32 4294967184, %v3546_v47 }
 0x321   : > { %v1160_v54 = vperm.slane %v960_v48, %v3692_v11  ;;  %1707 = vmatpush.bf16.msrb.mxu1 %v2465_v22 }
 0x322   : > { %v1156_v17 = vperm.slane %v959_v26, %v3689_v10  ;;  %v2448_v26 = vld [vmem:[#allocation3 + $0x90] sm:$0xf]  ;;  %v1164_v22 = vperm.slane %v961_v34, %v3704_v36 }
 0x323   : > { %1042 = vmax.xlane.f32.xlu1 %v996_v35  ;;  %1070 = vmax.xlane.f32.xlu2 %v1010_v1  ;;  %v2690_v1 = vld [vmem:[#allocation3 + $0x94] sm:$0xf0] }
 0x324   : > { %1068 = vmax.xlane.f32.xlu0 %v1009_v32  ;;  %v1158_v62 = vsel %vm1157_vm2, %v1156_v17, %v1154_v60  ;;  %v2449_v23 = vor.u32 %v2690_v1, %v2448_v26  ;;  %v1012_v32 = vsel %vm979_vm6, %v3556_v9, -inf }
 0x325   : > { %v1162_v48 = vsel %vm1161_vm3, %v1160_v54, %v1158_v62  ;;  %1708 = vmatpush.bf16.msrb.mxu1 %v2457_v43  ;;  %v997_v54 = vsel %vm979_vm6, %v3481_v12, -inf  ;;  %v2584_v12 = vld [vmem:[#allocation3 + $0x1a0] sm:$0xf] }
 0x326   : > { %v916_v7 = vpop.xlane.xlu1 %915  ;;  %v918_v35 = vpop.xlane.xlu2 %917  ;;  %v1166_v43 = vsel %vm1165_vm4, %v1164_v22, %v1162_v48  ;;  %v2426_v22 = vld [vmem:[#allocation3 + $0x68] sm:$0xf0] }
 0x327   : > { %v914_v51 = vpop.xlane.xlu0 %913  ;;  %v964_v9 = vmul.f32 0.125, %v918_v35  ;;  %v963_v58 = vmul.f32 0.125, %v916_v7  ;;  %v1013_v7 = vsel %vm979_vm6, %v3552_v5, -inf }
 0x328   : > { %v962_v61 = vmul.f32 0.125, %v914_v51  ;;  %v2434_v51 = vld [vmem:[#allocation3 + $0x78] sm:$0xf0] }
 0x329   : > { %1709 = vmatpush.bf16.msrb.mxu1 %v2449_v23  ;;  %v2437_v48 = vor.u32 %v2685_v21, %v2434_v51  ;;  %v1171_v29 = vperm.slane %v963_v58, %v3546_v47  ;;  %v2679_v51 = vld [vmem:[#allocation3 + $0x44] sm:$0xf] }
 0x32a   : > { %v1168_v17 = vperm.slane %v962_v61, %v3713_v31  ;;  %v2440_v61 = vld [vmem:[#allocation3 + $0x80] sm:$0xf] }
 0x32b   : > { %1072 = vmax.xlane.f32.xlu1 %v1011_v45  ;;  %1074 = vmax.xlane.f32.xlu2 %v1012_v32  ;;  %v2441_v1 = vor.u32 %v2688_v20, %v2440_v61  ;;  %v2683_v45 = vld [vmem:[#allocation3 + $0x64] sm:$0xf] }
 0x32c   : > { %1044 = vmax.xlane.f32.xlu0 %v997_v54  ;;  %v1170_v34 = vsel %vm1169_vm5, %v1168_v17, %v1166_v43  ;;  %v2429_v23 = vor.u32 %v2683_v45, %v2426_v22  ;;  %v2681_v17 = vld [vmem:[#allocation3 + $0x54] sm:$0xf]  ;;  %v2418_v43 = vld [vmem:[#allocation3 + $0x58] sm:$0xf0]  ;;  %v2410_v45 = vld [vmem:[#allocation3 + $0x48] sm:$0xf0] }
 0x32d   : > { %v3729_v62 = vpack.c.bf16 %v1170_v34, %v1170_v34  ;;  %1710 = vmatpush.bf16.msrb.mxu1 %v2441_v1  ;;  %v1172_v34 = vperm.slane %v964_v9, %v3609_v50  ;;  %v2421_v21 = vor.u32 %v2681_v17, %v2418_v43  ;;  %v2413_v5 = vor.u32 %v2679_v51, %v2410_v45  ;;  %v2677_v43 = vld [vmem:[#allocation3 + $0x34] sm:$0xf] }
 0x32e   : > { %v922_v60 = vpop.xlane.xlu1 %921  ;;  %v924_v26 = vpop.xlane.xlu2 %923 }
 0x32f   : > { %1698 = vmatmul.bf16.vlgmr.msrb.gmra.mxu3 %v3729_v62  ;;  %v920_v32 = vpop.xlane.xlu0 %919  ;;  %v966_v61 = vmul.f32 0.125, %v922_v60  ;;  %v967_v58 = vmul.f32 0.125, %v924_v26 }
 0x330   : > { %v965_v54 = vmul.f32 0.125, %v920_v32  ;;  %v1173_v32 = vsel %vm1113_vm7, %v1172_v34, %v1171_v29 }
 0x331   : > { %1742 = vmatpush.bf16.msra.mxu1 %v2437_v48  ;;  %v1176_v9 = vperm.slane %v966_v61, %v3615_v63  ;;  %v1178_v17 = vperm.slane %v967_v58, %v3626_v13 }
 0x332   : > { %v1174_v35 = vperm.slane %v965_v54, %v3612_v52 }
 0x334   : > { %1076 = vmax.xlane.f32.xlu0 %v1013_v7  ;;  %v1175_v60 = vsel %vm1117_vm8, %v1174_v35, %v1173_v32  ;;  %v2402_v7 = vld [vmem:[#allocation3 + $0x38] sm:$0xf0]  ;;  %v2675_v35 = vld [vmem:[#allocation3 + $0x24] sm:$0xf] }
 0x335   : > { %1743 = vmatpush.bf16.msra.mxu1 %v2429_v23  ;;  %v1177_v54 = vsel %vm1121_vm9, %v1176_v9, %v1175_v60  ;;  %v2405_v29 = vor.u32 %v2677_v43, %v2402_v7  ;;  %v2673_v60 = vld [vmem:[#allocation3 + $0x14] sm:$0xf] }
 0x336   : > { %v928_v20 = vpop.xlane.xlu1 %927  ;;  %v930_v1 = vpop.xlane.xlu2 %929  ;;  %v1179_v26 = vsel %vm1125_vm10, %v1178_v17, %v1177_v54 }
 0x337   : > { %v926_v48 = vpop.xlane.xlu0 %925  ;;  %v969_v15 = vmul.f32 0.125, %v928_v20  ;;  %v970_v51 = vmul.f32 0.125, %v930_v1 }
 0x338   : > { %v968_v22 = vmul.f32 0.125, %v926_v48 }
 0x339   : > { %1744 = vmatpush.bf16.msra.mxu1 %v2421_v21  ;;  %v1182_v34 = vperm.slane %v969_v15, %v3639_v16  ;;  %v2394_v21 = vld [vmem:[#allocation3 + $0x28] sm:$0xf0]  ;;  %v1184_v15 = vperm.slane %v970_v51, %v3647_v14 }
 0x33a   : > { %v1180_v23 = vperm.slane %v968_v22, %v3636_v56  ;;  %v2397_v48 = vor.u32 %v2675_v35, %v2394_v21  ;;  %v2386_v22 = vld [vmem:[#allocation3 + $0x18] sm:$0xf0] }
 0x33c   : > { %v1181_v20 = vsel %vm1129_vm11, %v1180_v23, %v1179_v26  ;;  %v2389_v23 = vor.u32 %v2673_v60, %v2386_v22  ;;  %v2378_v26 = vld [vmem:[#allocation3 + $0x8] sm:$0xf0] }
 0x33d   : > { %1745 = vmatpush.bf16.msra.mxu1 %v2413_v5  ;;  %v1183_v58 = vsel %vm1133_vm12, %v1182_v34, %v1181_v20 }
 0x33e   : > { %v934_v25 = vpop.xlane.xlu1 %933  ;;  %v936_v61 = vpop.xlane.xlu2 %935  ;;  %v1185_v17 = vsel %vm1137_vm13, %v1184_v15, %v1183_v58 }
 0x33f   : > { %v932_v45 = vpop.xlane.xlu0 %931  ;;  %v972_v9 = vmul.f32 0.125, %v934_v25  ;;  %v973_v43 = vmul.f32 0.125, %v936_v61 }
 0x340   : > { %v971_v32 = vmul.f32 0.125, %v932_v45 }
 0x341   : > { %1746 = vmatpush.bf16.msra.mxu1 %v2405_v29  ;;  %v1188_v54 = vperm.slane %v972_v9, %v3661_v40  ;;  %v2671_v29 = vld [vmem:[#allocation3 + $0x4] sm:$0xf]  ;;  %v1190_v45 = vperm.slane %v973_v43, %v3668_v18 }
 0x342   : > { %v1186_v5 = vperm.slane %v971_v32, %v3664_v4  ;;  %v2381_v51 = vor.u32 %v2671_v29, %v2378_v26 }
 0x344   : > { %v1187_v25 = vsel %vm1141_vm14, %v1186_v5, %v1185_v17 }
 0x345   : > { %1747 = vmatpush.bf16.msra.mxu1 %v2397_v48  ;;  %v1189_v20 = vsel %vm1145_vm15, %v1188_v54, %v1187_v25 }
 0x346   : > { %v940_v1 = vpop.xlane.xlu1 %939  ;;  %v942_v7 = vpop.xlane.xlu2 %941  ;;  %v1191_v61 = vsel %vm1149_vm0, %v1190_v45, %v1189_v20  ;;  %v2560_v20 = vld [vmem:[#allocation3 + $0x170] sm:$0xf]  ;;  %v2552_v45 = vld [vmem:[#allocation3 + $0x160] sm:$0xf] }
 0x347   : > { %v938_v34 = vpop.xlane.xlu0 %937  ;;  %v975_v35 = vmul.f32 0.125, %v940_v1  ;;  %v976_v48 = vmul.f32 0.125, %v942_v7 }
 0x348   : > { %v974_v21 = vmul.f32 0.125, %v938_v34 }
 0x349   : > { %1748 = vmatpush.bf16.msra.mxu1 %v2389_v23  ;;  %v1194_v9 = vperm.slane %v975_v35, %v3689_v10  ;;  %v1196_v1 = vperm.slane %v976_v48, %v3692_v11 }
 0x34a   : > { %v1192_v32 = vperm.slane %v974_v21, %v3683_v2 }
 0x34c   : > { %v1193_v58 = vsel %vm1153_vm1, %v1192_v32, %v1191_v61 }
 0x34d   : > { %1749 = vmatpush.bf16.msra.mxu1 %v2381_v51  ;;  %v1195_v54 = vsel %vm1157_vm2, %v1194_v9, %v1193_v58  ;;  %v2718_v51 = vld [vmem:[#allocation3 + $0x174] sm:$0xf0]  ;;  %v2716_v9 = vld [vmem:[#allocation3 + $0x164] sm:$0xf0] }
 0x34e   : > { %v946_v5 = vpop.xlane.xlu1 %945  ;;  %v3759_v22 = vpop.xlane.xlu2 %1014  ;;  %v1197_v25 = vsel %vm1161_vm3, %v1196_v1, %v1195_v54  ;;  %v2561_v32 = vor.u32 %v2718_v51, %v2560_v20  ;;  %v2553_v58 = vor.u32 %v2716_v9, %v2552_v45  ;;  %v2624_v54 = vld [vmem:[#allocation3 + $0x1f0] sm:$0xf]  ;;  %v2734_v1 = vld [vmem:[#allocation3 + $0x1f4] sm:$0xf0]  ;;  %v2732_v20 = vld [vmem:[#allocation3 + $0x1e4] sm:$0xf0] }
 0x34f   : > { %v978_v60 = vmul.f32 0.125, %v946_v5  ;;  %v944_v15 = vpop.xlane.xlu0 %943 }
 0x350   : > { %v977_v17 = vmul.f32 0.125, %v944_v15  ;;  %1716 = vmatpush.bf16.msra.mxu2 %v2561_v32  ;;  %v2714_v15 = vld [vmem:[#allocation3 + $0x154] sm:$0xf0] }
 0x351   : > { %v1200_v23 = vperm.slane %v978_v60, %v3713_v31  ;;  %v2544_v60 = vld [vmem:[#allocation3 + $0x150] sm:$0xf] }
 0x352   : > { %v1198_v43 = vperm.slane %v977_v17, %v3704_v36  ;;  %v2545_v17 = vor.u32 %v2714_v15, %v2544_v60  ;;  %v2710_v60 = vld [vmem:[#allocation3 + $0x134] sm:$0xf0]  ;;  %v2608_v15 = vld [vmem:[#allocation3 + $0x1d0] sm:$0xf] }
 0x353   : > { %v2609_v24 = vor.u32 %v2730_v33, %v2608_v15  ;;  %v2726_v15 = vld [vmem:[#allocation3 + $0x1b4] sm:$0xf0] }
 0x354   : > { %v1199_v7 = vsel %vm1165_vm4, %v1198_v43, %v1197_v25  ;;  %1717 = vmatpush.bf16.msra.mxu2 %v2553_v58  ;;  %v2712_v43 = vld [vmem:[#allocation3 + $0x144] sm:$0xf0]  ;;  %v2528_v58 = vld [vmem:[#allocation3 + $0x130] sm:$0xf] }
 0x355   : > { %v1201_v26 = vsel %vm1169_vm5, %v1200_v23, %v1199_v7  ;;  %v2536_v23 = vld [vmem:[#allocation3 + $0x140] sm:$0xf]  ;;  %v2625_v7 = vor.u32 %v2734_v1, %v2624_v54  ;;  %v2529_v37 = vor.u32 %v2710_v60, %v2528_v58  ;;  %v2708_v1 = vld [vmem:[#allocation3 + $0x124] sm:$0xf0]  ;;  %v2706_v58 = vld [vmem:[#allocation3 + $0x114] sm:$0xf0] }
 0x356   : > { %v3767_v29 = vpop.xlane.xlu1 %1018  ;;  %v3770_v34 = vpop.xlane.xlu2 %1020  ;;  %v3772_v35 = vpack.c.bf16 %v1201_v26, %v1201_v26  ;;  %v2616_v26 = vld [vmem:[#allocation3 + $0x1e0] sm:$0xf]  ;;  %v2537_v32 = vor.u32 %v2712_v43, %v2536_v23  ;;  %v2728_v23 = vld [vmem:[#allocation3 + $0x1c4] sm:$0xf0]  ;;  %v2733_v43 = vld [vmem:[#allocation3 + $0x1f4] sm:$0xf] }
 0x357   : > { %v3774_v21 = vpop.xlane.xlu0 %1016  ;;  %1729 = vmatpush.bf16.msra.mxu3 %v2625_v7  ;;  %v2617_v9 = vor.u32 %v2732_v20, %v2616_v26  ;;  %v2520_v54 = vld [vmem:[#allocation3 + $0x120] sm:$0xf]  ;;  %v2592_v60 = vld [vmem:[#allocation3 + $0x1b0] sm:$0xf] }
 0x358   : > { %1711 = vmatmul.bf16.vlgmr.msrb.gmra.mxu1 %v3772_v35  ;;  %1718 = vmatpush.bf16.msra.mxu2 %v2545_v17  ;;  %v2600_v17 = vld [vmem:[#allocation3 + $0x1c0] sm:$0xf]  ;;  %v2521_v7 = vor.u32 %v2708_v1, %v2520_v54  ;;  %v2621_v54 = vor.u32 %v2731_v59, %v2618_v8  ;;  %v2576_v59 = vld [vmem:[#allocation3 + $0x190] sm:$0xf]  ;;  %v2722_v8 = vld [vmem:[#allocation3 + $0x194] sm:$0xf0] }
 0x359   : > { %v2601_v20 = vor.u32 %v2728_v23, %v2600_v17  ;;  %v2504_v1 = vld [vmem:[#allocation3 + $0x100] sm:$0xf]  ;;  %v2724_v23 = vld [vmem:[#allocation3 + $0x1a4] sm:$0xf0] }
 0x35a   : > { %v2505_v17 = vor.u32 %v2704_v3, %v2504_v1  ;;  %v2577_v3 = vor.u32 %v2722_v8, %v2576_v59  ;;  %v2727_v1 = vld [vmem:[#allocation3 + $0x1c4] sm:$0xf]  ;;  %v2725_v59 = vld [vmem:[#allocation3 + $0x1b4] sm:$0xf]  ;;  %v2594_v8 = vld [vmem:[#allocation3 + $0x1b8] sm:$0xf0] }
 0x35b   : > { %1730 = vmatpush.bf16.msra.mxu3 %v2617_v9  ;;  %v2512_v9 = vld [vmem:[#allocation3 + $0x110] sm:$0xf] }
 0x35c   : > { %1719 = vmatpush.bf16.msra.mxu2 %v2537_v32  ;;  %v2513_v33 = vor.u32 %v2706_v58, %v2512_v9  ;;  %v2729_v9 = vld [vmem:[#allocation3 + $0x1d4] sm:$0xf]  ;;  %v2610_v58 = vld [vmem:[#allocation3 + $0x1d8] sm:$0xf0] }
 0x35e   : > { %v3777_v61 = vpop.xlane.xlu1 %1048  ;;  %v3779_v48 = vpop.xlane.xlu2 %1022 }
 0x35f   : > { %v3781_v5 = vpop.xlane.xlu0 %1046  ;;  %1731 = vmatpush.bf16.msra.mxu3 %v2609_v24 }
 0x360   : > { %1720 = vmatpush.bf16.msra.mxu2 %v2529_v37  ;;  %v2593_v37 = vor.u32 %v2726_v15, %v2592_v60  ;;  %v2613_v60 = vor.u32 %v2729_v9, %v2610_v58  ;;  %v2699_v15 = vld [vmem:[#allocation3 + $0xe4] sm:$0xf] }
 0x363   : > { %1732 = vmatpush.bf16.msra.mxu3 %v2601_v20  ;;  %v2585_v20 = vor.u32 %v2724_v23, %v2584_v12  ;;  %v2568_v12 = vld [vmem:[#allocation3 + $0x180] sm:$0xf]  ;;  %v2720_v23 = vld [vmem:[#allocation3 + $0x184] sm:$0xf0] }
 0x364   : > { %1721 = vmatpush.bf16.msra.mxu2 %v2521_v7  ;;  %v2498_v7 = vld [vmem:[#allocation3 + $0xf8] sm:$0xf0]  ;;  %v2569_v58 = vor.u32 %v2720_v23, %v2568_v12  ;;  %v2693_v23 = vld [vmem:[#allocation3 + $0xb4] sm:$0xf] }
 0x366   : > { %v3783_v25 = vpop.xlane.xlu1 %1024  ;;  %v3785_v51 = vpop.xlane.xlu2 %1052 }
 0x367   : > { %v3787_v45 = vpop.xlane.xlu0 %1050  ;;  %1733 = vmatpush.bf16.msra.mxu3 %v2593_v37 }
 0x368   : > { %1750 = vmatmul.bf16.vlgmr.msra.gmra.mxu1 %v3729_v62  ;;  %v2626_v62 = vld [vmem:[#allocation3 + $0x1f8] sm:$0xf0]  ;;  %1722 = vmatpush.bf16.msra.mxu2 %v2513_v33  ;;  %v2490_v33 = vld [vmem:[#allocation3 + $0xe8] sm:$0xf0] }
 0x369   : > { %v2629_v32 = vor.u32 %v2733_v43, %v2626_v62  ;;  %v2701_v43 = vld [vmem:[#allocation3 + $0xf4] sm:$0xf]  ;;  %v2493_v37 = vor.u32 %v2699_v15, %v2490_v33  ;;  %v2597_v15 = vor.u32 %v2725_v59, %v2594_v8  ;;  %v2474_v33 = vld [vmem:[#allocation3 + $0xc8] sm:$0xf0] }
 0x36b   : > { %1781 = vmatpush.bf16.msrb.mxu1 %v2629_v32  ;;  %v2501_v32 = vor.u32 %v2701_v43, %v2498_v7  ;;  %1734 = vmatpush.bf16.msra.mxu3 %v2585_v20  ;;  %v2697_v43 = vld [vmem:[#allocation3 + $0xd4] sm:$0xf] }
 0x36c   : > { %1723 = vmatpush.bf16.msra.mxu2 %v2505_v17  ;;  %v2482_v17 = vld [vmem:[#allocation3 + $0xd8] sm:$0xf0]  ;;  %v2717_v20 = vld [vmem:[#allocation3 + $0x174] sm:$0xf] }
 0x36e   : > { %v3790_v19 = vpop.xlane.xlu1 %1054  ;;  %v3792_v6 = vpop.xlane.xlu2 %1028 }
 0x36f   : > { %v3794_v26 = vpop.xlane.xlu0 %1026  ;;  %1782 = vmatpush.bf16.msrb.mxu1 %v2621_v54  ;;  %v2605_v54 = vor.u32 %v2727_v1, %v2602_v0  ;;  %1735 = vmatpush.bf16.msra.mxu3 %v2577_v3  ;;  %v2695_v0 = vld [vmem:[#allocation3 + $0xc4] sm:$0xf]  ;;  %v1237_v3 = vperm.slane %v3774_v21, %v3609_v50  ;;  %v1239_v21 = vperm.slane %v3767_v29, %v3612_v52 }
 0x370   : > { %1755 = vmatpush.bf16.msrb.mxu2 %v2501_v32  ;;  %v2562_v32 = vld [vmem:[#allocation3 + $0x178] sm:$0xf0]  ;;  %v2715_v1 = vld [vmem:[#allocation3 + $0x164] sm:$0xf]  ;;  %v2477_v44 = vor.u32 %v2695_v0, %v2474_v33  ;;  %v2458_v0 = vld [vmem:[#allocation3 + $0xa8] sm:$0xf0] }
 0x371   : > { %v2565_v39 = vor.u32 %v2717_v20, %v2562_v32  ;;  %v2557_v12 = vor.u32 %v2715_v1, %v2554_v57  ;;  %v2546_v32 = vld [vmem:[#allocation3 + $0x158] sm:$0xf0]  ;;  %v2711_v33 = vld [vmem:[#allocation3 + $0x144] sm:$0xf] }
 0x372   : > { %v2719_v29 = vld [vmem:[#allocation3 + $0x184] sm:$0xf] }
 0x373   : > { %1783 = vmatpush.bf16.msrb.mxu1 %v2613_v60  ;;  %v2485_v60 = vor.u32 %v2697_v43, %v2482_v17  ;;  %1736 = vmatpush.bf16.msra.mxu3 %v2569_v58  ;;  %v2466_v43 = vld [vmem:[#allocation3 + $0xb8] sm:$0xf0]  ;;  %v2713_v17 = vld [vmem:[#allocation3 + $0x154] sm:$0xf] }
 0x374   : > { %1756 = vmatpush.bf16.msrb.mxu2 %v2493_v37  ;;  %v2721_v58 = vld [vmem:[#allocation3 + $0x194] sm:$0xf]  ;;  %v2469_v8 = vor.u32 %v2693_v23, %v2466_v43  ;;  %v2538_v23 = vld [vmem:[#allocation3 + $0x148] sm:$0xf0] }
 0x376   : > { %v3796_v53 = vpop.xlane.xlu1 %1030  ;;  %v3798_v24 = vpop.xlane.xlu2 %1058 }
 0x377   : > { %v3800_v62 = vpop.xlane.xlu0 %1056  ;;  %1784 = vmatpush.bf16.msrb.mxu1 %v2605_v54  ;;  %1768 = vmatpush.bf16.msrb.mxu3 %v2565_v39  ;;  %v2589_v54 = vor.u32 %v2723_v49, %v2586_v46  ;;  %v2578_v39 = vld [vmem:[#allocation3 + $0x198] sm:$0xf0]  ;;  %v2549_v46 = vor.u32 %v2713_v17, %v2546_v32  ;;  %v2541_v17 = vor.u32 %v2711_v33, %v2538_v23 }
 0x378   : > { %1757 = vmatpush.bf16.msrb.mxu2 %v2485_v60  ;;  %v1236_v60 = vperm.slane %v3759_v22, %v3546_v47  ;;  %v2581_v49 = vor.u32 %v2721_v58, %v2578_v39  ;;  %v1268_v22 = vperm.slane %v3777_v61, %v3609_v50  ;;  %v2689_v58 = vld [vmem:[#allocation3 + $0x94] sm:$0xf]  ;;  %v2450_v39 = vld [vmem:[#allocation3 + $0x98] sm:$0xf0]  ;;  %v1241_v50 = vperm.slane %v3770_v34, %v3615_v63 }
 0x379   : > { %v1245_v61 = vperm.slane %v3783_v25, %v3636_v56 }
 0x37a   : > { %v1238_v57 = vsel %vm1113_vm7, %v1237_v3, %v1236_v60  ;;  %v1243_v3 = vperm.slane %v3779_v48, %v3626_v13  ;;  %v2709_v60 = vld [vmem:[#allocation3 + $0x134] sm:$0xf]  ;;  %v1247_v48 = vperm.slane %v3794_v26, %v3639_v16  ;;  %v1274_v26 = vperm.slane %v3790_v19, %v3626_v13  ;;  %v2522_v13 = vld [vmem:[#allocation3 + $0x128] sm:$0xf0] }
 0x37b   : > { %1785 = vmatpush.bf16.msrb.mxu1 %v2597_v15  ;;  %1769 = vmatpush.bf16.msrb.mxu3 %v2557_v12  ;;  %v2691_v15 = vld [vmem:[#allocation3 + $0xa4] sm:$0xf]  ;;  %v1240_v1 = vsel %vm1117_vm8, %v1239_v21, %v1238_v57  ;;  %v2570_v12 = vld [vmem:[#allocation3 + $0x188] sm:$0xf0] }
 0x37c   : > { %1758 = vmatpush.bf16.msrb.mxu2 %v2477_v44  ;;  %v2461_v44 = vor.u32 %v2691_v15, %v2458_v0  ;;  %v2573_v32 = vor.u32 %v2719_v29, %v2570_v12  ;;  %v1249_v0 = vperm.slane %v3792_v6, %v3647_v14 }
 0x37e   : > { %v3802_v55 = vpop.xlane.xlu1 %1060  ;;  %v3804_v7 = vpop.xlane.xlu2 %1034 }
 0x37f   : > { %v3806_v9 = vpop.xlane.xlu0 %1032  ;;  %1786 = vmatpush.bf16.msrb.mxu1 %v2589_v54  ;;  %1770 = vmatpush.bf16.msrb.mxu3 %v2549_v46  ;;  %v1267_v54 = vperm.slane %v3781_v5, %v3546_v47  ;;  %v2530_v5 = vld [vmem:[#allocation3 + $0x138] sm:$0xf0]  ;;  %v2453_v46 = vor.u32 %v2689_v58, %v2450_v39  ;;  %v1255_v58 = vperm.slane %v3804_v7, %v3668_v18 }
 0x380   : > { %1759 = vmatpush.bf16.msrb.mxu2 %v2469_v8  ;;  %v1270_v8 = vperm.slane %v3787_v45, %v3612_v52  ;;  %v2533_v34 = vor.u32 %v2709_v60, %v2530_v5  ;;  %v1272_v52 = vperm.slane %v3785_v51, %v3615_v63  ;;  %v2687_v63 = vld [vmem:[#allocation3 + $0x84] sm:$0xf]  ;;  %v2442_v51 = vld [vmem:[#allocation3 + $0x88] sm:$0xf0]  ;;  %v1253_v23 = vperm.slane %v3806_v9, %v3661_v40 }
 0x381   : > { %v1269_v57 = vsel %vm1113_vm7, %v1268_v22, %v1267_v54  ;;  %v1276_v22 = vperm.slane %v3800_v62, %v3636_v56  ;;  %v2445_v19 = vor.u32 %v2687_v63, %v2442_v51  ;;  %v2705_v54 = vld [vmem:[#allocation3 + $0x114] sm:$0xf]  ;;  %v1278_v62 = vperm.slane %v3798_v24, %v3639_v16  ;;  %v2506_v5 = vld [vmem:[#allocation3 + $0x108] sm:$0xf0] }
 0x382   : > { %v1271_v15 = vsel %vm1117_vm8, %v1270_v8, %v1269_v57 }
 0x383   : > { %1787 = vmatpush.bf16.msrb.mxu1 %v2581_v49  ;;  %v1242_v49 = vsel %vm1121_vm9, %v1241_v50, %v1240_v1  ;;  %1771 = vmatpush.bf16.msrb.mxu3 %v2541_v17  ;;  %v1251_v1 = vperm.slane %v3796_v53, %v3664_v4  ;;  %v1273_v6 = vsel %vm1121_vm9, %v1272_v52, %v1271_v15 }
 0x384   : > { %1760 = vmatpush.bf16.msrb.mxu2 %v2461_v44  ;;  %v1244_v25 = vsel %vm1125_vm10, %v1243_v3, %v1242_v49  ;;  %v2707_v44 = vld [vmem:[#allocation3 + $0x124] sm:$0xf]  ;;  %v2514_v3 = vld [vmem:[#allocation3 + $0x118] sm:$0xf0]  ;;  %v1275_v53 = vsel %vm1125_vm10, %v1274_v26, %v1273_v6 }
 0x385   : > { %v1246_v45 = vsel %vm1129_vm11, %v1245_v61, %v1244_v25  ;;  %v2525_v12 = vor.u32 %v2707_v44, %v2522_v13  ;;  %v1277_v9 = vsel %vm1129_vm11, %v1276_v22, %v1275_v53  ;;  %v2517_v16 = vor.u32 %v2705_v54, %v2514_v3 }
 0x386   : > { %v3810_v37 = vpop.xlane.xlu1 %1036  ;;  %v3812_v20 = vpop.xlane.xlu2 %1064  ;;  %v1248_v33 = vsel %vm1133_vm12, %v1247_v48, %v1246_v45 }
 0x387   : > { %v3816_v59 = vpop.xlane.xlu0 %1062  ;;  %1788 = vmatpush.bf16.msrb.mxu1 %v2573_v32  ;;  %1772 = vmatpush.bf16.msrb.mxu3 %v2533_v34  ;;  %v1250_v56 = vsel %vm1137_vm13, %v1249_v0, %v1248_v33  ;;  %v1280_v32 = vperm.slane %v3802_v55, %v3647_v14  ;;  %v1257_v50 = vperm.slane %v3810_v37, %v3683_v2  ;;  %v2703_v14 = vld [vmem:[#allocation3 + $0x104] sm:$0xf] }
 0x388   : > { %1761 = vmatpush.bf16.msrb.mxu2 %v2453_v46  ;;  %v1252_v17 = vsel %vm1141_vm14, %v1251_v1, %v1250_v56  ;;  %v1282_v24 = vperm.slane %v3816_v59, %v3664_v4  ;;  %v1279_v55 = vsel %vm1133_vm12, %v1278_v62, %v1277_v9  ;;  %v1284_v37 = vperm.slane %v3812_v20, %v3661_v40 }
 0x389   : > { %v1254_v60 = vsel %vm1145_vm15, %v1253_v23, %v1252_v17  ;;  %v1281_v7 = vsel %vm1137_vm13, %v1280_v32, %v1279_v55  ;;  %v2509_v4 = vor.u32 %v2703_v14, %v2506_v5 }
 0x38a   : > { %v1256_v48 = vsel %vm1149_vm0, %v1255_v58, %v1254_v60  ;;  %v1283_v59 = vsel %vm1141_vm14, %v1282_v24, %v1281_v7  ;;  %v4154_v58 = vlaneseq }
 0x38b   : > { %1773 = vmatpush.bf16.msrb.mxu3 %v2525_v12  ;;  %v1258_v46 = vsel %vm1153_vm1, %v1257_v50, %v1256_v48  ;;  %v1285_v40 = vsel %vm1145_vm15, %v1284_v37, %v1283_v59 }
 0x38c   : > { %1762 = vmatpush.bf16.msrb.mxu2 %v2445_v19 }
 0x38e   : > { %v3828_v43 = vpop.xlane.xlu1 %1066  ;;  %v3836_v47 = vpop.xlane.xlu2 %1040 }
 0x38f   : > { %v1039_v21 = vpop.xlane.xlu0 %1038  ;;  %v1261_v49 = vperm.slane %v3836_v47, %v3692_v11  ;;  %1774 = vmatpush.bf16.msrb.mxu3 %v2517_v16 }
 0x390   : > { %v1259_v8 = vperm.slane %v1039_v21, %v3689_v10  ;;  %v1286_v21 = vperm.slane %v3828_v43, %v3668_v18 }
 0x392   : > { %v1260_v34 = vsel %vm1157_vm2, %v1259_v8, %v1258_v46  ;;  %v1287_v15 = vsel %vm1149_vm0, %v1286_v21, %v1285_v40 }
 0x393   : > { %v1262_v20 = vsel %vm1161_vm3, %v1261_v49, %v1260_v34  ;;  %1775 = vmatpush.bf16.msrb.mxu3 %v2509_v4 }
 0x396   : > { %v1043_v29 = vpop.xlane.xlu1 %1042  ;;  %v1071_v61 = vpop.xlane.xlu2 %1070 }
 0x397   : > { %v1069_v39 = vpop.xlane.xlu0 %1068  ;;  %v1263_v57 = vperm.slane %v1043_v29, %v3704_v36  ;;  %v1290_v18 = vperm.slane %v1071_v61, %v3689_v10 }
 0x398   : > { %v1288_v25 = vperm.slane %v1069_v39, %v3683_v2  ;;  %v3906_v39 = vshrl.u32 %v4154_v58, 7 }
 0x399   : > { %v1264_v26 = vsel %vm1165_vm4, %v1263_v57, %v1262_v20 }
 0x39a   : > { %v1289_v43 = vsel %vm1153_vm1, %v1288_v25, %v1287_v15  ;;  %2891 = vset.pattern.permute.xlu1 %v3906_v39  ;;  %v3910_v50 = vadd.s32 16, %v3906_v39  ;;  %v3913_v61 = vadd.s32 8, %v3906_v39 }
 0x39b   : > { %v1291_v22 = vsel %vm1157_vm2, %v1290_v18, %v1289_v43  ;;  %v3923_v18 = vadd.s32 72, %v3906_v39  ;;  %v1853_v43 = vadd.s32 24, %v3906_v39 }
 0x39c   : > { %2893 = vset.pattern.permute.xlu0 %v3910_v50  ;;  %2892 = vset.pattern.permute.xlu2 %v3913_v61 }
 0x39e   : > { %v1073_v52 = vpop.xlane.xlu1 %1072  ;;  %v1075_v33 = vpop.xlane.xlu2 %1074 }
 0x39f   : > { %v1045_v45 = vpop.xlane.xlu0 %1044  ;;  %v1292_v0 = vperm.slane %v1073_v52, %v3692_v11  ;;  %v1294_v63 = vperm.slane %v1075_v33, %v3704_v36  ;;  %v1369_v36 = vstv %s1368_s26 }
 0x3a0   : > { %v1265_v47 = vperm.slane %v1045_v45, %v3713_v31 }
 0x3a1   : > { %v1293_v51 = vsel %vm1161_vm3, %v1292_v0, %v1291_v22  ;;  %v3927_v0 = vadd.s32 32, %v3906_v39  ;;  %v3938_v22 = vadd.s32 40, %v3906_v39 }
 0x3a2   : > { %v1266_v2 = vsel %vm1169_vm5, %v1265_v47, %v1264_v26  ;;  %v1295_v10 = vsel %vm1165_vm4, %v1294_v63, %v1293_v51  ;;  %v3941_v51 = vadd.s32 48, %v3906_v39 }
 0x3a3   : > { %v1302_v1 = vpack.c.bf16 %v1266_v2, %v1266_v2 }
 0x3a5   : > { %1724 = vmatmul.bf16.vlgmr.msra.gmra.mxu2 %v1302_v1 }
 0x3a7   : > { %v1077_v44 = vpop.xlane.xlu0 %1076 }
 0x3a8   : > { %v1296_v23 = vperm.slane %v1077_v44, %v3713_v31 }
 0x3aa   : > { %v1297_v19 = vsel %vm1169_vm5, %v1296_v23, %v1295_v10 }
 0x3ab   : > { %v1303_v13 = vpack.c.bf16 %v1297_v19, %v1297_v19 }
 0x3ad   : > { %1737 = vmatmul.bf16.vlgmr.msra.gmra.mxu3 %v1303_v13  ;;  %1789 = vmatmul.bf16.vlgmr.msrb.gmra.mxu1 %v1303_v13  ;;  %v3950_v13 = vadd.s32 56, %v3906_v39 }
 0x3b2   : > { %v1699_v11 = vpop.f32.mrf.mxu3 }
 0x3b3   : > { %v1700_v29 = vadd.f32 %v1699_v11, %v1369_v36 }
 0x3b5   : > { %1763 = vmatmul.bf16.vlgmr.msrb.gmra.mxu2 %v3772_v35 }
 0x3ba   : > { %v1701_v6 = vpop.f32.mrf.mxu3 }
 0x3bb   : > { %v1883_v6 = vadd.s32 64, %v3906_v39 }
 0x3bd   : > { %1776 = vmatmul.bf16.vlgmr.msrb.gmra.mxu3 %v1302_v1  ;;  %v3935_v1 = vadd.s32 112, %v3906_v39 }
 0x3d5   : > { %v1712_v12 = vpop.f32.mrf.mxu1 }
 0x3d6   : > { %v1713_v54 = vadd.f32 %v1712_v12, %v1700_v29 }
 0x3dd   : > { %v1714_v3 = vpop.f32.mrf.mxu1 }
 0x3e5   : > { %v1751_v53 = vpop.f32.mrf.mxu1 }
 0x3e6   : > { %v1752_v48 = vadd.f32 %v1751_v53, %v1369_v36  ;;  %v1895_v53 = vadd.s32 80, %v3906_v39 }
 0x3ed   : > { %v1753_v31 = vpop.f32.mrf.mxu1 }
 0x3ee   : > { %v3961_v31 = vadd.s32 88, %v3906_v39 }
 0x428   : > { %v1725_v56 = vpop.f32.mrf.mxu2 }
 0x429   : > { %v1726_v17 = vadd.f32 %v1725_v56, %v1713_v54  ;;  %v1913_v56 = vadd.s32 104, %v3906_v39 }
 0x42a   : > { %v1790_v62 = vpop.f32.mrf.mxu1 }
 0x430   : > { %v1727_v9 = vpop.f32.mrf.mxu2  ;;  %v1738_v32 = vpop.f32.mrf.mxu3 }
 0x431   : > { %v1739_v60 = vadd.f32 %v1738_v32, %v1726_v17  ;;  %v3973_v17 = vadd.s32 120, %v3906_v39 }
 0x432   : > { %v1792_v35 = vpop.f32.mrf.mxu1 }
 0x433   : > { %v2630_v16 = vmul.f32 -1.442695, %v1739_v60 }
 0x435   : > { %2929 = vpow2.f32 %v2630_v16 }
 0x438   : > { %v1740_v24 = vpop.f32.mrf.mxu3  ;;  %v1764_v8 = vpop.f32.mrf.mxu2 }
 0x439   : > { %v1765_v49 = vadd.f32 %v1764_v8, %v1752_v48  ;;  %v4156_v48 = vld [vmem:[#allocation11_spill] sm:$0xff] }
 0x43b   : > { %v2930_v55 = vpop.eup %2929 }
 0x43c   : > { %v1800_v14 = vadd.f32 1.0, %v2930_v55 }
 0x43e   : > { %2931 = vrcp.f32 %v1800_v14  ;;  %v1813_v21 = vand.u32 2147483648, %v1800_v14  ;;  %v1811_v25 = vand.u32 2147483647, %v1800_v14  ;;  %vm1807_vm7 = vweird.f32 %v1800_v14 }
 0x440   : > { %v1766_v5 = vpop.f32.mrf.mxu2  ;;  %v1777_v7 = vpop.f32.mrf.mxu3  ;;  %v1814_v40 = vor.u32 1.1754944e-38, %v1813_v21  ;;  %vm1812_vm9 = vcmp.eq.f32.partialorder %v1811_v25, 8.507059e+37 }
 0x441   : > { %v1778_v59 = vadd.f32 %v1777_v7, %v1765_v49  ;;  %v4155_v5 = vld [vmem:[#allocation9_spill] sm:$0xff]  ;;  %v4157_v49 = vld [vmem:[#allocation14_spill] sm:$0xff] }
 0x443   : > { %v1791_v45 = vadd.f32 %v1790_v62, %v1778_v59  ;;  %v1907_v62 = vadd.s32 96, %v3906_v39  ;;  %v4158_v59 = vld [vmem:[#allocation10_spill] sm:$0xff] }
 0x444   : > { %v2932_v46 = vpop.eup %2931 }
 0x445   : > { %v1803_v37 = vmul.f32 %v2932_v46, %v1800_v14  ;;  %vm1808_vm6 = vweird.f32 %v2932_v46  ;;  %v2631_v26 = vmul.f32 -1.442695, %v1791_v45  ;;  %v4159_v45 = vld [vmem:[#allocation12_spill] sm:$0xff] }
 0x446   : > { %vm1809_vm8 = vmor %vm1807_vm7, %vm1808_vm6 }
 0x447   : > { %v1804_v4 = vsub.f32 1.0, %v1803_v37  ;;  %2933 = vpow2.f32 %v2631_v26 }
 0x448   : > { %v1779_v34 = vpop.f32.mrf.mxu3 }
 0x449   : > { %v1805_v57 = vmul.f32 %v2932_v46, %v1804_v4 }
 0x44b   : > { %v1806_v52 = vadd.f32 %v2932_v46, %v1805_v57 }
 0x44d   : > { %v1810_v20 = vsel %vm1809_vm8, %v2932_v46, %v1806_v52  ;;  %v2934_v2 = vpop.eup %2933 }
 0x44e   : > { %v1815_v47 = vsel %vm1812_vm9, %v1814_v40, %v1810_v20  ;;  %v1801_v33 = vadd.f32 1.0, %v2934_v2  ;;  %v4160_v20 = vld [vmem:[#allocation13_spill] sm:$0xff]  ;;  %v4162_v2 = vld [vmem:[#allocation20_spill] sm:$0xff] }
 0x44f   : > { %v3917_v15 = vperm.slane %v1815_v47, 0 }
 0x450   : > { %2935 = vrcp.f32 %v1801_v33  ;;  %v1828_v11 = vand.u32 2147483648, %v1801_v33  ;;  %vm1822_vm11 = vweird.f32 %v1801_v33  ;;  %v1826_v36 = vand.u32 2147483647, %v1801_v33 }
 0x451   : > { %1849 = vperm.xlu0 %2893, %v3917_v15   ;;  %1843 = vperm.xlu2 %2892, %v3917_v15  }
 0x452   : > { %1837 = vperm.xlu1 %2891, %v3917_v15   ;;  %v1829_v12 = vor.u32 1.1754944e-38, %v1828_v11  ;;  %vm1827_vm13 = vcmp.eq.f32.partialorder %v1826_v36, 8.507059e+37  ;;  %v4165_v11 = vld [vmem:[#allocation19_spill] sm:$0xff]  ;;  %v4166_v36 = vld [vmem:[#allocation18_spill] sm:$0xff] }
 0x456   : > { %v2936_v63 = vpop.eup %2935 }
 0x457   : > { %v1818_v44 = vmul.f32 %v2936_v63, %v1801_v33  ;;  %vm1823_vm10 = vweird.f32 %v2936_v63 }
 0x458   : > { %vm1824_vm12 = vmor %vm1822_vm11, %vm1823_vm10 }
 0x459   : > { %2900 = vset.pattern.permute.xlu0 %v3923_v18  ;;  %2894 = vset.pattern.permute.xlu2 %v1853_v43  ;;  %v1819_v23 = vsub.f32 1.0, %v1818_v44 }
 0x45a   : > { %2895 = vset.pattern.permute.xlu1 %v3927_v0 }
 0x45b   : > { %v1820_v10 = vmul.f32 %v2936_v63, %v1819_v23  ;;  %v4164_v23 = vld [vmem:[#allocation15_spill] sm:$0xff] }
 0x45d   : > { %v1821_v19 = vadd.f32 %v2936_v63, %v1820_v10 }
 0x45f   : > { %v1825_v29 = vsel %vm1824_vm12, %v2936_v63, %v1821_v19 }
 0x460   : > { %v1830_v54 = vsel %vm1827_vm13, %v1829_v12, %v1825_v29 }
 0x461   : > { %1891 = vperm.xlu0 %2900, %v3917_v15   ;;  %1855 = vperm.xlu2 %2894, %v3917_v15   ;;  %v3954_v3 = vperm.slane %v1830_v54, 0 }
 0x462   : > { %1861 = vperm.xlu1 %2895, %v3917_v15  }
 0x469   : > { %2905 = vset.pattern.permute.xlu0 %v3935_v1  ;;  %2896 = vset.pattern.permute.xlu2 %v3938_v22 }
 0x46a   : > { %2897 = vset.pattern.permute.xlu1 %v3941_v51 }
 0x471   : > { %1921 = vperm.xlu0 %2905, %v3917_v15   ;;  %1867 = vperm.xlu2 %2896, %v3917_v15  }
 0x472   : > { %1873 = vperm.xlu1 %2897, %v3917_v15  }
 0x479   : > { %2910 = vset.pattern.permute.xlu0 %v1853_v43  ;;  %2898 = vset.pattern.permute.xlu2 %v3950_v13  ;;  %v4161_v43 = vld [vmem:[#allocation16_spill] sm:$0xff] }
 0x47a   : > { %2899 = vset.pattern.permute.xlu1 %v1883_v6 }
 0x481   : > { %1952 = vperm.xlu0 %2910, %v3954_v3   ;;  %1879 = vperm.xlu2 %2898, %v3917_v15  }
 0x482   : > { %1885 = vperm.xlu1 %2899, %v3917_v15  }
 0x489   : > { %2915 = vset.pattern.permute.xlu0 %v1883_v6  ;;  %2901 = vset.pattern.permute.xlu2 %v1895_v53 }
 0x48a   : > { %2902 = vset.pattern.permute.xlu1 %v3961_v31 }
 0x491   : > { %1982 = vperm.xlu0 %2915, %v3954_v3   ;;  %1897 = vperm.xlu2 %2901, %v3917_v15  }
 0x492   : > { %1903 = vperm.xlu1 %2902, %v3917_v15  }
 0x499   : > { %2920 = vset.pattern.permute.xlu0 %v1913_v56  ;;  %2903 = vset.pattern.permute.xlu2 %v1907_v62 }
 0x49a   : > { %2904 = vset.pattern.permute.xlu1 %v1913_v56  ;;  %v4168_v56 = vld [vmem:[#allocation23_spill] sm:$0xff] }
 0x4a1   : > { %2012 = vperm.xlu0 %2920, %v3954_v3   ;;  %1909 = vperm.xlu2 %2903, %v3917_v15  }
 0x4a2   : > { %1915 = vperm.xlu1 %2904, %v3917_v15  }
 0x4a9   : > { %2906 = vset.pattern.permute.xlu2 %v3973_v17  ;;  %2923 = vset.pattern.permute.xlu0 %v3973_v17 }
 0x4aa   : > { %2907 = vset.pattern.permute.xlu1 %v3906_v39 }
 0x4ab   : > { %v1844_v9 = vpop.permute.xlu2 %1843 }
 0x4ac   : > { %v2027_v16 = vmul.f32 %v1844_v9, %v3421_v42 }
 0x4b1   : > { %1927 = vperm.xlu2 %2906, %v3917_v15  }
 0x4b2   : > { %1934 = vperm.xlu1 %2907, %v3954_v3  }
 0x4b9   : > { %2908 = vset.pattern.permute.xlu2 %v3913_v61 }
 0x4ba   : > { %2909 = vset.pattern.permute.xlu1 %v3910_v50 }
 0x4bb   : > { %v1856_v32 = vpop.permute.xlu2 %1855 }
 0x4bc   : > { %v2029_v39 = vmul.f32 %v1856_v32, %v3413_v30 }
 0x4c1   : > { %1940 = vperm.xlu2 %2908, %v3954_v3  }
 0x4c2   : > { %1946 = vperm.xlu1 %2909, %v3954_v3  }
 0x4c3   : > { %v1850_v58 = vpop.permute.xlu0 %1849 }
 0x4c4   : > { %v2028_v60 = vmul.f32 %v1850_v58, %v3402_v38  ;;  %v1838_v35 = vpop.permute.xlu1 %1837 }
 0x4c5   : > { %v2026_v61 = vmul.f32 %v1838_v35, %v3398_v27  ;;  %v4170_v35 = vld [vmem:[#allocation26_spill] sm:$0xff] }
 0x4c6   : > { %v2744_v24 = vpack.c.bf16 %v2029_v39, %v2028_v60  ;;  %v4169_v39 = vld [vmem:[#allocation22_spill] sm:$0xff] }
 0x4c7   : > { %v2739_v50 = vpack.c.bf16 %v2027_v16, %v2026_v61 }
 0x4c8   : > { %2816 = vst [vmem:[%s3991_s29 + $0x8] sm:$0xff] %v2744_v24  }
 0x4c9   : > { %2740 = vst [vmem:[%s3991_s29] sm:$0xff] %v2739_v50   ;;  %2911 = vset.pattern.permute.xlu2 %v3927_v0 }
 0x4ca   : > { %2912 = vset.pattern.permute.xlu1 %v3938_v22 }
 0x4cb   : > { %v1868_v38 = vpop.permute.xlu2 %1867 }
 0x4cc   : > { %v2031_v30 = vmul.f32 %v1868_v38, %v3417_v41  ;;  %v4171_v38 = vld [vmem:[#allocation29_spill] sm:$0xff] }
 0x4d1   : > { %1958 = vperm.xlu2 %2911, %v3954_v3  }
 0x4d2   : > { %1964 = vperm.xlu1 %2912, %v3954_v3  }
 0x4d4   : > { %v1862_v27 = vpop.permute.xlu1 %1861 }
 0x4d5   : > { %v2030_v42 = vmul.f32 %v1862_v27, %v3406_v28  ;;  %v1892_v28 = vpop.permute.xlu0 %1891 }
 0x4d6   : > { %v2035_v4 = vmul.f32 %v1892_v28, %v4157_v49 }
 0x4d7   : > { %v2749_v8 = vpack.c.bf16 %v2031_v30, %v2030_v42  ;;  %v4172_v30 = vld [vmem:[#allocation27_spill] sm:$0xff] }
 0x4d9   : > { %2817 = vst [vmem:[%s3991_s29 + $0x10] sm:$0xff] %v2749_v8   ;;  %2913 = vset.pattern.permute.xlu2 %v3941_v51  ;;  %v4163_v51 = vld [vmem:[#allocation17_spill] sm:$0xff] }
 0x4da   : > { %2914 = vset.pattern.permute.xlu1 %v3950_v13 }
 0x4db   : > { %v1880_v55 = vpop.permute.xlu2 %1879 }
 0x4dc   : > { %v2033_v7 = vmul.f32 %v1880_v55, %v4155_v5 }
 0x4e1   : > { %1970 = vperm.xlu2 %2913, %v3954_v3  }
 0x4e2   : > { %1976 = vperm.xlu1 %2914, %v3954_v3  }
 0x4e3   : > { %v1922_v26 = vpop.permute.xlu0 %1921 }
 0x4e4   : > { %v1874_v14 = vpop.permute.xlu1 %1873  ;;  %v2040_v0 = vmul.f32 %v1922_v26, %v4161_v43  ;;  %v4179_v26 = vld [vmem:[#allocation34_spill] sm:$0xff]  ;;  %v4180_v43 = vld [vmem:[#allocation33_spill] sm:$0xff] }
 0x4e5   : > { %v2032_v46 = vmul.f32 %v1874_v14, %v4156_v48  ;;  %v4173_v14 = vld [vmem:[#allocation24_spill] sm:$0xff] }
 0x4e7   : > { %v2754_v41 = vpack.c.bf16 %v2033_v7, %v2032_v46  ;;  %v4174_v7 = vld [vmem:[#allocation25_spill] sm:$0xff] }
 0x4e9   : > { %2818 = vst [vmem:[%s3991_s29 + $0x18] sm:$0xff] %v2754_v41   ;;  %2916 = vset.pattern.permute.xlu2 %v3923_v18 }
 0x4ea   : > { %2917 = vset.pattern.permute.xlu1 %v1895_v53 }
 0x4eb   : > { %v1898_v57 = vpop.permute.xlu2 %1897 }
 0x4ec   : > { %v2036_v40 = vmul.f32 %v1898_v57, %v4159_v45  ;;  %v4178_v45 = vld [vmem:[#allocation30_spill] sm:$0xff] }
 0x4f1   : > { %1988 = vperm.xlu2 %2916, %v3954_v3  }
 0x4f2   : > { %1994 = vperm.xlu1 %2917, %v3954_v3  }
 0x4f3   : > { %v1953_v54 = vpop.permute.xlu0 %1952 }
 0x4f4   : > { %v1886_v37 = vpop.permute.xlu1 %1885 }
 0x4f5   : > { %v2034_v21 = vmul.f32 %v1886_v37, %v4158_v59  ;;  %v4175_v37 = vld [vmem:[#allocation32_spill] sm:$0xff] }
 0x4f7   : > { %v2759_v34 = vpack.c.bf16 %v2035_v4, %v2034_v21  ;;  %v4176_v4 = vld [vmem:[#allocation28_spill] sm:$0xff] }
 0x4f9   : > { %2819 = vst [vmem:[%s3991_s29 + $0x20] sm:$0xff] %v2759_v34   ;;  %2918 = vset.pattern.permute.xlu2 %v3961_v31 }
 0x4fa   : > { %2919 = vset.pattern.permute.xlu1 %v1907_v62 }
 0x4fb   : > { %v1910_v25 = vpop.permute.xlu2 %1909 }
 0x4fc   : > { %v2038_v44 = vmul.f32 %v1910_v25, %v4163_v51  ;;  %v4177_v25 = vld [vmem:[#allocation31_spill] sm:$0xff] }
 0x501   : > { %2000 = vperm.xlu2 %2918, %v3954_v3  }
 0x502   : > { %2006 = vperm.xlu1 %2919, %v3954_v3  }
 0x503   : > { %v1983_v24 = vpop.permute.xlu0 %1982 }
 0x504   : > { %v1904_v52 = vpop.permute.xlu1 %1903  ;;  %v2050_v27 = vmul.f32 %v1983_v24, %v4171_v38 }
 0x505   : > { %v2037_v47 = vmul.f32 %v1904_v52, %v4160_v20 }
 0x507   : > { %v2764_v15 = vpack.c.bf16 %v2037_v47, %v2036_v40 }
 0x509   : > { %2820 = vst [vmem:[%s3991_s29 + $0x28] sm:$0xff] %v2764_v15   ;;  %2921 = vset.pattern.permute.xlu2 %v3935_v1 }
 0x50a   : > { %2922 = vset.pattern.permute.xlu1 %v3973_v17 }
 0x50b   : > { %v1928_v18 = vpop.permute.xlu2 %1927 }
 0x50c   : > { %v2041_v33 = vmul.f32 %v1928_v18, %v4162_v2 }
 0x50e   : > { %v2774_v22 = vpack.c.bf16 %v2041_v33, %v2040_v0 }
 0x510   : > { %2822 = vst [vmem:[%s3991_s29 + $0x38] sm:$0xff] %v2774_v22  }
 0x511   : > { %2018 = vperm.xlu2 %2921, %v3954_v3  }
 0x512   : > { %2024 = vperm.xlu1 %2922, %v3954_v3   ;;  %v4167_v3 = vld [vmem:[#allocation21_spill] sm:$0xff] }
 0x513   : > { %v2045_v31 = vmul.f32 %v1953_v54, %v4167_v3  ;;  %v2013_v34 = vpop.permute.xlu0 %2012 }
 0x514   : > { %v1916_v63 = vpop.permute.xlu1 %1915  ;;  %v2055_v52 = vmul.f32 %v2013_v34, %v4177_v25 }
 0x515   : > { %v2039_v1 = vmul.f32 %v1916_v63, %v4164_v23 }
 0x517   : > { %v2769_v10 = vpack.c.bf16 %v2039_v1, %v2038_v44 }
 0x519   : > { %2821 = vst [vmem:[%s3991_s29 + $0x30] sm:$0xff] %v2769_v10  }
 0x51b   : > { %v1941_v19 = vpop.permute.xlu2 %1940 }
 0x51c   : > { %v2043_v6 = vmul.f32 %v1941_v19, %v4165_v11 }
 0x524   : > { %v1935_v13 = vpop.permute.xlu1 %1934 }
 0x525   : > { %v2042_v29 = vmul.f32 %v1935_v13, %v4166_v36 }
 0x527   : > { %v2779_v12 = vpack.c.bf16 %v2043_v6, %v2042_v29 }
 0x529   : > { %2823 = vst [vmem:[%s3991_s29 + $0x40] sm:$0xff] %v2779_v12  }
 0x52b   : > { %v1959_v9 = vpop.permute.xlu2 %1958 }
 0x52c   : > { %v2046_v60 = vmul.f32 %v1959_v9, %v4169_v39 }
 0x534   : > { %v1947_v53 = vpop.permute.xlu1 %1946 }
 0x535   : > { %v2044_v62 = vmul.f32 %v1947_v53, %v4168_v56 }
 0x537   : > { %v2784_v17 = vpack.c.bf16 %v2045_v31, %v2044_v62 }
 0x539   : > { %2824 = vst [vmem:[%s3991_s29 + $0x48] sm:$0xff] %v2784_v17  }
 0x53b   : > { %v1971_v32 = vpop.permute.xlu2 %1970 }
 0x53c   : > { %v2048_v5 = vmul.f32 %v1971_v32, %v4173_v14 }
 0x544   : > { %v1965_v58 = vpop.permute.xlu1 %1964 }
 0x545   : > { %v2047_v16 = vmul.f32 %v1965_v58, %v4170_v35 }
 0x547   : > { %v2789_v61 = vpack.c.bf16 %v2047_v16, %v2046_v60 }
 0x549   : > { %2825 = vst [vmem:[%s3991_s29 + $0x50] sm:$0xff] %v2789_v61  }
 0x54b   : > { %v1989_v50 = vpop.permute.xlu2 %1988 }
 0x54c   : > { %v2051_v42 = vmul.f32 %v1989_v50, %v4172_v30 }
 0x54e   : > { %v2799_v8 = vpack.c.bf16 %v2051_v42, %v2050_v27 }
 0x550   : > { %2827 = vst [vmem:[%s3991_s29 + $0x60] sm:$0xff] %v2799_v8  }
 0x554   : > { %v1977_v55 = vpop.permute.xlu1 %1976 }
 0x555   : > { %v2049_v48 = vmul.f32 %v1977_v55, %v4174_v7 }
 0x557   : > { %v2794_v46 = vpack.c.bf16 %v2049_v48, %v2048_v5 }
 0x559   : > { %2826 = vst [vmem:[%s3991_s29 + $0x58] sm:$0xff] %v2794_v46  }
 0x55b   : > { %v2001_v41 = vpop.permute.xlu2 %2000 }
 0x55c   : > { %v2053_v49 = vmul.f32 %v2001_v41, %v4175_v37 }
 0x564   : > { %v1995_v28 = vpop.permute.xlu1 %1994 }
 0x565   : > { %v2052_v59 = vmul.f32 %v1995_v28, %v4176_v4 }
 0x567   : > { %v2804_v21 = vpack.c.bf16 %v2053_v49, %v2052_v59 }
 0x569   : > { %2828 = vst [vmem:[%s3991_s29 + $0x68] sm:$0xff] %v2804_v21  }
 0x56b   : > { %v2019_v47 = vpop.permute.xlu2 %2018 }
 0x56c   : > { %v2056_v18 = vmul.f32 %v2019_v47, %v4179_v26 }
 0x574   : > { %v2007_v57 = vpop.permute.xlu1 %2006 }
 0x575   : > { %v2054_v40 = vmul.f32 %v2007_v57, %v4178_v45 }
 0x577   : > { %v2809_v20 = vpack.c.bf16 %v2055_v52, %v2054_v40 }
 0x579   : > { %2829 = vst [vmem:[%s3991_s29 + $0x70] sm:$0xff] %v2809_v20  }
 0x584   : > { %v2025_v15 = vpop.permute.xlu1 %2024 }
 0x585   : > { %v2057_v0 = vmul.f32 %v2025_v15, %v4180_v43 }
 0x587   : > { %v2814_v2 = vpack.c.bf16 %v2057_v0, %v2056_v18 }
 0x589   : > { %2830 = vst [vmem:[%s3991_s29 + $0x78] sm:$0xff] %v2814_v2  }
 0x58a   : > { %2994 = shalt.err (!%p2991_p8)
}
 0x58b   : > { %s3038_s27 = smov 64   ;;  %s3039_s29 = smov 4  }
 0x58c   : > { %2841 = dma.vmem_to_hbm [thread:$0]  (%p3131_p5), %s2136_s18, 2048, %s2138_s22, %s2123_s23, %s3038_s27, %s3038_s27, %s3039_s29  }
 0x58d PF: > { %p2853_p9 = scmp.ge.s32.totalorder %s3033_s14, 2  ;;  %s2152_s15 = sand.u32 1, %s3021_s11  }
 0x58e   : > { %s2153_s17 = scalar_lea.sflag [#allocation5], %s2152_s15 }
 0x58f   : > { %p2848_p10 = pnand %p2853_p9, %p3135_p6 }
 0x591   : > { %p2849_p11 = pneg %p2848_p10 }
 0x593   : > { %3016 = dma.done.wait (%p2849_p11), %s2153_s17, 2048  }
 0x594   : > { %3018 = vsyncadd (%p2849_p11), %s2153_s17, 4294965248  ;;  %p21_p12 = scmp.ge.s32.totalorder %s3118_s16, 4   ;;  %s4181_s11 = smov %s3025_s12 }
 0x595   : > { %s4182_s12 = smov %s3029_s13  ;;  %s4183_s13 = smov %s3129_s19 }
 0x596   : > { %s4184_s14 = smov %s3118_s16  ;;  %23 = sbr.rel (!%p21_p12) target bundleno = 6 (0x6), region = 96 }
 0x59b   :  { %2159 = vsyncpa [#allocation4], 1 }
 0x59c   :  { %2161 = vsyncpa [#allocation4 + $0x1], 1 }
 0x59d   :  { %2162 = vsyncpa [#allocation5], 1 }
 0x59e   :  { %2164 = vsyncpa [#allocation5 + $0x1], 1 }

</bundles_post_ra>
